<compile_context>
chip_gen: v6e
topology: v6e:2x2x1
jax: 0.10.0
libtpu: 0.0.40
codegen_flags: <defaults>
</compile_context>

<pallas_src>
import math
import functools

import jax
import jax.numpy as jnp
from jax import lax
from jax.experimental import pallas as pl
from jax.experimental.pallas import tpu as pltpu


# ----------------------------- helpers ---------------------------------------

def _layernorm(v, w, b, eps=1e-5):
    mu = jnp.mean(v, axis=-1, keepdims=True)
    var = jnp.mean((v - mu) * (v - mu), axis=-1, keepdims=True)
    return (v - mu) * lax.rsqrt(var + eps) * w + b


def _gelu_tanh(x):
    # PyTorch nn.GELU(approximate='tanh')
    c = math.sqrt(2.0 / math.pi)
    return 0.5 * x * (1.0 + jnp.tanh(c * (x + 0.044715 * x * x * x)))


def _is_pow2(n):
    return n > 0 and (n & (n - 1)) == 0


def _tpu_vmem_capacity_bytes():
    try:
        info = pltpu.get_tpu_info()
        cap = getattr(info, "vmem_capacity_bytes", None)
        if cap:
            return int(cap)
    except Exception:
        pass
    return 64 * 1024 * 1024                      # conservative (v7x-sized) default


def _pick_q_tile(T, vmem_cap):
    # 128 on 64 MiB-VMEM generations (v7x), 256 on 128 MiB parts (v5e/v6e):
    # keeps proj/fc GEMMs at M >= 128 while score/prob tiles stay small.
    target = 128 if vmem_cap <= 64 * 1024 * 1024 else 256
    for cand in (target, target // 2, 64, 32, 16, 8):
        if cand <= T and T % cand == 0:
            return cand
    return T


def _pick_head_group(n_head, q_tile, budget_bytes=6 * 1024 * 1024):
    # per-head kv-tile temporaries: s (f32) + p (f32) + p (bf16)
    per_head = q_tile * q_tile * (4 + 4 + 2)
    hg = max(1, min(n_head, budget_bytes // max(per_head, 1)))
    while n_head % hg:
        hg -= 1
    return hg


# ----------------------------- kernel 1: ln_1 + QKV ---------------------------

def _qkv_kernel(x_ref, ln1w_ref, ln1b_ref, wattn_ref, battn_ref,
                q_ref, k_ref, v_ref, *, n_head):
    f32 = jnp.float32
    x = x_ref[0].astype(f32)                                  # (rt, C)
    C = x.shape[-1]
    hd = C // n_head

    h = _layernorm(x, ln1w_ref[0], ln1b_ref[0])
    # single lane-dense (rt, C) x (C, 3C) MXU matmul; Q columns pre-scaled host-side
    qkv = jnp.dot(h.astype(wattn_ref.dtype), wattn_ref[...],
                  preferred_element_type=f32) + battn_ref[0]  # (rt, 3C)
    qkv = qkv.astype(q_ref.dtype)

    # one-time head-major relayout, done once per token in this cheap kernel
    # (kept OFF the attention hot loop of kernel 2)
    for hh in range(n_head):
        q_ref[0, hh] = qkv[:, 0 * C + hh * hd: 0 * C + (hh + 1) * hd]
        k_ref[0, hh] = qkv[:, 1 * C + hh * hd: 1 * C + (hh + 1) * hd]
        v_ref[0, hh] = qkv[:, 2 * C + hh * hd: 2 * C + (hh + 1) * hd]


# --------------------- kernel 2: attention + proj + MLP -----------------------

def _attn_mlp_kernel(x_ref, q_ref, k_ref, v_ref,
                     wproj3_ref, bproj_ref,
                     ln2w_ref, ln2b_ref,
                     wfc_ref, bfc_ref, wfc2_ref, bfc2_ref,
                     o_ref, *, n_head, head_group, q_tile):
    f32 = jnp.float32
    bf = wproj3_ref.dtype
    neg = f32(-1e30)

    qi = pl.program_id(1)                                     # query-tile index
    x = x_ref[0].astype(f32)                                  # (tq, C)
    C = x.shape[-1]
    hd = C // n_head

    # local causal mask for the DIAGONAL kv tile only; prefix tiles are unmasked
    row = lax.broadcasted_iota(jnp.int32, (q_tile, q_tile), 0)
    col = lax.broadcasted_iota(jnp.int32, (q_tile, q_tile), 1)
    diag_allow = (row >= col)[None, :, :]                     # (1, tq, tq)

    def kv_step(q_g, k_t, v_t, m, l, acc, mask):
        s = jnp.einsum('hqd,hkd->hqk', q_g, k_t, preferred_element_type=f32)
        if mask is not None:
            s = jnp.where(mask, s, neg)
        m_new = jnp.maximum(m, jnp.max(s, axis=-1, keepdims=True))
        alpha = jnp.exp(m - m_new)
        p = jnp.exp(s - m_new)
        l_new = alpha * l + jnp.sum(p, axis=-1, keepdims=True)
        acc_new = alpha * acc + jnp.einsum('hqk,hkd->hqd', p.astype(bf), v_t,
                                           preferred_element_type=f32)
        return m_new, l_new, acc_new

    y = jnp.zeros((q_tile, C), f32)
    for g in range(n_head // head_group):                     # static head groups
        hs = g * head_group
        he = hs + head_group
        q_g = q_ref[0, hs:he]                                 # (hg, tq, hd) bf16

        m0 = jnp.full((head_group, q_tile, 1), neg, f32)
        l0 = jnp.zeros((head_group, q_tile, 1), f32)
        a0 = jnp.zeros((head_group, q_tile, hd), f32)

        def body(kv, carry):
            m, l, acc = carry
            off = kv * q_tile
            if _is_pow2(q_tile):
                off = pl.multiple_of(off, q_tile)
            k_t = k_ref[0, hs:he, pl.ds(off, q_tile), :]
            v_t = v_ref[0, hs:he, pl.ds(off, q_tile), :]
            return kv_step(q_g, k_t, v_t, m, l, acc, None)

        # fully-visible kv tiles [0, qi): no mask / iota / select work at all
        m, l, acc = lax.fori_loop(0, qi, body, (m0, l0, a0))

        # diagonal kv tile (kv == qi): local (tq, tq) causal mask
        off = qi * q_tile
        if _is_pow2(q_tile):
            off = pl.multiple_of(off, q_tile)
        k_t = k_ref[0, hs:he, pl.ds(off, q_tile), :]
        v_t = v_ref[0, hs:he, pl.ds(off, q_tile), :]
        m, l, acc = kv_step(q_g, k_t, v_t, m, l, acc, diag_allow)

        # normalize the small (hg, tq, hd) output; exact reciprocal (off MXU path)
        o_g = acc * pl.reciprocal(l, approx=False)

        # head merge folded into the output projection (no concat relayout):
        #   y += sum_h o_g[h] @ w_proj[h]
        wp_g = wproj3_ref[hs:he]                              # (hg, hd, C) bf16
        y = y + jnp.sum(jnp.einsum('hqd,hdc->hqc', o_g.astype(bf), wp_g,
                                   preferred_element_type=f32), axis=0)

    # first residual
    x1 = x + y + bproj_ref[0]

    # ln_2 + MLP (GELU tanh) + second residual
    h2 = _layernorm(x1, ln2w_ref[0], ln2b_ref[0])
    h2 = jnp.dot(h2.astype(bf), wfc_ref[...], preferred_element_type=f32) + bfc_ref[0]
    h2 = _gelu_tanh(h2)
    h2 = jnp.dot(h2.astype(bf), wfc2_ref[...], preferred_element_type=f32) + bfc2_ref[0]

    o_ref[0] = (x1 + h2).astype(o_ref.dtype)


# ----------------------------- wrapper ----------------------------------------

def _rep_spec(a, single_buffer):
    nd = a.ndim
    idx = lambda b, i: (0,) * nd                   # grid-invariant weight block
    if single_buffer:
        return pl.BlockSpec(a.shape, idx, pipeline_mode=pl.Buffered(1))
    return pl.BlockSpec(a.shape, idx)


def _forward(x, prep, n_head, q_tile, head_group, vmem_limit, single_buffer_weights):
    B, T, C = x.shape
    hd = C // n_head
    nq = T // q_tile
    bf16 = jnp.bfloat16

    (ln1_w, ln1_b, w_attn, b_attn,
     w_proj3, b_proj, ln2_w, ln2_b,
     w_fc, b_fc, w_fc2, b_fc2) = prep

    rep = lambda a: _rep_spec(a, single_buffer_weights)

    # ---- kernel 1: ln_1 + fused QKV projection ------------------------------
    k1_weights = (ln1_w, ln1_b, w_attn, b_attn)
    q3, k3, v3 = pl.pallas_call(
        functools.partial(_qkv_kernel, n_head=n_head),
        out_shape=tuple(jax.ShapeDtypeStruct((B, n_head, T, hd), bf16)
                        for _ in range(3)),
        grid_spec=pltpu.PrefetchScalarGridSpec(
            num_scalar_prefetch=0,
            grid=(B, nq),
            in_specs=[pl.BlockSpec((1, q_tile, C), lambda b, i: (b, i, 0)),
                      rep(ln1_w), rep(ln1_b), rep(w_attn), rep(b_attn)],
            out_specs=tuple(pl.BlockSpec((1, n_head, q_tile, hd),
                                         lambda b, i: (b, 0, i, 0))
                            for _ in range(3)),
        ),
        compiler_params=pltpu.CompilerParams(
            dimension_semantics=("parallel", "parallel"),
            vmem_limit_bytes=vmem_limit),
        cost_estimate=pl.CostEstimate(
            flops=2 * B * T * C * 3 * C,
            transcendentals=B * T,
            bytes_accessed=(int(x.size) * x.dtype.itemsize
                            + 3 * B * T * C * 2
                            + sum(int(a.size) * a.dtype.itemsize for a in k1_weights))),
    )(x, ln1_w, ln1_b, w_attn, b_attn)

    # ---- kernel 2: causal attention + proj + residual + MLP + residual ------
    attn_flops = 2 * B * C * T * (T + q_tile)            # qk^T + pv, causal (~half dense)
    dense_flops = B * (2 * T * C * C + 16 * T * C * C)   # proj + fc + fc2
    transcend = B * (n_head * T * (T + q_tile) // 2 + T * 4 * C + 2 * T)
    k2_weights = (w_proj3, b_proj, ln2_w, ln2_b, w_fc, b_fc, w_fc2, b_fc2)
    bytes2 = (2 * int(x.size) * x.dtype.itemsize + 3 * B * T * C * 2
              + sum(int(a.size) * a.dtype.itemsize for a in k2_weights))

    out = pl.pallas_call(
        functools.partial(_attn_mlp_kernel, n_head=n_head,
                          head_group=head_group, q_tile=q_tile),
        out_shape=jax.ShapeDtypeStruct((B, T, C), x.dtype),
        grid_spec=pltpu.PrefetchScalarGridSpec(
            num_scalar_prefetch=0,
            grid=(B, nq),
            in_specs=[pl.BlockSpec((1, q_tile, C), lambda b, i: (b, i, 0)),
                      pl.BlockSpec((1, n_head, q_tile, hd), lambda b, i: (b, 0, i, 0)),
                      pl.BlockSpec((1, n_head, T, hd), lambda b, i: (b, 0, 0, 0)),
                      pl.BlockSpec((1, n_head, T, hd), lambda b, i: (b, 0, 0, 0)),
                      rep(w_proj3), rep(b_proj), rep(ln2_w), rep(ln2_b),
                      rep(w_fc), rep(b_fc), rep(w_fc2), rep(b_fc2)],
            out_specs=pl.BlockSpec((1, q_tile, C), lambda b, i: (b, i, 0)),
        ),
        compiler_params=pltpu.CompilerParams(
            dimension_semantics=("parallel", "parallel"),
            vmem_limit_bytes=vmem_limit),
        cost_estimate=pl.CostEstimate(
            flops=attn_flops + dense_flops,
            transcendentals=transcend,
            bytes_accessed=bytes2),
    )(x, q3, k3, v3, *k2_weights)
    return out


def gpt2_block(x, params, n_head):
    B, T, C = x.shape
    assert C % n_head == 0
    hd = C // n_head
    bf16, f32 = jnp.bfloat16, jnp.float32

    vmem_cap = _tpu_vmem_capacity_bytes()
    vmem_limit = int(max(32 * 1024 * 1024,
                         min(vmem_cap - 16 * 1024 * 1024, 112 * 1024 * 1024)))
    q_tile = _pick_q_tile(T, vmem_cap)
    head_group = _pick_head_group(n_head, q_tile)

    # fold the 1/sqrt(hd) attention scale into the Q columns of w_attn / b_attn
    scale = 1.0 / math.sqrt(hd)
    w_attn = params["w_attn"].astype(f32).at[:, :C].multiply(scale).astype(bf16)
    b_attn = params["b_attn"].astype(f32).at[:, :C].multiply(scale)

    # reshape w_proj to (H, hd, C) so the head merge folds into the projection
    w_proj3 = params["w_proj"].reshape(n_head, hd, C).astype(bf16)

    prep = (params["ln1_w"].astype(f32), params["ln1_b"].astype(f32),
            w_attn, b_attn,
            w_proj3, params["b_proj"].astype(f32),
            params["ln2_w"].astype(f32), params["ln2_b"].astype(f32),
            params["w_fc"].astype(bf16), params["b_fc"].astype(f32),
            params["w_fc2"].astype(bf16), params["b_fc2"].astype(f32))

    try:
        return _forward(x, prep, n_head, q_tile, head_group, vmem_limit,
                        single_buffer_weights=True)
    except Exception:
        # pl.Buffered(1) (single-buffered invariant weights) unsupported on this
        # jax/pallas build -> fall back to default double-buffered weight blocks.
        return _forward(x, prep, n_head, q_tile, head_group, vmem_limit,
                        single_buffer_weights=False)


# ------------------------- pure-JAX reference ----------------------------------

def gpt2_block_ref(x, p, n_head):
    B, T, C = x.shape
    hd = C // n_head

    def ln(v, w, b):
        mu = jnp.mean(v, axis=-1, keepdims=True)
        var = jnp.mean((v - mu) ** 2, axis=-1, keepdims=True)
        return (v - mu) / jnp.sqrt(var + 1e-5) * w + b

    h = ln(x, p["ln1_w"][0], p["ln1_b"][0])
    qkv = h @ p["w_attn"] + p["b_attn"][0]
    q, k, v = jnp.split(qkv, 3, axis=-1)
    q = q.reshape(B, T, n_head, hd).transpose(0, 2, 1, 3)
    k = k.reshape(B, T, n_head, hd).transpose(0, 2, 1, 3)
    v = v.reshape(B, T, n_head, hd).transpose(0, 2, 1, 3)
    att = jnp.einsum("bhqd,bhkd->bhqk", q, k) / math.sqrt(hd)
    mask = jnp.tril(jnp.ones((T, T), bool))
    att = jnp.where(mask, att, -1e30)
    att = jax.nn.softmax(att, axis=-1)
    y = jnp.einsum("bhqk,bhkd->bhqd", att, v)
    y = y.transpose(0, 2, 1, 3).reshape(B, T, C)
    y = y @ p["w_proj"] + p["b_proj"][0]
    x1 = x + y

    h2 = ln(x1, p["ln2_w"][0], p["ln2_b"][0])
    h2 = h2 @ p["w_fc"] + p["b_fc"][0]
    c = math.sqrt(2.0 / math.pi)
    h2 = 0.5 * h2 * (1.0 + jnp.tanh(c * (h2 + 0.044715 * h2 ** 3)))
    h2 = h2 @ p["w_fc2"] + p["b_fc2"][0]
    return x1 + h2


# --------------------------------- main -----------------------------------------

if __name__ == "__main__":
    # small GPT-2-like config that still exercises multiple q tiles, the
    # unmasked-prefix kv loop and (8,128)-aligned dense GEMM blocks
    B, T, C, n_head = 2, 512, 128, 4

    key = jax.random.PRNGKey(0)
    ks = jax.random.split(key, 8)
    s = 0.02  # GPT-2-style init scale

    # linear weights stored as (in, out) so forward is x @ W + b
    params = {
        "ln1_w": jnp.ones((1, C), jnp.float32),
        "ln1_b": jnp.zeros((1, C), jnp.float32),
        "w_attn": s * jax.random.normal(ks[0], (C, 3 * C), jnp.float32),
        "b_attn": jnp.zeros((1, 3 * C), jnp.float32),
        "w_proj": s * jax.random.normal(ks[1], (C, C), jnp.float32),
        "b_proj": jnp.zeros((1, C), jnp.float32),
        "ln2_w": jnp.ones((1, C), jnp.float32),
        "ln2_b": jnp.zeros((1, C), jnp.float32),
        "w_fc": s * jax.random.normal(ks[2], (C, 4 * C), jnp.float32),
        "b_fc": jnp.zeros((1, 4 * C), jnp.float32),
        "w_fc2": s * jax.random.normal(ks[3], (4 * C, C), jnp.float32),
        "b_fc2": jnp.zeros((1, C), jnp.float32),
    }

    x = jax.random.normal(ks[4], (B, T, C), jnp.float32)

    out = jax.block_until_ready(gpt2_block(x, params, n_head))
    ref = jax.block_until_ready(gpt2_block_ref(x, params, n_head))

    assert out.shape == (B, T, C)
    err = jnp.max(jnp.abs(out - ref))
    # bf16 MXU inputs with f32 accumulation -> loosened tolerance vs f32 ref
    assert jnp.allclose(out, ref, rtol=2e-2, atol=2e-2), f"max err {err}"

    print("KERNEL_OK")
</pallas_src>

<mosaic_0001>
module attributes {stable_mosaic.version = 11 : i64} {
  func.func @_qkv_kernel(%arg0: i32, %arg1: i32, %arg2: memref<1x128x128xf32, #tpu.memory_space<vmem>>, %arg3: memref<1x128xf32, #tpu.memory_space<vmem>>, %arg4: memref<1x128xf32, #tpu.memory_space<vmem>>, %arg5: memref<128x384xbf16, #tpu.memory_space<vmem>>, %arg6: memref<1x384xf32, #tpu.memory_space<vmem>>, %arg7: memref<1x4x128x32xbf16, #tpu.memory_space<vmem>>, %arg8: memref<1x4x128x32xbf16, #tpu.memory_space<vmem>>, %arg9: memref<1x4x128x32xbf16, #tpu.memory_space<vmem>>) attributes {dimension_semantics = [#tpu.dimension_semantics<parallel>, #tpu.dimension_semantics<parallel>], iteration_bounds = array<i64: 2, 4>, scalar_prefetch = 0 : i64, scratch_operands = 0 : i64, tpu.core_type = #tpu.core_type<tc>, window_params = [{transform_indices = @transform_0, window_bounds = array<i64: 1, 128, 128>}, {pipeline_mode = #tpu.pipeline_mode<synchronous>, transform_indices = @transform_1, window_bounds = array<i64: 1, 128>}, {pipeline_mode = #tpu.pipeline_mode<synchronous>, transform_indices = @transform_2, window_bounds = array<i64: 1, 128>}, {pipeline_mode = #tpu.pipeline_mode<synchronous>, transform_indices = @transform_3, window_bounds = array<i64: 128, 384>}, {pipeline_mode = #tpu.pipeline_mode<synchronous>, transform_indices = @transform_4, window_bounds = array<i64: 1, 384>}, {transform_indices = @transform_5, window_bounds = array<i64: 1, 4, 128, 32>}, {transform_indices = @transform_6, window_bounds = array<i64: 1, 4, 128, 32>}, {transform_indices = @transform_7, window_bounds = array<i64: 1, 4, 128, 32>}]} {
    %c0 = arith.constant 0 : index
    %c0_0 = arith.constant 0 : index
    %c0_1 = arith.constant 0 : index
    %0 = vector.load %arg2[%c0, %c0_0, %c0_1] : memref<1x128x128xf32, #tpu.memory_space<vmem>>, vector<1x128x128xf32>
    %1 = vector.shape_cast %0 : vector<1x128x128xf32> to vector<128x128xf32>
    %c0_2 = arith.constant 0 : index
    %c0_3 = arith.constant 0 : index
    %2 = vector.load %arg3[%c0_2, %c0_3] : memref<1x128xf32, #tpu.memory_space<vmem>>, vector<1x128xf32>
    %3 = vector.shape_cast %2 : vector<1x128xf32> to vector<128xf32>
    %c0_4 = arith.constant 0 : index
    %c0_5 = arith.constant 0 : index
    %4 = vector.load %arg4[%c0_4, %c0_5] : memref<1x128xf32, #tpu.memory_space<vmem>>, vector<1x128xf32>
    %5 = vector.shape_cast %4 : vector<1x128xf32> to vector<128xf32>
    %cst = arith.constant dense<0.000000e+00> : vector<128xf32>
    %6 = vector.multi_reduction <add>, %1, %cst [1] : vector<128x128xf32> to vector<128xf32>
    %7 = vector.shape_cast %6 : vector<128xf32> to vector<128x1xf32>
    %cst_6 = arith.constant 1.280000e+02 : f32
    %8 = vector.broadcast %cst_6 : f32 to vector<128x1xf32>
    %9 = arith.divf %7, %8 : vector<128x1xf32>
    %10 = vector.broadcast %9 : vector<128x1xf32> to vector<128x128xf32>
    %11 = arith.subf %1, %10 : vector<128x128xf32>
    %12 = vector.broadcast %9 : vector<128x1xf32> to vector<128x128xf32>
    %13 = arith.subf %1, %12 : vector<128x128xf32>
    %14 = arith.mulf %11, %13 : vector<128x128xf32>
    %cst_7 = arith.constant dense<0.000000e+00> : vector<128xf32>
    %15 = vector.multi_reduction <add>, %14, %cst_7 [1] : vector<128x128xf32> to vector<128xf32>
    %16 = vector.shape_cast %15 : vector<128xf32> to vector<128x1xf32>
    %cst_8 = arith.constant 1.280000e+02 : f32
    %17 = vector.broadcast %cst_8 : f32 to vector<128x1xf32>
    %18 = arith.divf %16, %17 : vector<128x1xf32>
    %19 = vector.broadcast %9 : vector<128x1xf32> to vector<128x128xf32>
    %20 = arith.subf %1, %19 : vector<128x128xf32>
    %cst_9 = arith.constant 9.99999974E-6 : f32
    %21 = vector.broadcast %cst_9 : f32 to vector<128x1xf32>
    %22 = arith.addf %18, %21 : vector<128x1xf32>
    %23 = math.rsqrt %22 : vector<128x1xf32>
    %24 = vector.broadcast %23 : vector<128x1xf32> to vector<128x128xf32>
    %25 = arith.mulf %20, %24 : vector<128x128xf32>
    %26 = vector.shape_cast %3 : vector<128xf32> to vector<1x128xf32>
    %27 = vector.broadcast %26 : vector<1x128xf32> to vector<128x128xf32>
    %28 = arith.mulf %25, %27 : vector<128x128xf32>
    %29 = vector.shape_cast %5 : vector<128xf32> to vector<1x128xf32>
    %30 = vector.broadcast %29 : vector<1x128xf32> to vector<128x128xf32>
    %31 = arith.addf %28, %30 : vector<128x128xf32>
    %32 = arith.truncf %31 : vector<128x128xf32> to vector<128x128xbf16>
    %c0_10 = arith.constant 0 : index
    %c0_11 = arith.constant 0 : index
    %33 = vector.load %arg5[%c0_10, %c0_11] : memref<128x384xbf16, #tpu.memory_space<vmem>>, vector<128x384xbf16>
    %cst_12 = arith.constant dense<0.000000e+00> : vector<128x384xf32>
    %34 = tpu.matmul %32, %33, %cst_12 {dimension_numbers = #tpu.dot_dimension_numbers<[1], [0], [0], [1], [0, 0, 1, 1], [], []>} : vector<128x128xbf16>, vector<128x384xbf16>, vector<128x384xf32> -> vector<128x384xf32>
    %c0_13 = arith.constant 0 : index
    %c0_14 = arith.constant 0 : index
    %35 = vector.load %arg6[%c0_13, %c0_14] : memref<1x384xf32, #tpu.memory_space<vmem>>, vector<1x384xf32>
    %36 = vector.shape_cast %35 : vector<1x384xf32> to vector<384xf32>
    %37 = vector.shape_cast %36 : vector<384xf32> to vector<1x384xf32>
    %38 = vector.broadcast %37 : vector<1x384xf32> to vector<128x384xf32>
    %39 = arith.addf %34, %38 : vector<128x384xf32>
    %40 = arith.truncf %39 : vector<128x384xf32> to vector<128x384xbf16>
    %41 = vector.extract_strided_slice %40 {offsets = [0, 0], sizes = [128, 32], strides = [1, 1]} : vector<128x384xbf16> to vector<128x32xbf16>
    %c0_15 = arith.constant 0 : index
    %c0_16 = arith.constant 0 : index
    %c0_17 = arith.constant 0 : index
    %c0_18 = arith.constant 0 : index
    %42 = vector.load %arg7[%c0_15, %c0_16, %c0_17, %c0_18] : memref<1x4x128x32xbf16, #tpu.memory_space<vmem>>, vector<1x1x128x32xbf16>
    %43 = vector.shape_cast %42 : vector<1x1x128x32xbf16> to vector<128x32xbf16>
    %44 = vector.shape_cast %41 : vector<128x32xbf16> to vector<1x1x128x32xbf16>
    tpu.vector_store %arg7[%c0_15, %c0_16, %c0_17, %c0_18], %44 {strides = array<i32>} : memref<1x4x128x32xbf16, #tpu.memory_space<vmem>>, vector<1x1x128x32xbf16>,
    %45 = vector.extract_strided_slice %40 {offsets = [0, 128], sizes = [128, 32], strides = [1, 1]} : vector<128x384xbf16> to vector<128x32xbf16>
    %c0_19 = arith.constant 0 : index
    %c0_20 = arith.constant 0 : index
    %c0_21 = arith.constant 0 : index
    %c0_22 = arith.constant 0 : index
    %46 = vector.load %arg8[%c0_19, %c0_20, %c0_21, %c0_22] : memref<1x4x128x32xbf16, #tpu.memory_space<vmem>>, vector<1x1x128x32xbf16>
    %47 = vector.shape_cast %46 : vector<1x1x128x32xbf16> to vector<128x32xbf16>
    %48 = vector.shape_cast %45 : vector<128x32xbf16> to vector<1x1x128x32xbf16>
    tpu.vector_store %arg8[%c0_19, %c0_20, %c0_21, %c0_22], %48 {strides = array<i32>} : memref<1x4x128x32xbf16, #tpu.memory_space<vmem>>, vector<1x1x128x32xbf16>,
    %49 = vector.extract_strided_slice %40 {offsets = [0, 256], sizes = [128, 32], strides = [1, 1]} : vector<128x384xbf16> to vector<128x32xbf16>
    %c0_23 = arith.constant 0 : index
    %c0_24 = arith.constant 0 : index
    %c0_25 = arith.constant 0 : index
    %c0_26 = arith.constant 0 : index
    %50 = vector.load %arg9[%c0_23, %c0_24, %c0_25, %c0_26] : memref<1x4x128x32xbf16, #tpu.memory_space<vmem>>, vector<1x1x128x32xbf16>
    %51 = vector.shape_cast %50 : vector<1x1x128x32xbf16> to vector<128x32xbf16>
    %52 = vector.shape_cast %49 : vector<128x32xbf16> to vector<1x1x128x32xbf16>
    tpu.vector_store %arg9[%c0_23, %c0_24, %c0_25, %c0_26], %52 {strides = array<i32>} : memref<1x4x128x32xbf16, #tpu.memory_space<vmem>>, vector<1x1x128x32xbf16>,
    %53 = vector.extract_strided_slice %40 {offsets = [0, 32], sizes = [128, 32], strides = [1, 1]} : vector<128x384xbf16> to vector<128x32xbf16>
    %c0_27 = arith.constant 0 : index
    %c1 = arith.constant 1 : index
    %c0_28 = arith.constant 0 : index
    %c0_29 = arith.constant 0 : index
    %54 = vector.load %arg7[%c0_27, %c1, %c0_28, %c0_29] : memref<1x4x128x32xbf16, #tpu.memory_space<vmem>>, vector<1x1x128x32xbf16>
    %55 = vector.shape_cast %54 : vector<1x1x128x32xbf16> to vector<128x32xbf16>
    %56 = vector.shape_cast %53 : vector<128x32xbf16> to vector<1x1x128x32xbf16>
    tpu.vector_store %arg7[%c0_27, %c1, %c0_28, %c0_29], %56 {strides = array<i32>} : memref<1x4x128x32xbf16, #tpu.memory_space<vmem>>, vector<1x1x128x32xbf16>,
    %57 = vector.extract_strided_slice %40 {offsets = [0, 160], sizes = [128, 32], strides = [1, 1]} : vector<128x384xbf16> to vector<128x32xbf16>
    %c0_30 = arith.constant 0 : index
    %c1_31 = arith.constant 1 : index
    %c0_32 = arith.constant 0 : index
    %c0_33 = arith.constant 0 : index
    %58 = vector.load %arg8[%c0_30, %c1_31, %c0_32, %c0_33] : memref<1x4x128x32xbf16, #tpu.memory_space<vmem>>, vector<1x1x128x32xbf16>
    %59 = vector.shape_cast %58 : vector<1x1x128x32xbf16> to vector<128x32xbf16>
    %60 = vector.shape_cast %57 : vector<128x32xbf16> to vector<1x1x128x32xbf16>
    tpu.vector_store %arg8[%c0_30, %c1_31, %c0_32, %c0_33], %60 {strides = array<i32>} : memref<1x4x128x32xbf16, #tpu.memory_space<vmem>>, vector<1x1x128x32xbf16>,
    %61 = vector.extract_strided_slice %40 {offsets = [0, 288], sizes = [128, 32], strides = [1, 1]} : vector<128x384xbf16> to vector<128x32xbf16>
    %c0_34 = arith.constant 0 : index
    %c1_35 = arith.constant 1 : index
    %c0_36 = arith.constant 0 : index
    %c0_37 = arith.constant 0 : index
    %62 = vector.load %arg9[%c0_34, %c1_35, %c0_36, %c0_37] : memref<1x4x128x32xbf16, #tpu.memory_space<vmem>>, vector<1x1x128x32xbf16>
    %63 = vector.shape_cast %62 : vector<1x1x128x32xbf16> to vector<128x32xbf16>
    %64 = vector.shape_cast %61 : vector<128x32xbf16> to vector<1x1x128x32xbf16>
    tpu.vector_store %arg9[%c0_34, %c1_35, %c0_36, %c0_37], %64 {strides = array<i32>} : memref<1x4x128x32xbf16, #tpu.memory_space<vmem>>, vector<1x1x128x32xbf16>,
    %65 = vector.extract_strided_slice %40 {offsets = [0, 64], sizes = [128, 32], strides = [1, 1]} : vector<128x384xbf16> to vector<128x32xbf16>
    %c0_38 = arith.constant 0 : index
    %c2 = arith.constant 2 : index
    %c0_39 = arith.constant 0 : index
    %c0_40 = arith.constant 0 : index
    %66 = vector.load %arg7[%c0_38, %c2, %c0_39, %c0_40] : memref<1x4x128x32xbf16, #tpu.memory_space<vmem>>, vector<1x1x128x32xbf16>
    %67 = vector.shape_cast %66 : vector<1x1x128x32xbf16> to vector<128x32xbf16>
    %68 = vector.shape_cast %65 : vector<128x32xbf16> to vector<1x1x128x32xbf16>
    tpu.vector_store %arg7[%c0_38, %c2, %c0_39, %c0_40], %68 {strides = array<i32>} : memref<1x4x128x32xbf16, #tpu.memory_space<vmem>>, vector<1x1x128x32xbf16>,
    %69 = vector.extract_strided_slice %40 {offsets = [0, 192], sizes = [128, 32], strides = [1, 1]} : vector<128x384xbf16> to vector<128x32xbf16>
    %c0_41 = arith.constant 0 : index
    %c2_42 = arith.constant 2 : index
    %c0_43 = arith.constant 0 : index
    %c0_44 = arith.constant 0 : index
    %70 = vector.load %arg8[%c0_41, %c2_42, %c0_43, %c0_44] : memref<1x4x128x32xbf16, #tpu.memory_space<vmem>>, vector<1x1x128x32xbf16>
    %71 = vector.shape_cast %70 : vector<1x1x128x32xbf16> to vector<128x32xbf16>
    %72 = vector.shape_cast %69 : vector<128x32xbf16> to vector<1x1x128x32xbf16>
    tpu.vector_store %arg8[%c0_41, %c2_42, %c0_43, %c0_44], %72 {strides = array<i32>} : memref<1x4x128x32xbf16, #tpu.memory_space<vmem>>, vector<1x1x128x32xbf16>,
    %73 = vector.extract_strided_slice %40 {offsets = [0, 320], sizes = [128, 32], strides = [1, 1]} : vector<128x384xbf16> to vector<128x32xbf16>
    %c0_45 = arith.constant 0 : index
    %c2_46 = arith.constant 2 : index
    %c0_47 = arith.constant 0 : index
    %c0_48 = arith.constant 0 : index
    %74 = vector.load %arg9[%c0_45, %c2_46, %c0_47, %c0_48] : memref<1x4x128x32xbf16, #tpu.memory_space<vmem>>, vector<1x1x128x32xbf16>
    %75 = vector.shape_cast %74 : vector<1x1x128x32xbf16> to vector<128x32xbf16>
    %76 = vector.shape_cast %73 : vector<128x32xbf16> to vector<1x1x128x32xbf16>
    tpu.vector_store %arg9[%c0_45, %c2_46, %c0_47, %c0_48], %76 {strides = array<i32>} : memref<1x4x128x32xbf16, #tpu.memory_space<vmem>>, vector<1x1x128x32xbf16>,
    %77 = vector.extract_strided_slice %40 {offsets = [0, 96], sizes = [128, 32], strides = [1, 1]} : vector<128x384xbf16> to vector<128x32xbf16>
    %c0_49 = arith.constant 0 : index
    %c3 = arith.constant 3 : index
    %c0_50 = arith.constant 0 : index
    %c0_51 = arith.constant 0 : index
    %78 = vector.load %arg7[%c0_49, %c3, %c0_50, %c0_51] : memref<1x4x128x32xbf16, #tpu.memory_space<vmem>>, vector<1x1x128x32xbf16>
    %79 = vector.shape_cast %78 : vector<1x1x128x32xbf16> to vector<128x32xbf16>
    %80 = vector.shape_cast %77 : vector<128x32xbf16> to vector<1x1x128x32xbf16>
    tpu.vector_store %arg7[%c0_49, %c3, %c0_50, %c0_51], %80 {strides = array<i32>} : memref<1x4x128x32xbf16, #tpu.memory_space<vmem>>, vector<1x1x128x32xbf16>,
    %81 = vector.extract_strided_slice %40 {offsets = [0, 224], sizes = [128, 32], strides = [1, 1]} : vector<128x384xbf16> to vector<128x32xbf16>
    %c0_52 = arith.constant 0 : index
    %c3_53 = arith.constant 3 : index
    %c0_54 = arith.constant 0 : index
    %c0_55 = arith.constant 0 : index
    %82 = vector.load %arg8[%c0_52, %c3_53, %c0_54, %c0_55] : memref<1x4x128x32xbf16, #tpu.memory_space<vmem>>, vector<1x1x128x32xbf16>
    %83 = vector.shape_cast %82 : vector<1x1x128x32xbf16> to vector<128x32xbf16>
    %84 = vector.shape_cast %81 : vector<128x32xbf16> to vector<1x1x128x32xbf16>
    tpu.vector_store %arg8[%c0_52, %c3_53, %c0_54, %c0_55], %84 {strides = array<i32>} : memref<1x4x128x32xbf16, #tpu.memory_space<vmem>>, vector<1x1x128x32xbf16>,
    %85 = vector.extract_strided_slice %40 {offsets = [0, 352], sizes = [128, 32], strides = [1, 1]} : vector<128x384xbf16> to vector<128x32xbf16>
    %c0_56 = arith.constant 0 : index
    %c3_57 = arith.constant 3 : index
    %c0_58 = arith.constant 0 : index
    %c0_59 = arith.constant 0 : index
    %86 = vector.load %arg9[%c0_56, %c3_57, %c0_58, %c0_59] : memref<1x4x128x32xbf16, #tpu.memory_space<vmem>>, vector<1x1x128x32xbf16>
    %87 = vector.shape_cast %86 : vector<1x1x128x32xbf16> to vector<128x32xbf16>
    %88 = vector.shape_cast %85 : vector<128x32xbf16> to vector<1x1x128x32xbf16>
    tpu.vector_store %arg9[%c0_56, %c3_57, %c0_58, %c0_59], %88 {strides = array<i32>} : memref<1x4x128x32xbf16, #tpu.memory_space<vmem>>, vector<1x1x128x32xbf16>,
    return
  }
  func.func @transform_0(%arg0: i32, %arg1: i32) -> (i32, i32, i32) {
    %c0_i32 = arith.constant 0 : i32
    %c0_i32_0 = arith.constant 0 : i32
    return %arg0, %arg1, %c0_i32 : i32, i32, i32
  }
  func.func @transform_1(%arg0: i32, %arg1: i32) -> (i32, i32) {
    %c0_i32 = arith.constant 0 : i32
    %c0_i32_0 = arith.constant 0 : i32
    %c0_i32_1 = arith.constant 0 : i32
    return %c0_i32, %c0_i32_0 : i32, i32
  }
  func.func @transform_2(%arg0: i32, %arg1: i32) -> (i32, i32) {
    %c0_i32 = arith.constant 0 : i32
    %c0_i32_0 = arith.constant 0 : i32
    %c0_i32_1 = arith.constant 0 : i32
    return %c0_i32, %c0_i32_0 : i32, i32
  }
  func.func @transform_3(%arg0: i32, %arg1: i32) -> (i32, i32) {
    %c0_i32 = arith.constant 0 : i32
    %c0_i32_0 = arith.constant 0 : i32
    %c0_i32_1 = arith.constant 0 : i32
    return %c0_i32, %c0_i32_0 : i32, i32
  }
  func.func @transform_4(%arg0: i32, %arg1: i32) -> (i32, i32) {
    %c0_i32 = arith.constant 0 : i32
    %c0_i32_0 = arith.constant 0 : i32
    %c0_i32_1 = arith.constant 0 : i32
    return %c0_i32, %c0_i32_0 : i32, i32
  }
  func.func @transform_5(%arg0: i32, %arg1: i32) -> (i32, i32, i32, i32) {
    %c0_i32 = arith.constant 0 : i32
    %c0_i32_0 = arith.constant 0 : i32
    %c0_i32_1 = arith.constant 0 : i32
    return %arg0, %c0_i32, %arg1, %c0_i32_0 : i32, i32, i32, i32
  }
  func.func @transform_6(%arg0: i32, %arg1: i32) -> (i32, i32, i32, i32) {
    %c0_i32 = arith.constant 0 : i32
    %c0_i32_0 = arith.constant 0 : i32
    %c0_i32_1 = arith.constant 0 : i32
    return %arg0, %c0_i32, %arg1, %c0_i32_0 : i32, i32, i32, i32
  }
  func.func @transform_7(%arg0: i32, %arg1: i32) -> (i32, i32, i32, i32) {
    %c0_i32 = arith.constant 0 : i32
    %c0_i32_0 = arith.constant 0 : i32
    %c0_i32_1 = arith.constant 0 : i32
    return %arg0, %c0_i32, %arg1, %c0_i32_0 : i32, i32, i32, i32
  }
}

module attributes {stable_mosaic.version = 11 : i64} {
  func.func @_qkv_kernel(%arg0: i32, %arg1: i32, %arg2: memref<1x128x128xf32, #tpu.memory_space<vmem>>, %arg3: memref<1x128xf32, #tpu.memory_space<vmem>>, %arg4: memref<1x128xf32, #tpu.memory_space<vmem>>, %arg5: memref<128x384xbf16, #tpu.memory_space<vmem>>, %arg6: memref<1x384xf32, #tpu.memory_space<vmem>>, %arg7: memref<1x4x128x32xbf16, #tpu.memory_space<vmem>>, %arg8: memref<1x4x128x32xbf16, #tpu.memory_space<vmem>>, %arg9: memref<1x4x128x32xbf16, #tpu.memory_space<vmem>>) attributes {dimension_semantics = [#tpu.dimension_semantics<parallel>, #tpu.dimension_semantics<parallel>], iteration_bounds = array<i64: 2, 4>, scalar_prefetch = 0 : i64, scratch_operands = 0 : i64, tpu.core_type = #tpu.core_type<tc>, window_params = [{transform_indices = @transform_0, window_bounds = array<i64: 1, 128, 128>}, {pipeline_mode = #tpu.pipeline_mode<synchronous>, transform_indices = @transform_1, window_bounds = array<i64: 1, 128>}, {pipeline_mode = #tpu.pipeline_mode<synchronous>, transform_indices = @transform_2, window_bounds = array<i64: 1, 128>}, {pipeline_mode = #tpu.pipeline_mode<synchronous>, transform_indices = @transform_3, window_bounds = array<i64: 128, 384>}, {pipeline_mode = #tpu.pipeline_mode<synchronous>, transform_indices = @transform_4, window_bounds = array<i64: 1, 384>}, {transform_indices = @transform_5, window_bounds = array<i64: 1, 4, 128, 32>}, {transform_indices = @transform_6, window_bounds = array<i64: 1, 4, 128, 32>}, {transform_indices = @transform_7, window_bounds = array<i64: 1, 4, 128, 32>}]} {
    %c0 = arith.constant 0 : index
    %c0_0 = arith.constant 0 : index
    %c0_1 = arith.constant 0 : index
    %0 = vector.load %arg2[%c0, %c0_0, %c0_1] : memref<1x128x128xf32, #tpu.memory_space<vmem>>, vector<1x128x128xf32>
    %1 = vector.shape_cast %0 : vector<1x128x128xf32> to vector<128x128xf32>
    %c0_2 = arith.constant 0 : index
    %c0_3 = arith.constant 0 : index
    %2 = vector.load %arg3[%c0_2, %c0_3] : memref<1x128xf32, #tpu.memory_space<vmem>>, vector<1x128xf32>
    %3 = vector.shape_cast %2 : vector<1x128xf32> to vector<128xf32>
    %c0_4 = arith.constant 0 : index
    %c0_5 = arith.constant 0 : index
    %4 = vector.load %arg4[%c0_4, %c0_5] : memref<1x128xf32, #tpu.memory_space<vmem>>, vector<1x128xf32>
    %5 = vector.shape_cast %4 : vector<1x128xf32> to vector<128xf32>
    %cst = arith.constant dense<0.000000e+00> : vector<128xf32>
    %6 = vector.multi_reduction <add>, %1, %cst [1] : vector<128x128xf32> to vector<128xf32>
    %7 = vector.shape_cast %6 : vector<128xf32> to vector<128x1xf32>
    %cst_6 = arith.constant 1.280000e+02 : f32
    %8 = vector.broadcast %cst_6 : f32 to vector<128x1xf32>
    %9 = arith.divf %7, %8 : vector<128x1xf32>
    %10 = vector.broadcast %9 : vector<128x1xf32> to vector<128x128xf32>
    %11 = arith.subf %1, %10 : vector<128x128xf32>
    %12 = vector.broadcast %9 : vector<128x1xf32> to vector<128x128xf32>
    %13 = arith.subf %1, %12 : vector<128x128xf32>
    %14 = arith.mulf %11, %13 : vector<128x128xf32>
    %cst_7 = arith.constant dense<0.000000e+00> : vector<128xf32>
    %15 = vector.multi_reduction <add>, %14, %cst_7 [1] : vector<128x128xf32> to vector<128xf32>
    %16 = vector.shape_cast %15 : vector<128xf32> to vector<128x1xf32>
    %cst_8 = arith.constant 1.280000e+02 : f32
    %17 = vector.broadcast %cst_8 : f32 to vector<128x1xf32>
    %18 = arith.divf %16, %17 : vector<128x1xf32>
    %19 = vector.broadcast %9 : vector<128x1xf32> to vector<128x128xf32>
    %20 = arith.subf %1, %19 : vector<128x128xf32>
    %cst_9 = arith.constant 9.99999974E-6 : f32
    %21 = vector.broadcast %cst_9 : f32 to vector<128x1xf32>
    %22 = arith.addf %18, %21 : vector<128x1xf32>
    %23 = math.rsqrt %22 : vector<128x1xf32>
    %24 = vector.broadcast %23 : vector<128x1xf32> to vector<128x128xf32>
    %25 = arith.mulf %20, %24 : vector<128x128xf32>
    %26 = vector.shape_cast %3 : vector<128xf32> to vector<1x128xf32>
    %27 = vector.broadcast %26 : vector<1x128xf32> to vector<128x128xf32>
    %28 = arith.mulf %25, %27 : vector<128x128xf32>
    %29 = vector.shape_cast %5 : vector<128xf32> to vector<1x128xf32>
    %30 = vector.broadcast %29 : vector<1x128xf32> to vector<128x128xf32>
    %31 = arith.addf %28, %30 : vector<128x128xf32>
    %32 = arith.truncf %31 : vector<128x128xf32> to vector<128x128xbf16>
    %c0_10 = arith.constant 0 : index
    %c0_11 = arith.constant 0 : index
    %33 = vector.load %arg5[%c0_10, %c0_11] : memref<128x384xbf16, #tpu.memory_space<vmem>>, vector<128x384xbf16>
    %cst_12 = arith.constant dense<0.000000e+00> : vector<128x384xf32>
    %34 = tpu.matmul %32, %33, %cst_12 {dimension_numbers = #tpu.dot_dimension_numbers<[1], [0], [0], [1], [0, 0, 1, 1], [], []>} : vector<128x128xbf16>, vector<128x384xbf16>, vector<128x384xf32> -> vector<128x384xf32>
    %c0_13 = arith.constant 0 : index
    %c0_14 = arith.constant 0 : index
    %35 = vector.load %arg6[%c0_13, %c0_14] : memref<1x384xf32, #tpu.memory_space<vmem>>, vector<1x384xf32>
    %36 = vector.shape_cast %35 : vector<1x384xf32> to vector<384xf32>
    %37 = vector.shape_cast %36 : vector<384xf32> to vector<1x384xf32>
    %38 = vector.broadcast %37 : vector<1x384xf32> to vector<128x384xf32>
    %39 = arith.addf %34, %38 : vector<128x384xf32>
    %40 = arith.truncf %39 : vector<128x384xf32> to vector<128x384xbf16>
    %41 = vector.extract_strided_slice %40 {offsets = [0, 0], sizes = [128, 32], strides = [1, 1]} : vector<128x384xbf16> to vector<128x32xbf16>
    %c0_15 = arith.constant 0 : index
    %c0_16 = arith.constant 0 : index
    %c0_17 = arith.constant 0 : index
    %c0_18 = arith.constant 0 : index
    %42 = vector.load %arg7[%c0_15, %c0_16, %c0_17, %c0_18] : memref<1x4x128x32xbf16, #tpu.memory_space<vmem>>, vector<1x1x128x32xbf16>
    %43 = vector.shape_cast %42 : vector<1x1x128x32xbf16> to vector<128x32xbf16>
    %44 = vector.shape_cast %41 : vector<128x32xbf16> to vector<1x1x128x32xbf16>
    tpu.vector_store %arg7[%c0_15, %c0_16, %c0_17, %c0_18], %44 {strides = array<i32>} : memref<1x4x128x32xbf16, #tpu.memory_space<vmem>>, vector<1x1x128x32xbf16>,
    %45 = vector.extract_strided_slice %40 {offsets = [0, 128], sizes = [128, 32], strides = [1, 1]} : vector<128x384xbf16> to vector<128x32xbf16>
    %c0_19 = arith.constant 0 : index
    %c0_20 = arith.constant 0 : index
    %c0_21 = arith.constant 0 : index
    %c0_22 = arith.constant 0 : index
    %46 = vector.load %arg8[%c0_19, %c0_20, %c0_21, %c0_22] : memref<1x4x128x32xbf16, #tpu.memory_space<vmem>>, vector<1x1x128x32xbf16>
    %47 = vector.shape_cast %46 : vector<1x1x128x32xbf16> to vector<128x32xbf16>
    %48 = vector.shape_cast %45 : vector<128x32xbf16> to vector<1x1x128x32xbf16>
    tpu.vector_store %arg8[%c0_19, %c0_20, %c0_21, %c0_22], %48 {strides = array<i32>} : memref<1x4x128x32xbf16, #tpu.memory_space<vmem>>, vector<1x1x128x32xbf16>,
    %49 = vector.extract_strided_slice %40 {offsets = [0, 256], sizes = [128, 32], strides = [1, 1]} : vector<128x384xbf16> to vector<128x32xbf16>
    %c0_23 = arith.constant 0 : index
    %c0_24 = arith.constant 0 : index
    %c0_25 = arith.constant 0 : index
    %c0_26 = arith.constant 0 : index
    %50 = vector.load %arg9[%c0_23, %c0_24, %c0_25, %c0_26] : memref<1x4x128x32xbf16, #tpu.memory_space<vmem>>, vector<1x1x128x32xbf16>
    %51 = vector.shape_cast %50 : vector<1x1x128x32xbf16> to vector<128x32xbf16>
    %52 = vector.shape_cast %49 : vector<128x32xbf16> to vector<1x1x128x32xbf16>
    tpu.vector_store %arg9[%c0_23, %c0_24, %c0_25, %c0_26], %52 {strides = array<i32>} : memref<1x4x128x32xbf16, #tpu.memory_space<vmem>>, vector<1x1x128x32xbf16>,
    %53 = vector.extract_strided_slice %40 {offsets = [0, 32], sizes = [128, 32], strides = [1, 1]} : vector<128x384xbf16> to vector<128x32xbf16>
    %c0_27 = arith.constant 0 : index
    %c1 = arith.constant 1 : index
    %c0_28 = arith.constant 0 : index
    %c0_29 = arith.constant 0 : index
    %54 = vector.load %arg7[%c0_27, %c1, %c0_28, %c0_29] : memref<1x4x128x32xbf16, #tpu.memory_space<vmem>>, vector<1x1x128x32xbf16>
    %55 = vector.shape_cast %54 : vector<1x1x128x32xbf16> to vector<128x32xbf16>
    %56 = vector.shape_cast %53 : vector<128x32xbf16> to vector<1x1x128x32xbf16>
    tpu.vector_store %arg7[%c0_27, %c1, %c0_28, %c0_29], %56 {strides = array<i32>} : memref<1x4x128x32xbf16, #tpu.memory_space<vmem>>, vector<1x1x128x32xbf16>,
    %57 = vector.extract_strided_slice %40 {offsets = [0, 160], sizes = [128, 32], strides = [1, 1]} : vector<128x384xbf16> to vector<128x32xbf16>
    %c0_30 = arith.constant 0 : index
    %c1_31 = arith.constant 1 : index
    %c0_32 = arith.constant 0 : index
    %c0_33 = arith.constant 0 : index
    %58 = vector.load %arg8[%c0_30, %c1_31, %c0_32, %c0_33] : memref<1x4x128x32xbf16, #tpu.memory_space<vmem>>, vector<1x1x128x32xbf16>
    %59 = vector.shape_cast %58 : vector<1x1x128x32xbf16> to vector<128x32xbf16>
    %60 = vector.shape_cast %57 : vector<128x32xbf16> to vector<1x1x128x32xbf16>
    tpu.vector_store %arg8[%c0_30, %c1_31, %c0_32, %c0_33], %60 {strides = array<i32>} : memref<1x4x128x32xbf16, #tpu.memory_space<vmem>>, vector<1x1x128x32xbf16>,
    %61 = vector.extract_strided_slice %40 {offsets = [0, 288], sizes = [128, 32], strides = [1, 1]} : vector<128x384xbf16> to vector<128x32xbf16>
    %c0_34 = arith.constant 0 : index
    %c1_35 = arith.constant 1 : index
    %c0_36 = arith.constant 0 : index
    %c0_37 = arith.constant 0 : index
    %62 = vector.load %arg9[%c0_34, %c1_35, %c0_36, %c0_37] : memref<1x4x128x32xbf16, #tpu.memory_space<vmem>>, vector<1x1x128x32xbf16>
    %63 = vector.shape_cast %62 : vector<1x1x128x32xbf16> to vector<128x32xbf16>
    %64 = vector.shape_cast %61 : vector<128x32xbf16> to vector<1x1x128x32xbf16>
    tpu.vector_store %arg9[%c0_34, %c1_35, %c0_36, %c0_37], %64 {strides = array<i32>} : memref<1x4x128x32xbf16, #tpu.memory_space<vmem>>, vector<1x1x128x32xbf16>,
    %65 = vector.extract_strided_slice %40 {offsets = [0, 64], sizes = [128, 32], strides = [1, 1]} : vector<128x384xbf16> to vector<128x32xbf16>
    %c0_38 = arith.constant 0 : index
    %c2 = arith.constant 2 : index
    %c0_39 = arith.constant 0 : index
    %c0_40 = arith.constant 0 : index
    %66 = vector.load %arg7[%c0_38, %c2, %c0_39, %c0_40] : memref<1x4x128x32xbf16, #tpu.memory_space<vmem>>, vector<1x1x128x32xbf16>
    %67 = vector.shape_cast %66 : vector<1x1x128x32xbf16> to vector<128x32xbf16>
    %68 = vector.shape_cast %65 : vector<128x32xbf16> to vector<1x1x128x32xbf16>
    tpu.vector_store %arg7[%c0_38, %c2, %c0_39, %c0_40], %68 {strides = array<i32>} : memref<1x4x128x32xbf16, #tpu.memory_space<vmem>>, vector<1x1x128x32xbf16>,
    %69 = vector.extract_strided_slice %40 {offsets = [0, 192], sizes = [128, 32], strides = [1, 1]} : vector<128x384xbf16> to vector<128x32xbf16>
    %c0_41 = arith.constant 0 : index
    %c2_42 = arith.constant 2 : index
    %c0_43 = arith.constant 0 : index
    %c0_44 = arith.constant 0 : index
    %70 = vector.load %arg8[%c0_41, %c2_42, %c0_43, %c0_44] : memref<1x4x128x32xbf16, #tpu.memory_space<vmem>>, vector<1x1x128x32xbf16>
    %71 = vector.shape_cast %70 : vector<1x1x128x32xbf16> to vector<128x32xbf16>
    %72 = vector.shape_cast %69 : vector<128x32xbf16> to vector<1x1x128x32xbf16>
    tpu.vector_store %arg8[%c0_41, %c2_42, %c0_43, %c0_44], %72 {strides = array<i32>} : memref<1x4x128x32xbf16, #tpu.memory_space<vmem>>, vector<1x1x128x32xbf16>,
    %73 = vector.extract_strided_slice %40 {offsets = [0, 320], sizes = [128, 32], strides = [1, 1]} : vector<128x384xbf16> to vector<128x32xbf16>
    %c0_45 = arith.constant 0 : index
    %c2_46 = arith.constant 2 : index
    %c0_47 = arith.constant 0 : index
    %c0_48 = arith.constant 0 : index
    %74 = vector.load %arg9[%c0_45, %c2_46, %c0_47, %c0_48] : memref<1x4x128x32xbf16, #tpu.memory_space<vmem>>, vector<1x1x128x32xbf16>
    %75 = vector.shape_cast %74 : vector<1x1x128x32xbf16> to vector<128x32xbf16>
    %76 = vector.shape_cast %73 : vector<128x32xbf16> to vector<1x1x128x32xbf16>
    tpu.vector_store %arg9[%c0_45, %c2_46, %c0_47, %c0_48], %76 {strides = array<i32>} : memref<1x4x128x32xbf16, #tpu.memory_space<vmem>>, vector<1x1x128x32xbf16>,
    %77 = vector.extract_strided_slice %40 {offsets = [0, 96], sizes = [128, 32], strides = [1, 1]} : vector<128x384xbf16> to vector<128x32xbf16>
    %c0_49 = arith.constant 0 : index
    %c3 = arith.constant 3 : index
    %c0_50 = arith.constant 0 : index
    %c0_51 = arith.constant 0 : index
    %78 = vector.load %arg7[%c0_49, %c3, %c0_50, %c0_51] : memref<1x4x128x32xbf16, #tpu.memory_space<vmem>>, vector<1x1x128x32xbf16>
    %79 = vector.shape_cast %78 : vector<1x1x128x32xbf16> to vector<128x32xbf16>
    %80 = vector.shape_cast %77 : vector<128x32xbf16> to vector<1x1x128x32xbf16>
    tpu.vector_store %arg7[%c0_49, %c3, %c0_50, %c0_51], %80 {strides = array<i32>} : memref<1x4x128x32xbf16, #tpu.memory_space<vmem>>, vector<1x1x128x32xbf16>,
    %81 = vector.extract_strided_slice %40 {offsets = [0, 224], sizes = [128, 32], strides = [1, 1]} : vector<128x384xbf16> to vector<128x32xbf16>
    %c0_52 = arith.constant 0 : index
    %c3_53 = arith.constant 3 : index
    %c0_54 = arith.constant 0 : index
    %c0_55 = arith.constant 0 : index
    %82 = vector.load %arg8[%c0_52, %c3_53, %c0_54, %c0_55] : memref<1x4x128x32xbf16, #tpu.memory_space<vmem>>, vector<1x1x128x32xbf16>
    %83 = vector.shape_cast %82 : vector<1x1x128x32xbf16> to vector<128x32xbf16>
    %84 = vector.shape_cast %81 : vector<128x32xbf16> to vector<1x1x128x32xbf16>
    tpu.vector_store %arg8[%c0_52, %c3_53, %c0_54, %c0_55], %84 {strides = array<i32>} : memref<1x4x128x32xbf16, #tpu.memory_space<vmem>>, vector<1x1x128x32xbf16>,
    %85 = vector.extract_strided_slice %40 {offsets = [0, 352], sizes = [128, 32], strides = [1, 1]} : vector<128x384xbf16> to vector<128x32xbf16>
    %c0_56 = arith.constant 0 : index
    %c3_57 = arith.constant 3 : index
    %c0_58 = arith.constant 0 : index
    %c0_59 = arith.constant 0 : index
    %86 = vector.load %arg9[%c0_56, %c3_57, %c0_58, %c0_59] : memref<1x4x128x32xbf16, #tpu.memory_space<vmem>>, vector<1x1x128x32xbf16>
    %87 = vector.shape_cast %86 : vector<1x1x128x32xbf16> to vector<128x32xbf16>
    %88 = vector.shape_cast %85 : vector<128x32xbf16> to vector<1x1x128x32xbf16>
    tpu.vector_store %arg9[%c0_56, %c3_57, %c0_58, %c0_59], %88 {strides = array<i32>} : memref<1x4x128x32xbf16, #tpu.memory_space<vmem>>, vector<1x1x128x32xbf16>,
    return
  }
  func.func @transform_0(%arg0: i32, %arg1: i32) -> (i32, i32, i32) {
    %c0_i32 = arith.constant 0 : i32
    %c0_i32_0 = arith.constant 0 : i32
    return %arg0, %arg1, %c0_i32 : i32, i32, i32
  }
  func.func @transform_1(%arg0: i32, %arg1: i32) -> (i32, i32) {
    %c0_i32 = arith.constant 0 : i32
    %c0_i32_0 = arith.constant 0 : i32
    %c0_i32_1 = arith.constant 0 : i32
    return %c0_i32, %c0_i32_0 : i32, i32
  }
  func.func @transform_2(%arg0: i32, %arg1: i32) -> (i32, i32) {
    %c0_i32 = arith.constant 0 : i32
    %c0_i32_0 = arith.constant 0 : i32
    %c0_i32_1 = arith.constant 0 : i32
    return %c0_i32, %c0_i32_0 : i32, i32
  }
  func.func @transform_3(%arg0: i32, %arg1: i32) -> (i32, i32) {
    %c0_i32 = arith.constant 0 : i32
    %c0_i32_0 = arith.constant 0 : i32
    %c0_i32_1 = arith.constant 0 : i32
    return %c0_i32, %c0_i32_0 : i32, i32
  }
  func.func @transform_4(%arg0: i32, %arg1: i32) -> (i32, i32) {
    %c0_i32 = arith.constant 0 : i32
    %c0_i32_0 = arith.constant 0 : i32
    %c0_i32_1 = arith.constant 0 : i32
    return %c0_i32, %c0_i32_0 : i32, i32
  }
  func.func @transform_5(%arg0: i32, %arg1: i32) -> (i32, i32, i32, i32) {
    %c0_i32 = arith.constant 0 : i32
    %c0_i32_0 = arith.constant 0 : i32
    %c0_i32_1 = arith.constant 0 : i32
    return %arg0, %c0_i32, %arg1, %c0_i32_0 : i32, i32, i32, i32
  }
  func.func @transform_6(%arg0: i32, %arg1: i32) -> (i32, i32, i32, i32) {
    %c0_i32 = arith.constant 0 : i32
    %c0_i32_0 = arith.constant 0 : i32
    %c0_i32_1 = arith.constant 0 : i32
    return %arg0, %c0_i32, %arg1, %c0_i32_0 : i32, i32, i32, i32
  }
  func.func @transform_7(%arg0: i32, %arg1: i32) -> (i32, i32, i32, i32) {
    %c0_i32 = arith.constant 0 : i32
    %c0_i32_0 = arith.constant 0 : i32
    %c0_i32_1 = arith.constant 0 : i32
    return %arg0, %c0_i32, %arg1, %c0_i32_0 : i32, i32, i32, i32
  }
}

</mosaic_0001>

<bundles_post_ra>
// kernel: tpu_custom_call.1
= control target key start
LH: loop header
LB: loop body
LE: loop exit
PB: predicated region body
PF: predicated region fallthrough
CT: control target
= control target key end

     0   :  { %s4972_s0 = inlined_call_operand.hbm [shape: f32[2,512,128], index: 0, kind: input, shape index: {}]   ;;  %s4973_s1 = inlined_call_operand.vmem [shape: f32[1,128], index: 1, kind: input, shape index: {}]   ;;  %s4974_s2 = inlined_call_operand.vmem [shape: f32[1,128], index: 2, kind: input, shape index: {}]   ;;  %s4975_s3 = inlined_call_operand.hbm [shape: bf16[128,384], index: 3, kind: input, shape index: {}]   ;;  %s4976_s4 = inlined_call_operand.vmem [shape: f32[1,384], index: 4, kind: input, shape index: {}]   ;;  %s4977_s5 = inlined_call_operand.vmem [shape: bf16[2,4,512,32], index: 5, kind: output, shape index: {0}]   ;;  %s4978_s6 = inlined_call_operand.vmem [shape: bf16[2,4,512,32], index: 6, kind: output, shape index: {1}]   ;;  %s4979_s7 = inlined_call_operand.vmem [shape: bf16[2,4,512,32], index: 7, kind: output, shape index: {2}]  }
   0x1   :  { %4983 = sst [smem:[#allocation15_spill]] %s4975_s3 }
   0x2   :  { %4984 = sst [smem:[#allocation16_spill]] %s4977_s5 }
   0x3   :  { %4985 = sst [smem:[#allocation17_spill]] %s4978_s6 }
   0x4   :  { %4986 = sst [smem:[#allocation18_spill]] %s4979_s7 }
   0x5   :  { %13 = vsyncpa [#allocation3], 0 }
   0x6   :  { %15 = vsyncpa [#allocation3 + $0x1], 0 }
   0x7   :  { %16 = vsyncpa [#allocation5], 0  ;;  %s3547_s24 = smov 0   ;;  %s3549_s25 = smov 0  }
   0x8   :  { %s3551_s26 = smov 0   ;;  %s3553_s27 = smov 0  }
   0x9   :  { %s3555_s28 = smov 0   ;;  %s3557_s29 = smov 0  }
   0xa   :  { %s3559_s30 = smov 0   ;;  %s3561_s8 = smov 0  }
   0xb LB: > { %4987 = sst [smem:[#allocation11_spill]] %s3479_s27  ;;  %s2874_s9 = sadd.s32 4294967295, %s3495_s8   ;;  %s3495_s8 = sphi %s3561_s8, %s22_s8   ;;  %s3491_s30 = sphi %s3559_s30, %s5019_s30   ;;  %s3487_s29 = sphi %s3557_s29, %s5018_s29   ;;  %s3483_s28 = sphi %s3555_s28, %s5017_s28   ;;  %s3479_s27 = sphi %s3553_s27, %s5016_s27   ;;  %s3475_s26 = sphi %s3551_s26, %s5015_s26   ;;  %s3471_s25 = sphi %s3549_s25, %s5014_s25   ;;  %s3467_s24 = sphi %s3547_s24, %s5013_s24  }
   0xc   : > { %4988 = sst [smem:[#allocation12_spill]] %s3483_s28  ;;  %p56_p0 = scmp.ne.s32.totalorder %s3471_s25, %s3467_s24 }
   0xd   : > { %p3587_p1 = scmp.eq.s32.totalorder %s2874_s9, 0  ;;  %p3591_p2 = scmp.eq.s32.totalorder %s2874_s9, 7 }
   0xe   : > { %p2876_p3 = scmp.ge.s32.totalorder %s3495_s8, 1  ;;  %p235_p4 = scmp.lt.s32.totalorder %s3495_s8, 9 }
   0xf   : > { %p3599_p5 = por %p3587_p1, %p56_p0  ;;  %s3497_s14 = smov [#allocation4]  }
  0x10   : > { %p3603_p6 = pnand %p2876_p3, %p235_p4  ;;  %s253_s15 = sshll.u32 %s3497_s14, 4  ;;  %s254_s15 = int_to_ptr.vmem [resolvable:$true] %s253_s15 }
  0x11   : > { %s4991_s12 = scalar_select %p3599_p5, 1, 0 }
  0x12   : > { %p3223_p7 = pneg %p3603_p6  ;;  %s3382_s16 = scalar_lea.vmem %s254_s15, 3072 }
  0x13   : > { %p3383_p10 = scmp.ne.s32.totalorder %s254_s15, %s3382_s16  ;;  %p3390_p13 = scmp.lt.s32.totalorder %s254_s15, %s254_s15 }
  0x14   : > { %p3224_p8 = pnand %p3223_p7, %p3587_p1  ;;  %p3391_p0 = scmp.lt.s32.totalorder %s3382_s16, %s3382_s16 }
  0x16   : > { %p3373_p9 = pneg %p3224_p8  ;;  %p3392_p5 = por %p3391_p0, %p3390_p13 }
  0x18   : > { %p3385_p11 = pnand %p3383_p10, %p3373_p9 }
  0x1a   : > { %p3386_p12 = pneg %p3385_p11 }
  0x1c   : > { %p3393_p3 = pnand %p3392_p5, %p3386_p12 }
  0x1e   : > { %3396 = shalt.err (!%p3393_p3)
}
  0x1f   : > { %s3498_s17 = smov 192   ;;  %s3499_s18 = smov 12  }
  0x20   : > { %s4993_s3 = sld [smem:[#allocation15_spill]]  ;;  %s31_s21 = sadd.s32 1, %s3487_s29 }
  0x21   : > { %s34_s22 = sadd.s32 1, %s3491_s30  ;;  %p32_p4 = scmp.ge.s32.totalorder %s31_s21, 4 }
  0x22   : > { %s43_s23 = sadd.s32 1, %s3475_s26  ;;  %p50_p5 = scmp.ne.s32.totalorder %s3475_s26, %s3471_s25 }
  0x23   : > { %p51_p7 = scmp.eq.s32.totalorder %s3495_s8, 0  ;;  %s5021_s21 = smov (%p32_p4, %s31_s21), 0 }
  0x24   : > { %4994 = sst [smem:[#allocation13_spill]] %s5021_s21  ;;  %s5023_s22 = smov (!%p32_p4, %s34_s22), %s3491_s30 }
  0x25   : > { %s39_s24 = ssub.s32 %s3487_s29, %s5021_s21  ;;  %p3625_p9 = por %p51_p7, %p50_p5 }
  0x26   : > { %3226 = dma.hbm_to_vmem [thread:$0]  (!%p3224_p8), %s4993_s3, 3072, %s254_s15, [#allocation5], %s3498_s17, %s3498_s17, %s3499_s18  }
  0x27   : > { %p36_p8 = scmp.ge.s32.totalorder %s5023_s22, 2  ;;  %p3631_p10 = por %p3591_p2, %p50_p5 }
  0x28   : > { %p3232_p11 = scmp.lt.s32.totalorder %s3495_s8, 8  ;;  %s270_s15 = sand.u32 1, %s3475_s26  }
  0x29   : > { %s4996_s14 = scalar_select %p3631_p10, 1, 0 }
  0x2a   : > { %s5025_s22 = smov (%p36_p8, %s5023_s22), 0  ;;  %s2879_s16 = sshll.u32 %s270_s15, 7 }
  0x2b   : > { %4997 = sst [smem:[#allocation14_spill]] %s4996_s14  ;;  %s38_s17 = ssub.s32 %s3491_s30, %s5025_s22 }
  0x2c   : > { %s40_s18 = sor.u32 %s39_s24, %s38_s17  ;;  %s2880_s19 = sshll.u32 %s3487_s29, 4 }
  0x2d   : > { %p41_p12 = scmp.eq.s32.totalorder %s40_s18, 0  ;;  %s2881_s20 = sshll.u32 %s3491_s30, 6 }
  0x2e   : > { %s280_s3 = sadd.s32 %s2881_s20, %s2880_s19  ;;  %s274_s21 = scalar_lea.vmem [#allocation2], %s2879_s16 }
  0x2f   : > { %s283_s11 = sshll.u32 %s274_s21, 4  ;;  %s2882_s6 = sshll.u32 %s280_s3, 7  ;;  %s284_s11 = int_to_ptr.vmem [resolvable:$true] %s283_s11 }
  0x30   : > { %s3644_s7 = scalar_select %p41_p12, %s3475_s26, %s43_s23  }
  0x31   : > { %s282_s27 = scalar_lea.hbm %s4972_s0, %s2882_s6  ;;  %p3653_p2 = pnand %p3232_p11, %p3625_p9 }
  0x32   : > { %s271_s24 = scalar_lea.sflag [#allocation3], %s270_s15  ;;  %s3410_s16 = scalar_lea.vmem %s284_s11, 2048 }
  0x33   : > { %p3399_p13 = pneg %p3653_p2  ;;  %p3411_p0 = scmp.ne.s32.totalorder %s284_s11, %s3410_s16 }
  0x34   : > { %s3500_s3 = smov [#allocation2]  }
  0x35   : > { %p3413_p3 = pnand %p3411_p0, %p3399_p13  ;;  %s3415_s21 = sshll.u32 %s3500_s3, 4  ;;  %s3416_s21 = int_to_ptr.vmem [resolvable:$false] %s3415_s21 }
  0x36   : > { %s3417_s23 = scalar_lea.vmem %s3416_s21, 4096  ;;  %p3418_p5 = scmp.lt.s32.totalorder %s284_s11, %s3416_s21 }
  0x37   : > { %p3414_p4 = pneg %p3413_p3  ;;  %p3419_p7 = scmp.lt.s32.totalorder %s3417_s23, %s3410_s16 }
  0x39   : > { %p3420_p8 = por %p3419_p7, %p3418_p5 }
  0x3b   : > { %p3421_p12 = pnand %p3420_p8, %p3414_p4 }
  0x3d   : > { %3424 = shalt.err (!%p3421_p12)
}
  0x3e   : > { %s3501_s5 = smov 128   ;;  %s3502_s6 = smov 8  }
  0x3f   : > { %3230 = dma.hbm_to_vmem [thread:$0]  (!%p3653_p2), %s282_s27, 2048, %s284_s11, %s271_s24, %s3501_s5, %s3501_s5, %s3502_s6  }
  0x40   : > { %295 = sbr.rel (%p3603_p6) target bundleno = 1044 (0x414), region = 40  ;;  %s3664_s28 = sand.u32 (!%p3603_p6), 1, %s3471_s25  }
  0x41   : > { %s2884_s9 = sshll.u32 (!%p3603_p6), %s3664_s28, 7  ;;  %s298_s15 = scalar_lea.sflag (!%p3603_p6), [#allocation3], %s3664_s28 }
  0x42   : > { %s3668_s17 = scalar_lea.vmem (!%p3603_p6), [#allocation2], %s2884_s9  ;;  %p4999_p9 = scmp.ne.s32.totalorder (!%p3603_p6), %s4991_s12, 0 }
  0x45   : > { %3458 = dma.done.wait (%p4999_p9), %s298_s15, 2048  }
  0x46   : > { %3460 = vsyncadd (%p4999_p9), %s298_s15, 4294965248 }
  0x47   : > { %3462 = dma.done.wait (%p3587_p1), [#allocation5], 3072  }
  0x48   : > { %3464 = vsyncadd (%p3587_p1), [#allocation5], 4294964224  ;;  %v348_v0 = vld [vmem:[%s3668_s17] sm:$0xff]  ;;  %v350_v1 = vld [vmem:[%s3668_s17 + $0x10] sm:$0xff]  ;;  %s3862_s19 = sshll.u32 %s3664_s28, 8  ;;  %vm1062_vm0 = vcmask 257024  }
  0x49   : > { %366 = vadd.xlane.f32.xlu0 %v348_v0  ;;  %370 = vadd.xlane.f32.xlu1 %v350_v1  ;;  %v349_v2 = vld [vmem:[%s3668_s17 + $0x8] sm:$0xff]  ;;  %v351_v3 = vld [vmem:[%s3668_s17 + $0x18] sm:$0xff]  ;;  %v352_v4 = vld [vmem:[%s3668_s17 + $0x20] sm:$0xff]  ;;  %s3871_s20 = scalar_lea.vmem [#allocation6], %s3862_s19  ;;  %s3504_s11 = smov 96  }
  0x4a   : > { %v353_v5 = vld [vmem:[%s3668_s17 + $0x28] sm:$0xff]  ;;  %v354_v6 = vld [vmem:[%s3668_s17 + $0x30] sm:$0xff]  ;;  %v355_v7 = vld [vmem:[%s3668_s17 + $0x38] sm:$0xff]  ;;  %s3881_s24 = scalar_lea.vmem [#allocation7], %s3862_s19  ;;  %s3505_s16 = smov 64  }
  0x4b   : > { %v3687_v8 = vld [vmem:[%s3668_s17 + $0x40] sm:$0xff]  ;;  %v3690_v9 = vld [vmem:[%s3668_s17 + $0x48] sm:$0xff]  ;;  %v3695_v10 = vld [vmem:[%s3668_s17 + $0x50] sm:$0xff]  ;;  %s3898_s3 = scalar_lea.vmem [#allocation8], %s3862_s19  ;;  %s3506_s21 = smov 32  }
  0x4c   : > { %v3698_v11 = vld [vmem:[%s3668_s17 + $0x58] sm:$0xff]  ;;  %v3703_v12 = vld [vmem:[%s3668_s17 + $0x60] sm:$0xff]  ;;  %v3706_v13 = vld [vmem:[%s3668_s17 + $0x68] sm:$0xff]  ;;  %s5001_s5 = sld [smem:[#allocation11_spill]] (%p3631_p10) }
  0x4d   : > { %368 = vadd.xlane.f32.xlu0 %v349_v2  ;;  %372 = vadd.xlane.f32.xlu1 %v351_v3  ;;  %v3711_v14 = vld [vmem:[%s3668_s17 + $0x70] sm:$0xff]  ;;  %v3714_v15 = vld [vmem:[%s3668_s17 + $0x78] sm:$0xff]  ;;  %s5002_s6 = sld [smem:[#allocation12_spill]] (%p3631_p10) }
  0x4e   : > { %v3307_v16 = vld [vmem:[#allocation4 + $0xac] ss:$12 sps:$4 sm:$0xff]   ;;  %v3309_v17 = vld [vmem:[#allocation4 + $0xa8] ss:$12 sps:$4 sm:$0xff]   ;;  %v3312_v54 = vld [vmem:[#allocation4 + $0xb0] ss:$12 sps:$4 sm:$0xff]  }
  0x4f   : > { %772 = vmatprep.subr.bf16.mxu0 %v3307_v16  ;;  %v3310_v53 = vld [vmem:[#allocation4 + $0x94] ss:$12 sps:$4 sm:$0xff]   ;;  %v3313_v55 = vld [vmem:[#allocation4 + $0x90] ss:$12 sps:$4 sm:$0xff]   ;;  %3185 = vmatprep.subr.bf16.mxu1 %v3312_v54  ;;  %s5003_s12 = sld [smem:[#allocation16_spill]] (%p3631_p10) }
  0x50   : > { %773 = vmatpush1.bf16.msra.mxu0 %v3309_v17  ;;  %3186 = vmatpush3.bf16.msra.mxu1 %v3312_v54  ;;  %v3318_v17 = vld [vmem:[#allocation4 + $0x64] ss:$12 sps:$4 sm:$0xff]  }
  0x51   : > { %374 = vadd.xlane.f32.xlu0 %v352_v4  ;;  %376 = vadd.xlane.f32.xlu1 %v353_v5 }
  0x52   : > { %774 = vmatprep.subr.bf16.mxu0 %v3310_v53  ;;  %s3110_s28 = sshll.u32 (%p3631_p10), %s5001_s5, 4 }
  0x53   : > { %s3111_s9 = sshll.u32 (%p3631_p10), %s5002_s6, 8 }
  0x54   : > { %775 = vmatpush1.bf16.msra.mxu0 %v3313_v55  ;;  %s1825_s15 = sadd.s32 (%p3631_p10), %s3111_s9, %s3110_s28 }
  0x55   : > { %378 = vadd.xlane.f32.xlu0 %v354_v6  ;;  %380 = vadd.xlane.f32.xlu1 %v355_v7  ;;  %s3112_s17 = sshll.u32 (%p3631_p10), %s1825_s15, 2 }
  0x56   : > { %s4745_s13 = scalar_lea.vmem (%p3631_p10), %s5003_s12, %s3112_s17 }
  0x59   : > { %382 = vadd.xlane.f32.xlu0 %v3687_v8  ;;  %384 = vadd.xlane.f32.xlu1 %v3690_v9 }
  0x5d   : > { %386 = vadd.xlane.f32.xlu0 %v3695_v10  ;;  %388 = vadd.xlane.f32.xlu1 %v3698_v11 }
  0x61   : > { %390 = vadd.xlane.f32.xlu0 %v3703_v12  ;;  %392 = vadd.xlane.f32.xlu1 %v3706_v13 }
  0x65   : > { %394 = vadd.xlane.f32.xlu0 %v3711_v14  ;;  %396 = vadd.xlane.f32.xlu1 %v3714_v15 }
  0xd2   : > { %v367_v18 = vpop.xlane.xlu0 %366  ;;  %v371_v19 = vpop.xlane.xlu1 %370 }
  0xd3   : > { %v399_v20 = vmul.f32 0.0078125, %v367_v18  ;;  %v401_v21 = vmul.f32 0.0078125, %v371_v19  ;;  %v3320_v18 = vld [vmem:[#allocation4 + $0x80] ss:$12 sps:$4 sm:$0xff]  }
  0xd5   : > { %v3718_v22 = vsub.f32 %v348_v0, %v399_v20  ;;  %v3720_v23 = vsub.f32 %v350_v1, %v401_v21  ;;  %v3314_v0 = vld [vmem:[#allocation4 + $0x7c] ss:$12 sps:$4 sm:$0xff]   ;;  %v3316_v1 = vld [vmem:[#allocation4 + $0x98] ss:$12 sps:$4 sm:$0xff]   ;;  %v3321_v20 = vld [vmem:[#allocation4 + $0x60] ss:$12 sps:$4 sm:$0xff]  }
  0xd6   : > { %v369_v24 = vpop.xlane.xlu0 %368  ;;  %v373_v25 = vpop.xlane.xlu1 %372  ;;  %776 = vmatprep.subr.bf16.mxu0 %v3314_v0  ;;  %3187 = vmatprep.subr.bf16.mxu1 %v3316_v1 }
  0xd7   : > { %v400_v26 = vmul.f32 0.0078125, %v369_v24  ;;  %v431_v27 = vmul.f32 %v3718_v22, %v3718_v22  ;;  %v402_v28 = vmul.f32 0.0078125, %v373_v25  ;;  %v433_v29 = vmul.f32 %v3720_v23, %v3720_v23  ;;  %3188 = vmatpush3.bf16.msra.mxu1 %v3316_v1 }
  0xd8   : > { %3189 = vmatprep.subr.bf16.mxu1 %v3320_v18 }
  0xd9   : > { %447 = vadd.xlane.f32.xlu0 %v431_v27  ;;  %v3726_v30 = vsub.f32 %v349_v2, %v400_v26  ;;  %v3728_v31 = vsub.f32 %v351_v3, %v402_v28  ;;  %v3322_v28 = vld [vmem:[#allocation4 + $0x4c] ss:$12 sps:$4 sm:$0xff]  }
  0xda   : > { %v375_v32 = vpop.xlane.xlu0 %374  ;;  %v377_v33 = vpop.xlane.xlu1 %376 }
  0xdb   : > { %v403_v34 = vmul.f32 0.0078125, %v375_v32  ;;  %v432_v35 = vmul.f32 %v3726_v30, %v3726_v30  ;;  %v404_v36 = vmul.f32 0.0078125, %v377_v33  ;;  %v434_v37 = vmul.f32 %v3728_v31, %v3728_v31  ;;  %3190 = vmatpush3.bf16.msra.mxu1 %v3320_v18  ;;  %v3325_v33 = vld [vmem:[#allocation4 + $0x48] ss:$12 sps:$4 sm:$0xff]  }
  0xdd   : > { %451 = vadd.xlane.f32.xlu0 %v433_v29  ;;  %449 = vadd.xlane.f32.xlu1 %v432_v35  ;;  %v3734_v38 = vsub.f32 %v352_v4, %v403_v34  ;;  %v3736_v39 = vsub.f32 %v353_v5, %v404_v36  ;;  %v3317_v5 = vld [vmem:[#allocation4 + $0x78] ss:$12 sps:$4 sm:$0xff]   ;;  %v3324_v29 = vld [vmem:[#allocation4 + $0x68] ss:$12 sps:$4 sm:$0xff]   ;;  %v3328_v36 = vld [vmem:[#allocation4 + $0x50] ss:$12 sps:$4 sm:$0xff]  }
  0xde   : > { %v379_v40 = vpop.xlane.xlu0 %378  ;;  %v381_v41 = vpop.xlane.xlu1 %380  ;;  %777 = vmatpush1.bf16.msra.mxu0 %v3317_v5  ;;  %3191 = vmatprep.subr.bf16.mxu1 %v3324_v29  ;;  %v3326_v35 = vld [vmem:[#allocation4 + $0x34] ss:$12 sps:$4 sm:$0xff]  }
  0xdf   : > { %v405_v42 = vmul.f32 0.0078125, %v379_v40  ;;  %v435_v43 = vmul.f32 %v3734_v38, %v3734_v38  ;;  %v406_v44 = vmul.f32 0.0078125, %v381_v41  ;;  %v436_v45 = vmul.f32 %v3736_v39, %v3736_v39  ;;  %778 = vmatprep.subr.bf16.mxu0 %v3318_v17  ;;  %3192 = vmatpush3.bf16.msra.mxu1 %v3324_v29  ;;  %v3332_v40 = vld [vmem:[#allocation4 + $0x38] ss:$12 sps:$4 sm:$0xff]  }
  0xe0   : > { %3193 = vmatprep.subr.bf16.mxu1 %v3328_v36  ;;  %v3333_v41 = vld [vmem:[#allocation4 + $0x18] ss:$12 sps:$4 sm:$0xff]  }
  0xe1   : > { %453 = vadd.xlane.f32.xlu1 %v434_v37  ;;  %455 = vadd.xlane.f32.xlu0 %v435_v43  ;;  %v3742_v46 = vsub.f32 %v354_v6, %v405_v42  ;;  %v3744_v47 = vsub.f32 %v355_v7, %v406_v44  ;;  %v3334_v42 = vld [vmem:[#allocation4 + $0x4] ss:$12 sps:$4 sm:$0xff]   ;;  %v3336_v43 = vld [vmem:[#allocation4 + $0x20] ss:$12 sps:$4 sm:$0xff]  }
  0xe2   : > { %v383_v48 = vpop.xlane.xlu0 %382  ;;  %v385_v49 = vpop.xlane.xlu1 %384  ;;  %779 = vmatpush1.bf16.msra.mxu0 %v3321_v20  ;;  %v3337_v44 = vld [vmem:[#allocation4] ss:$12 sps:$4 sm:$0xff]  }
  0xe3   : > { %v407_v50 = vmul.f32 0.0078125, %v383_v48  ;;  %v437_v51 = vmul.f32 %v3742_v46, %v3742_v46  ;;  %v408_v52 = vmul.f32 0.0078125, %v385_v49  ;;  %v438_v56 = vmul.f32 %v3744_v47, %v3744_v47  ;;  %780 = vmatprep.subr.bf16.mxu0 %v3322_v28  ;;  %3194 = vmatpush3.bf16.msra.mxu1 %v3328_v36 }
  0xe4   : > { %3195 = vmatprep.subr.bf16.mxu1 %v3332_v40  ;;  %v3503_v48 = vmov 0  }
  0xe5   : > { %457 = vadd.xlane.f32.xlu1 %v436_v45  ;;  %459 = vadd.xlane.f32.xlu0 %v437_v51  ;;  %v3751_v57 = vsub.f32 %v3687_v8, %v407_v50  ;;  %v3754_v58 = vsub.f32 %v3690_v9, %v408_v52  ;;  %v3338_v45 = vld [vmem:[#allocation4 + $0x8] ss:$12 sps:$4 sm:$0xff]  }
  0xe6   : > { %v387_v59 = vpop.xlane.xlu0 %386  ;;  %v389_v60 = vpop.xlane.xlu1 %388  ;;  %781 = vmatpush1.bf16.msra.mxu0 %v3325_v33  ;;  %804 = vmatprep.mubr.bf16.mxu0 %v3503_v48 }
  0xe7   : > { %v409_v61 = vmul.f32 0.0078125, %v387_v59  ;;  %v439_v62 = vmul.f32 %v3751_v57, %v3751_v57  ;;  %v410_v63 = vmul.f32 0.0078125, %v389_v60  ;;  %v440_v2 = vmul.f32 %v3754_v58, %v3754_v58  ;;  %782 = vmatprep.subr.bf16.mxu0 %v3326_v35  ;;  %3196 = vmatpush3.bf16.msra.mxu1 %v3332_v40 }
  0xe8   : > { %3197 = vmatprep.subr.bf16.mxu1 %v3336_v43 }
  0xe9   : > { %461 = vadd.xlane.f32.xlu1 %v438_v56  ;;  %463 = vadd.xlane.f32.xlu0 %v439_v62  ;;  %v3761_v3 = vsub.f32 %v3695_v10, %v409_v61  ;;  %v3764_v4 = vsub.f32 %v3698_v11, %v410_v63 }
  0xea   : > { %v391_v6 = vpop.xlane.xlu0 %390  ;;  %v393_v7 = vpop.xlane.xlu1 %392 }
  0xeb   : > { %v411_v8 = vmul.f32 0.0078125, %v391_v6  ;;  %v441_v9 = vmul.f32 %v3761_v3, %v3761_v3  ;;  %v412_v16 = vmul.f32 0.0078125, %v393_v7  ;;  %v442_v10 = vmul.f32 %v3764_v4, %v3764_v4  ;;  %3198 = vmatpush3.bf16.msra.mxu1 %v3336_v43 }
  0xec   : > { %3199 = vmatprep.subr.bf16.mxu1 %v3338_v45 }
  0xed   : > { %465 = vadd.xlane.f32.xlu1 %v440_v2  ;;  %467 = vadd.xlane.f32.xlu0 %v441_v9  ;;  %v3771_v11 = vsub.f32 %v3703_v12, %v411_v8  ;;  %v3774_v19 = vsub.f32 %v3706_v13, %v412_v16 }
  0xee   : > { %v395_v21 = vpop.xlane.xlu0 %394  ;;  %v397_v24 = vpop.xlane.xlu1 %396 }
  0xef   : > { %v413_v25 = vmul.f32 0.0078125, %v395_v21  ;;  %v443_v26 = vmul.f32 %v3771_v11, %v3771_v11  ;;  %v414_v27 = vmul.f32 0.0078125, %v397_v24  ;;  %v444_v12 = vmul.f32 %v3774_v19, %v3774_v19  ;;  %3200 = vmatpush3.bf16.msra.mxu1 %v3338_v45 }
  0xf1   : > { %469 = vadd.xlane.f32.xlu1 %v442_v10  ;;  %471 = vadd.xlane.f32.xlu0 %v443_v26  ;;  %v3781_v13 = vsub.f32 %v3711_v14, %v413_v25  ;;  %v3784_v32 = vsub.f32 %v3714_v15, %v414_v27  ;;  %v3329_v14 = vld [vmem:[#allocation4 + $0x30] ss:$12 sps:$4 sm:$0xff]   ;;  %v3794_v25 = vld [vmem:[%s4973_s1] ss:$0 sm:$0xff] }
  0xf2   : > { %783 = vmatpush1.bf16.msra.mxu0 %v3329_v14  ;;  %v3330_v15 = vld [vmem:[#allocation4 + $0x1c] ss:$12 sps:$4 sm:$0xff]   ;;  %v3801_v14 = vld [vmem:[%s4974_s2] ss:$0 sm:$0xff] }
  0xf3   : > { %v445_v34 = vmul.f32 %v3781_v13, %v3781_v13  ;;  %v446_v37 = vmul.f32 %v3784_v32, %v3784_v32  ;;  %784 = vmatprep.subr.bf16.mxu0 %v3330_v15 }
  0xf5   : > { %473 = vadd.xlane.f32.xlu1 %v444_v12  ;;  %475 = vadd.xlane.f32.xlu0 %v445_v34 }
  0xf6   : > { %785 = vmatpush1.bf16.msra.mxu0 %v3333_v41 }
  0xf7   : > { %786 = vmatprep.subr.bf16.mxu0 %v3334_v42 }
  0xf9   : > { %477 = vadd.xlane.f32.xlu1 %v446_v37 }
  0xfa   : > { %787 = vmatpush1.bf16.msra.mxu0 %v3337_v44 }
 0x162   : > { %v448_v49 = vpop.xlane.xlu0 %447 }
 0x163   : > { %v479_v50 = vmul.f32 0.0078125, %v448_v49 }
 0x165   : > { %v495_v51 = vadd.f32 1e-05, %v479_v50 }
 0x166   : > { %v450_v52 = vpop.xlane.xlu1 %449  ;;  %v452_v53 = vpop.xlane.xlu0 %451 }
 0x167   : > { %3339 = vrsqrt.f32 %v495_v51  ;;  %v480_v54 = vmul.f32 0.0078125, %v450_v52  ;;  %v481_v55 = vmul.f32 0.0078125, %v452_v53 }
 0x169   : > { %v496_v56 = vadd.f32 1e-05, %v480_v54  ;;  %v497_v59 = vadd.f32 1e-05, %v481_v55 }
 0x16a   : > { %v454_v60 = vpop.xlane.xlu1 %453  ;;  %v456_v61 = vpop.xlane.xlu0 %455 }
 0x16b   : > { %3341 = vrsqrt.f32 %v496_v56  ;;  %v482_v62 = vmul.f32 0.0078125, %v454_v60  ;;  %v483_v63 = vmul.f32 0.0078125, %v456_v61 }
 0x16c   : > { %3343 = vrsqrt.f32 %v497_v59 }
 0x16d   : > { %v498_v0 = vadd.f32 1e-05, %v482_v62  ;;  %v499_v1 = vadd.f32 1e-05, %v483_v63 }
 0x16e   : > { %v458_v2 = vpop.xlane.xlu1 %457  ;;  %v460_v5 = vpop.xlane.xlu0 %459 }
 0x16f   : > { %3345 = vrsqrt.f32 %v498_v0  ;;  %v484_v6 = vmul.f32 0.0078125, %v458_v2  ;;  %v485_v7 = vmul.f32 0.0078125, %v460_v5 }
 0x170   : > { %3347 = vrsqrt.f32 %v499_v1 }
 0x171   : > { %v500_v8 = vadd.f32 1e-05, %v484_v6  ;;  %v501_v9 = vadd.f32 1e-05, %v485_v7 }
 0x172   : > { %v462_v16 = vpop.xlane.xlu1 %461  ;;  %v464_v17 = vpop.xlane.xlu0 %463 }
 0x173   : > { %3349 = vrsqrt.f32 %v500_v8  ;;  %v486_v18 = vmul.f32 0.0078125, %v462_v16  ;;  %v487_v10 = vmul.f32 0.0078125, %v464_v17 }
 0x174   : > { %v3340_v20 = vpop.eup %3339  ;;  %3351 = vrsqrt.f32 %v501_v9 }
 0x175   : > { %v502_v21 = vadd.f32 1e-05, %v486_v18  ;;  %v503_v24 = vadd.f32 1e-05, %v487_v10  ;;  %v527_v26 = vmul.f32 %v3340_v20, %v3718_v22 }
 0x176   : > { %v466_v27 = vpop.xlane.xlu1 %465  ;;  %v468_v28 = vpop.xlane.xlu0 %467 }
 0x177   : > { %3353 = vrsqrt.f32 %v502_v21  ;;  %v488_v29 = vmul.f32 0.0078125, %v466_v27  ;;  %v489_v12 = vmul.f32 0.0078125, %v468_v28  ;;  %v549_v34 = vmul.f32 %v3794_v25, %v527_v26 }
 0x178   : > { %v3342_v33 = vpop.eup %3341  ;;  %3355 = vrsqrt.f32 %v503_v24 }
 0x179   : > { %v3344_v35 = vpop.eup %3343  ;;  %v504_v36 = vadd.f32 1e-05, %v488_v29  ;;  %v505_v37 = vadd.f32 1e-05, %v489_v12  ;;  %v528_v15 = vmul.f32 %v3342_v33, %v3726_v30  ;;  %v571_v49 = vadd.f32 %v3801_v14, %v549_v34 }
 0x17a   : > { %v470_v22 = vpop.xlane.xlu1 %469  ;;  %v472_v40 = vpop.xlane.xlu0 %471  ;;  %v529_v41 = vmul.f32 %v3344_v35, %v3720_v23 }
 0x17b   : > { %3357 = vrsqrt.f32 %v504_v36  ;;  %v490_v42 = vmul.f32 0.0078125, %v470_v22  ;;  %v491_v43 = vmul.f32 0.0078125, %v472_v40  ;;  %v550_v44 = vmul.f32 %v3794_v25, %v528_v15 }
 0x17c   : > { %v3346_v45 = vpop.eup %3345  ;;  %3359 = vrsqrt.f32 %v505_v37  ;;  %v551_v23 = vmul.f32 %v3794_v25, %v529_v41 }
 0x17d   : > { %v3348_v50 = vpop.eup %3347  ;;  %v506_v51 = vadd.f32 1e-05, %v490_v42  ;;  %v507_v52 = vadd.f32 1e-05, %v491_v43  ;;  %v572_v53 = vadd.f32 %v3801_v14, %v550_v44  ;;  %v530_v30 = vmul.f32 %v3346_v45, %v3728_v31 }
 0x17e   : > { %v474_v54 = vpop.xlane.xlu1 %473  ;;  %v476_v55 = vpop.xlane.xlu0 %475  ;;  %v531_v56 = vmul.f32 %v3348_v50, %v3734_v38  ;;  %v573_v38 = vadd.f32 %v3801_v14, %v551_v23 }
 0x17f   : > { %3361 = vrsqrt.f32 %v506_v51  ;;  %v492_v59 = vmul.f32 0.0078125, %v474_v54  ;;  %v493_v60 = vmul.f32 0.0078125, %v476_v55  ;;  %v587_v61 = vpack.c.bf16 %v572_v53, %v571_v49 }
 0x180   : > { %v3350_v62 = vpop.eup %3349  ;;  %3363 = vrsqrt.f32 %v507_v52  ;;  %v552_v63 = vmul.f32 %v3794_v25, %v530_v30  ;;  %v553_v5 = vmul.f32 %v3794_v25, %v531_v56 }
 0x181   : > { %v3352_v0 = vpop.eup %3351  ;;  %v508_v1 = vadd.f32 1e-05, %v492_v59  ;;  %v509_v2 = vadd.f32 1e-05, %v493_v60  ;;  %805 = vmatmul.mubr.bf16.vlgmr.msra.gmra.mxu0 %v587_v61  ;;  %3201 = vmatprep.mubr.bf16.mxu1 %v587_v61  ;;  %v532_v31 = vmul.f32 %v3350_v62, %v3736_v39 }
 0x182   : > { %v478_v6 = vpop.xlane.xlu1 %477  ;;  %v574_v7 = vadd.f32 %v3801_v14, %v552_v63  ;;  %814 = vmatprep.mubr.bf16.mxu0 %v3503_v48  ;;  %v533_v8 = vmul.f32 %v3352_v0, %v3742_v46  ;;  %v575_v21 = vadd.f32 %v3801_v14, %v553_v5 }
 0x183   : > { %3365 = vrsqrt.f32 %v508_v1  ;;  %v494_v9 = vmul.f32 0.0078125, %v478_v6  ;;  %v554_v16 = vmul.f32 %v3794_v25, %v532_v31 }
 0x184   : > { %v3354_v17 = vpop.eup %3353  ;;  %3367 = vrsqrt.f32 %v509_v2  ;;  %v588_v18 = vpack.c.bf16 %v574_v7, %v573_v38  ;;  %v555_v39 = vmul.f32 %v3794_v25, %v533_v8 }
 0x185   : > { %v3356_v10 = vpop.eup %3355  ;;  %v510_v20 = vadd.f32 1e-05, %v494_v9  ;;  %v576_v24 = vadd.f32 %v3801_v14, %v554_v16  ;;  %v534_v26 = vmul.f32 %v3354_v17, %v3744_v47 }
 0x186   : > { %3202 = vmatmul.mubr.bf16.vlgmr.msra.gmra.mxu1 %v588_v18  ;;  %v535_v46 = vmul.f32 %v3356_v10, %v3751_v57  ;;  %v577_v12 = vadd.f32 %v3801_v14, %v555_v39 }
 0x187   : > { %3369 = vrsqrt.f32 %v510_v20  ;;  %v589_v27 = vpack.c.bf16 %v576_v24, %v575_v21  ;;  %v556_v28 = vmul.f32 %v3794_v25, %v534_v26 }
 0x188   : > { %v3358_v29 = vpop.eup %3357  ;;  %v557_v36 = vmul.f32 %v3794_v25, %v535_v46 }
 0x189   : > { %v3360_v33 = vpop.eup %3359  ;;  %815 = vmatmul.mubr.bf16.gmra.mxu0 %v588_v18  ;;  %3205 = vmatprep.mubr.bf16.mxu1 %v589_v27  ;;  %v578_v34 = vadd.f32 %v3801_v14, %v556_v28  ;;  %v536_v35 = vmul.f32 %v3358_v29, %v3754_v58 }
 0x18a   : > { %824 = vmatprep.mubr.bf16.mxu0 %v3503_v48  ;;  %v537_v47 = vmul.f32 %v3360_v33, %v3761_v3  ;;  %v579_v41 = vadd.f32 %v3801_v14, %v557_v36 }
 0x18b   : > { %v590_v57 = vpack.c.bf16 %v578_v34, %v577_v12  ;;  %v558_v37 = vmul.f32 %v3794_v25, %v536_v35 }
 0x18c   : > { %v3362_v15 = vpop.eup %3361  ;;  %v559_v22 = vmul.f32 %v3794_v25, %v537_v47 }
 0x18d   : > { %v3364_v40 = vpop.eup %3363  ;;  %v580_v42 = vadd.f32 %v3801_v14, %v558_v37  ;;  %v538_v43 = vmul.f32 %v3362_v15, %v3764_v4 }
 0x18e   : > { %3206 = vmatmul.mubr.bf16.gmra.mxu1 %v590_v57  ;;  %v539_v58 = vmul.f32 %v3364_v40, %v3771_v11  ;;  %v581_v49 = vadd.f32 %v3801_v14, %v559_v22 }
 0x18f   : > { %v591_v44 = vpack.c.bf16 %v580_v42, %v579_v41  ;;  %v560_v45 = vmul.f32 %v3794_v25, %v538_v43 }
 0x190   : > { %v3366_v3 = vpop.eup %3365  ;;  %v561_v53 = vmul.f32 %v3794_v25, %v539_v58 }
 0x191   : > { %v3368_v50 = vpop.eup %3367  ;;  %825 = vmatmul.mubr.bf16.gmra.mxu0 %v589_v27  ;;  %3209 = vmatprep.mubr.bf16.mxu1 %v591_v44  ;;  %v582_v51 = vadd.f32 %v3801_v14, %v560_v45  ;;  %v540_v52 = vmul.f32 %v3366_v3, %v3774_v19 }
 0x192   : > { %834 = vmatprep.mubr.bf16.mxu0 %v3503_v48  ;;  %v541_v4 = vmul.f32 %v3368_v50, %v3781_v13  ;;  %v583_v55 = vadd.f32 %v3801_v14, %v561_v53 }
 0x193   : > { %v592_v11 = vpack.c.bf16 %v582_v51, %v581_v49  ;;  %v562_v30 = vmul.f32 %v3794_v25, %v540_v52 }
 0x194   : > { %v3370_v54 = vpop.eup %3369  ;;  %v563_v59 = vmul.f32 %v3794_v25, %v541_v4 }
 0x195   : > { %v584_v23 = vadd.f32 %v3801_v14, %v562_v30  ;;  %v542_v56 = vmul.f32 %v3370_v54, %v3784_v32  ;;  %v629_v32 = vlaneseq }
 0x196   : > { %3210 = vmatmul.mubr.bf16.gmra.mxu1 %v592_v11  ;;  %v585_v13 = vadd.f32 %v3801_v14, %v563_v59 }
 0x197   : > { %v593_v19 = vpack.c.bf16 %v584_v23, %v583_v55  ;;  %v564_v60 = vmul.f32 %v3794_v25, %v542_v56  ;;  %v630_v25 = vshrl.u32 %v629_v32, 7 }
 0x199   : > { %835 = vmatmul.mubr.bf16.gmra.mxu0 %v590_v57  ;;  %3213 = vmatprep.mubr.bf16.mxu1 %v593_v19  ;;  %v586_v61 = vadd.f32 %v3801_v14, %v564_v60  ;;  %v631_v63 = vsub.s32 0, %v630_v25  ;;  %v627_v14 = vld [vmem:[%s4976_s4] sm:$0x7]  ;;  %v635_v0 = vsub.s32 1, %v630_v25  ;;  %v639_v2 = vsub.s32 2, %v630_v25 }
 0x19a   : > { %844 = vmatprep.mubr.bf16.mxu0 %v3503_v48 }
 0x19b   : > { %v594_v62 = vpack.c.bf16 %v586_v61, %v585_v13  ;;  %v3859_v1 = vrot.slane %v627_v14, %v631_v63  ;;  %v3864_v31 = vrot.slane %v627_v14, %v635_v0  ;;  %v3867_v38 = vrot.slane %v627_v14, %v639_v2 }
 0x19e   : > { %3214 = vmatmul.mubr.bf16.gmra.mxu1 %v594_v62 }
 0x1a1   : > { %845 = vmatmul.mubr.bf16.gmra.mxu0 %v591_v44 }
 0x1a2   : > { %854 = vmatprep.mubr.bf16.mxu0 %v3503_v48 }
 0x1a9   : > { %855 = vmatmul.mubr.bf16.gmra.mxu0 %v592_v11 }
 0x1aa   : > { %864 = vmatprep.mubr.bf16.mxu0 %v3503_v48 }
 0x1b1   : > { %865 = vmatmul.mubr.bf16.gmra.mxu0 %v593_v19 }
 0x1b2   : > { %874 = vmatprep.mubr.bf16.mxu0 %v3503_v48 }
 0x1b9   : > { %875 = vmatmul.mubr.bf16.gmra.mxu0 %v594_v62 }
 0x241   : > { %v806_v5 = vpop.f32.mrf.mxu0 }
 0x242   : > { %v807_v48 = vadd.f32 %v806_v5, %v3859_v1 }
 0x243   : > { %v808_v6 = vpop.f32.mrf.mxu0 }
 0x244   : > { %v3121_v7 = vpack.c.bf16 %v807_v48, %v807_v48  ;;  %v809_v8 = vadd.f32 %v808_v6, %v3864_v31 }
 0x245   : > { %v810_v9 = vpop.f32.mrf.mxu0 }
 0x246   : > { %1063 = vst.msk [vmem:[%s3871_s20] sm:$0xf] %vm1062_vm0, %v3121_v7  ;;  %v3875_v16 = vpack.c.bf16 %v809_v8, %v809_v8  ;;  %v811_v17 = vadd.f32 %v810_v9, %v3859_v1  ;;  %v3203_v18 = vpop.f32.mrf.mxu1  ;;  %1223 = vrot.lane.b32.xlu0 %v3121_v7, %s3504_s11 }
 0x247   : > { %v928_v39 = vadd.f32 %v3203_v18, %v3867_v38  ;;  %v812_v10 = vpop.f32.mrf.mxu0 }
 0x248   : > { %1135 = vst.msk [vmem:[%s3881_s24] sm:$0xf] %vm1062_vm0, %v3875_v16  ;;  %v3122_v20 = vpack.c.bf16 %v811_v17, %v811_v17  ;;  %v813_v21 = vadd.f32 %v812_v10, %v3864_v31  ;;  %v919_v24 = vpop.f32.mrf.mxu1 }
 0x249   : > { %v3887_v26 = vpack.c.bf16 %v928_v39, %v928_v39  ;;  %v920_v46 = vadd.f32 %v919_v24, %v3867_v38  ;;  %v816_v27 = vpop.f32.mrf.mxu0 }
 0x24a   : > { %1064 = vst.msk [vmem:[%s3871_s20 + $0x4] sm:$0xf] %vm1062_vm0, %v3122_v20  ;;  %v3892_v28 = vpack.c.bf16 %v813_v21, %v813_v21  ;;  %v817_v29 = vadd.f32 %v816_v27, %v3859_v1  ;;  %v3204_v12 = vpop.f32.mrf.mxu1  ;;  %1225 = vrot.lane.b32.xlu1 %v3122_v20, %s3504_s11  ;;  %1418 = vrot.lane.b32.xlu0 %v3121_v7, %s3505_s16 }
 0x24b   : > { %1209 = vst.msk [vmem:[%s3898_s3 + $0x8] sm:$0xf] %vm1062_vm0, %v3887_v26  ;;  %v3903_v33 = vpack.c.bf16 %v920_v46, %v920_v46  ;;  %v931_v34 = vadd.f32 %v3204_v12, %v3867_v38  ;;  %v818_v35 = vpop.f32.mrf.mxu0 }
 0x24c   : > { %1136 = vst.msk [vmem:[%s3881_s24 + $0x4] sm:$0xf] %vm1062_vm0, %v3892_v28  ;;  %v3909_v36 = vpack.c.bf16 %v817_v29, %v817_v29  ;;  %v819_v47 = vadd.f32 %v818_v35, %v3864_v31  ;;  %v922_v57 = vpop.f32.mrf.mxu1 }
 0x24d   : > { %1207 = vst.msk [vmem:[%s3898_s3] sm:$0xf] %vm1062_vm0, %v3903_v33  ;;  %v3915_v37 = vpack.c.bf16 %v931_v34, %v931_v34  ;;  %v923_v15 = vadd.f32 %v922_v57, %v3867_v38  ;;  %v820_v22 = vpop.f32.mrf.mxu0 }
 0x24e   : > { %1065 = vst.msk [vmem:[%s3871_s20 + $0x8] sm:$0xf] %vm1062_vm0, %v3909_v36  ;;  %v3921_v40 = vpack.c.bf16 %v819_v47, %v819_v47  ;;  %v821_v41 = vadd.f32 %v820_v22, %v3859_v1  ;;  %v3207_v42 = vpop.f32.mrf.mxu1  ;;  %1420 = vrot.lane.b32.xlu1 %v3122_v20, %s3505_s16  ;;  %1613 = vrot.lane.b32.xlu0 %v3121_v7, %s3506_s21 }
 0x24f   : > { %1210 = vst.msk [vmem:[%s3898_s3 + $0xc] sm:$0xf] %vm1062_vm0, %v3915_v37  ;;  %v3929_v43 = vpack.c.bf16 %v923_v15, %v923_v15  ;;  %v944_v58 = vadd.f32 %v3207_v42, %v3867_v38  ;;  %v822_v44 = vpop.f32.mrf.mxu0 }
 0x250   : > { %1137 = vst.msk [vmem:[%s3881_s24 + $0x8] sm:$0xf] %vm1062_vm0, %v3921_v40  ;;  %v3935_v45 = vpack.c.bf16 %v821_v41, %v821_v41  ;;  %v823_v3 = vadd.f32 %v822_v44, %v3864_v31  ;;  %v935_v49 = vpop.f32.mrf.mxu1 }
 0x251   : > { %1208 = vst.msk [vmem:[%s3898_s3 + $0x4] sm:$0xf] %vm1062_vm0, %v3929_v43  ;;  %v3941_v50 = vpack.c.bf16 %v944_v58, %v944_v58  ;;  %v936_v51 = vadd.f32 %v935_v49, %v3867_v38  ;;  %v826_v52 = vpop.f32.mrf.mxu0 }
 0x252   : > { %1066 = vst.msk [vmem:[%s3871_s20 + $0xc] sm:$0xf] %vm1062_vm0, %v3935_v45  ;;  %v3947_v53 = vpack.c.bf16 %v823_v3, %v823_v3  ;;  %v827_v4 = vadd.f32 %v826_v52, %v3859_v1  ;;  %v3208_v11 = vpop.f32.mrf.mxu1  ;;  %1615 = vrot.lane.b32.xlu1 %v3122_v20, %s3506_s21  ;;  %1357 = vrot.lane.b32.xlu0 %v3887_v26, %s3504_s11 }
 0x253   : > { %1213 = vst.msk [vmem:[%s3898_s3 + $0x18] sm:$0xf] %vm1062_vm0, %v3941_v50  ;;  %v3956_v30 = vpack.c.bf16 %v936_v51, %v936_v51  ;;  %v947_v54 = vadd.f32 %v3208_v11, %v3867_v38  ;;  %v828_v55 = vpop.f32.mrf.mxu0 }
 0x254   : > { %1138 = vst.msk [vmem:[%s3881_s24 + $0xc] sm:$0xf] %vm1062_vm0, %v3947_v53  ;;  %v3962_v23 = vpack.c.bf16 %v827_v4, %v827_v4  ;;  %v829_v56 = vadd.f32 %v828_v55, %v3864_v31  ;;  %v938_v59 = vpop.f32.mrf.mxu1 }
 0x255   : > { %1211 = vst.msk [vmem:[%s3898_s3 + $0x10] sm:$0xf] %vm1062_vm0, %v3956_v30  ;;  %v3968_v19 = vpack.c.bf16 %v947_v54, %v947_v54  ;;  %v939_v60 = vadd.f32 %v938_v59, %v3867_v38  ;;  %v830_v13 = vpop.f32.mrf.mxu0 }
 0x256   : > { %1067 = vst.msk [vmem:[%s3871_s20 + $0x10] sm:$0xf] %vm1062_vm0, %v3962_v23  ;;  %v3974_v61 = vpack.c.bf16 %v829_v56, %v829_v56  ;;  %v831_v62 = vadd.f32 %v830_v13, %v3859_v1  ;;  %v3211_v32 = vpop.f32.mrf.mxu1  ;;  %1552 = vrot.lane.b32.xlu0 %v3887_v26, %s3505_s16  ;;  %1359 = vrot.lane.b32.xlu1 %v3915_v37, %s3504_s11 }
 0x257   : > { %1214 = vst.msk [vmem:[%s3898_s3 + $0x1c] sm:$0xf] %vm1062_vm0, %v3968_v19  ;;  %v3984_v25 = vpack.c.bf16 %v939_v60, %v939_v60  ;;  %v960_v63 = vadd.f32 %v3211_v32, %v3867_v38  ;;  %v832_v14 = vpop.f32.mrf.mxu0 }
 0x258   : > { %1139 = vst.msk [vmem:[%s3881_s24 + $0x10] sm:$0xf] %vm1062_vm0, %v3974_v61  ;;  %v3990_v0 = vpack.c.bf16 %v831_v62, %v831_v62  ;;  %v833_v2 = vadd.f32 %v832_v14, %v3864_v31  ;;  %v951_v5 = vpop.f32.mrf.mxu1 }
 0x259   : > { %1212 = vst.msk [vmem:[%s3898_s3 + $0x14] sm:$0xf] %vm1062_vm0, %v3984_v25  ;;  %v3996_v48 = vpack.c.bf16 %v960_v63, %v960_v63  ;;  %v952_v6 = vadd.f32 %v951_v5, %v3867_v38  ;;  %v836_v7 = vpop.f32.mrf.mxu0 }
 0x25a   : > { %1068 = vst.msk [vmem:[%s3871_s20 + $0x14] sm:$0xf] %vm1062_vm0, %v3990_v0  ;;  %v4002_v8 = vpack.c.bf16 %v833_v2, %v833_v2  ;;  %v837_v9 = vadd.f32 %v836_v7, %v3859_v1  ;;  %v3212_v17 = vpop.f32.mrf.mxu1  ;;  %1747 = vrot.lane.b32.xlu0 %v3887_v26, %s3506_s21  ;;  %1554 = vrot.lane.b32.xlu1 %v3915_v37, %s3505_s16 }
 0x25b   : > { %1217 = vst.msk [vmem:[%s3898_s3 + $0x28] sm:$0xf] %vm1062_vm0, %v3996_v48  ;;  %v4012_v18 = vpack.c.bf16 %v952_v6, %v952_v6  ;;  %v963_v39 = vadd.f32 %v3212_v17, %v3867_v38  ;;  %v838_v10 = vpop.f32.mrf.mxu0 }
 0x25c   : > { %1140 = vst.msk [vmem:[%s3881_s24 + $0x14] sm:$0xf] %vm1062_vm0, %v4002_v8  ;;  %v4018_v20 = vpack.c.bf16 %v837_v9, %v837_v9  ;;  %v839_v21 = vadd.f32 %v838_v10, %v3864_v31  ;;  %v954_v24 = vpop.f32.mrf.mxu1 }
 0x25d   : > { %1215 = vst.msk [vmem:[%s3898_s3 + $0x20] sm:$0xf] %vm1062_vm0, %v4012_v18  ;;  %v4024_v26 = vpack.c.bf16 %v963_v39, %v963_v39  ;;  %v955_v46 = vadd.f32 %v954_v24, %v3867_v38  ;;  %v840_v27 = vpop.f32.mrf.mxu0 }
 0x25e   : > { %1069 = vst.msk [vmem:[%s3871_s20 + $0x18] sm:$0xf] %vm1062_vm0, %v4018_v20  ;;  %v4030_v29 = vpack.c.bf16 %v839_v21, %v839_v21  ;;  %v841_v12 = vadd.f32 %v840_v27, %v3859_v1  ;;  %v3215_v34 = vpop.f32.mrf.mxu1  ;;  %1288 = vrot.lane.b32.xlu0 %v3875_v16, %s3504_s11  ;;  %1749 = vrot.lane.b32.xlu1 %v3915_v37, %s3506_s21 }
 0x25f   : > { %1218 = vst.msk [vmem:[%s3898_s3 + $0x2c] sm:$0xf] %vm1062_vm0, %v4024_v26  ;;  %v4040_v35 = vpack.c.bf16 %v955_v46, %v955_v46  ;;  %v976_v47 = vadd.f32 %v3215_v34, %v3867_v38  ;;  %v842_v57 = vpop.f32.mrf.mxu0 }
 0x260   : > { %1141 = vst.msk [vmem:[%s3881_s24 + $0x18] sm:$0xf] %vm1062_vm0, %v4030_v29  ;;  %v4046_v15 = vpack.c.bf16 %v841_v12, %v841_v12  ;;  %v843_v22 = vadd.f32 %v842_v57, %v3864_v31  ;;  %v967_v41 = vpop.f32.mrf.mxu1 }
 0x261   : > { %1216 = vst.msk [vmem:[%s3898_s3 + $0x24] sm:$0xf] %vm1062_vm0, %v4040_v35  ;;  %v4052_v37 = vpack.c.bf16 %v976_v47, %v976_v47  ;;  %v968_v42 = vadd.f32 %v967_v41, %v3867_v38  ;;  %v846_v58 = vpop.f32.mrf.mxu0 }
 0x262   : > { %1070 = vst.msk [vmem:[%s3871_s20 + $0x1c] sm:$0xf] %vm1062_vm0, %v4046_v15  ;;  %v4058_v44 = vpack.c.bf16 %v843_v22, %v843_v22  ;;  %v847_v3 = vadd.f32 %v846_v58, %v3859_v1  ;;  %v3216_v49 = vpop.f32.mrf.mxu1  ;;  %1483 = vrot.lane.b32.xlu0 %v3875_v16, %s3505_s16  ;;  %1290 = vrot.lane.b32.xlu1 %v3892_v28, %s3504_s11 }
 0x263   : > { %1221 = vst.msk [vmem:[%s3898_s3 + $0x38] sm:$0xf] %vm1062_vm0, %v4052_v37  ;;  %v4068_v51 = vpack.c.bf16 %v968_v42, %v968_v42  ;;  %v979_v52 = vadd.f32 %v3216_v49, %v3867_v38  ;;  %v848_v4 = vpop.f32.mrf.mxu0 }
 0x264   : > { %1142 = vst.msk [vmem:[%s3881_s24 + $0x1c] sm:$0xf] %vm1062_vm0, %v4058_v44  ;;  %v4074_v11 = vpack.c.bf16 %v847_v3, %v847_v3  ;;  %v849_v54 = vadd.f32 %v848_v4, %v3864_v31  ;;  %v970_v55 = vpop.f32.mrf.mxu1 }
 0x265   : > { %1219 = vst.msk [vmem:[%s3898_s3 + $0x30] sm:$0xf] %vm1062_vm0, %v4068_v51  ;;  %v4080_v56 = vpack.c.bf16 %v979_v52, %v979_v52  ;;  %v971_v59 = vadd.f32 %v970_v55, %v3867_v38  ;;  %v850_v60 = vpop.f32.mrf.mxu0 }
 0x266   : > { %1071 = vst.msk [vmem:[%s3871_s20 + $0x20] sm:$0xf] %vm1062_vm0, %v4074_v11  ;;  %v4086_v13 = vpack.c.bf16 %v849_v54, %v849_v54  ;;  %v851_v62 = vadd.f32 %v850_v60, %v3859_v1  ;;  %1678 = vrot.lane.b32.xlu0 %v3875_v16, %s3506_s21  ;;  %1485 = vrot.lane.b32.xlu1 %v3892_v28, %s3505_s16 }
 0x267   : > { %1222 = vst.msk [vmem:[%s3898_s3 + $0x3c] sm:$0xf] %vm1062_vm0, %v4080_v56  ;;  %v4096_v32 = vpack.c.bf16 %v971_v59, %v971_v59  ;;  %v852_v38 = vpop.f32.mrf.mxu0 }
 0x268   : > { %1143 = vst.msk [vmem:[%s3881_s24 + $0x20] sm:$0xf] %vm1062_vm0, %v4086_v13  ;;  %v4101_v63 = vpack.c.bf16 %v851_v62, %v851_v62  ;;  %v853_v14 = vadd.f32 %v852_v38, %v3864_v31 }
 0x269   : > { %1220 = vst.msk [vmem:[%s3898_s3 + $0x34] sm:$0xf] %vm1062_vm0, %v4096_v32  ;;  %v856_v16 = vpop.f32.mrf.mxu0 }
 0x26a   : > { %1072 = vst.msk [vmem:[%s3871_s20 + $0x24] sm:$0xf] %vm1062_vm0, %v4101_v63  ;;  %v4110_v2 = vpack.c.bf16 %v853_v14, %v853_v14  ;;  %v857_v5 = vadd.f32 %v856_v16, %v3859_v1  ;;  %1680 = vrot.lane.b32.xlu1 %v3892_v28, %s3506_s21  ;;  %1353 = vrot.lane.b32.xlu0 %v3903_v33, %s3504_s11 }
 0x26b   : > { %v858_v6 = vpop.f32.mrf.mxu0 }
 0x26c   : > { %1144 = vst.msk [vmem:[%s3881_s24 + $0x24] sm:$0xf] %vm1062_vm0, %v4110_v2  ;;  %v4120_v7 = vpack.c.bf16 %v857_v5, %v857_v5  ;;  %v859_v9 = vadd.f32 %v858_v6, %v3864_v31 }
 0x26d   : > { %v860_v17 = vpop.f32.mrf.mxu0 }
 0x26e   : > { %1073 = vst.msk [vmem:[%s3871_s20 + $0x28] sm:$0xf] %vm1062_vm0, %v4120_v7  ;;  %v4126_v39 = vpack.c.bf16 %v859_v9, %v859_v9  ;;  %v861_v28 = vadd.f32 %v860_v17, %v3859_v1  ;;  %1355 = vrot.lane.b32.xlu1 %v3929_v43, %s3504_s11  ;;  %1548 = vrot.lane.b32.xlu0 %v3903_v33, %s3505_s16 }
 0x26f   : > { %v862_v10 = vpop.f32.mrf.mxu0 }
 0x270   : > { %1145 = vst.msk [vmem:[%s3881_s24 + $0x28] sm:$0xf] %vm1062_vm0, %v4126_v39  ;;  %v4136_v21 = vpack.c.bf16 %v861_v28, %v861_v28  ;;  %v863_v24 = vadd.f32 %v862_v10, %v3864_v31 }
 0x271   : > { %v866_v46 = vpop.f32.mrf.mxu0 }
 0x272   : > { %1074 = vst.msk [vmem:[%s3871_s20 + $0x2c] sm:$0xf] %vm1062_vm0, %v4136_v21  ;;  %v4142_v27 = vpack.c.bf16 %v863_v24, %v863_v24  ;;  %v867_v12 = vadd.f32 %v866_v46, %v3859_v1  ;;  %1550 = vrot.lane.b32.xlu1 %v3929_v43, %s3505_s16  ;;  %1743 = vrot.lane.b32.xlu0 %v3903_v33, %s3506_s21 }
 0x273   : > { %v868_v34 = vpop.f32.mrf.mxu0 }
 0x274   : > { %1146 = vst.msk [vmem:[%s3881_s24 + $0x2c] sm:$0xf] %vm1062_vm0, %v4142_v27  ;;  %v4152_v47 = vpack.c.bf16 %v867_v12, %v867_v12  ;;  %v869_v57 = vadd.f32 %v868_v34, %v3864_v31 }
 0x275   : > { %v870_v22 = vpop.f32.mrf.mxu0 }
 0x276   : > { %1075 = vst.msk [vmem:[%s3871_s20 + $0x30] sm:$0xf] %vm1062_vm0, %v4152_v47  ;;  %v4158_v41 = vpack.c.bf16 %v869_v57, %v869_v57  ;;  %v871_v42 = vadd.f32 %v870_v22, %v3859_v1  ;;  %1745 = vrot.lane.b32.xlu1 %v3929_v43, %s3506_s21  ;;  %1422 = vrot.lane.b32.xlu0 %v3909_v36, %s3505_s16 }
 0x277   : > { %v872_v33 = vpop.f32.mrf.mxu0 }
 0x278   : > { %1147 = vst.msk [vmem:[%s3881_s24 + $0x30] sm:$0xf] %vm1062_vm0, %v4158_v41  ;;  %v4168_v58 = vpack.c.bf16 %v871_v42, %v871_v42  ;;  %v873_v3 = vadd.f32 %v872_v33, %v3864_v31 }
 0x279   : > { %v876_v49 = vpop.f32.mrf.mxu0 }
 0x27a   : > { %1076 = vst.msk [vmem:[%s3871_s20 + $0x34] sm:$0xf] %vm1062_vm0, %v4168_v58  ;;  %v4174_v52 = vpack.c.bf16 %v873_v3, %v873_v3  ;;  %v877_v43 = vadd.f32 %v876_v49, %v3859_v1  ;;  %1617 = vrot.lane.b32.xlu0 %v3909_v36, %s3506_s21  ;;  %1227 = vrot.lane.b32.xlu1 %v3909_v36, %s3504_s11 }
 0x27b   : > { %v878_v4 = vpop.f32.mrf.mxu0 }
 0x27c   : > { %1148 = vst.msk [vmem:[%s3881_s24 + $0x34] sm:$0xf] %vm1062_vm0, %v4174_v52  ;;  %v4184_v54 = vpack.c.bf16 %v877_v43, %v877_v43  ;;  %v879_v55 = vadd.f32 %v878_v4, %v3864_v31 }
 0x27d   : > { %v880_v59 = vpop.f32.mrf.mxu0 }
 0x27e   : > { %1077 = vst.msk [vmem:[%s3871_s20 + $0x38] sm:$0xf] %vm1062_vm0, %v4184_v54  ;;  %v4190_v60 = vpack.c.bf16 %v879_v55, %v879_v55  ;;  %v881_v62 = vadd.f32 %v880_v59, %v3859_v1  ;;  %1229 = vrot.lane.b32.xlu1 %v3935_v45, %s3504_s11  ;;  %1365 = vrot.lane.b32.xlu0 %v3941_v50, %s3504_s11 }
 0x27f   : > { %v882_v36 = vpop.f32.mrf.mxu0 }
 0x280   : > { %1149 = vst.msk [vmem:[%s3881_s24 + $0x38] sm:$0xf] %vm1062_vm0, %v4190_v60  ;;  %v4200_v38 = vpack.c.bf16 %v881_v62, %v881_v62  ;;  %v883_v14 = vadd.f32 %v882_v36, %v3864_v31 }
 0x282   : > { %1078 = vst.msk [vmem:[%s3871_s20 + $0x3c] sm:$0xf] %vm1062_vm0, %v4200_v38  ;;  %v4206_v16 = vpack.c.bf16 %v883_v14, %v883_v14  ;;  %1424 = vrot.lane.b32.xlu1 %v3935_v45, %s3505_s16  ;;  %1560 = vrot.lane.b32.xlu0 %v3941_v50, %s3505_s16 }
 0x284   : > { %1150 = vst.msk [vmem:[%s3881_s24 + $0x3c] sm:$0xf] %vm1062_vm0, %v4206_v16 }
 0x286   : > { %1619 = vrot.lane.b32.xlu1 %v3935_v45, %s3506_s21  ;;  %1755 = vrot.lane.b32.xlu0 %v3941_v50, %s3506_s21 }
 0x28a   : > { %1292 = vrot.lane.b32.xlu0 %v3921_v40, %s3504_s11  ;;  %1367 = vrot.lane.b32.xlu1 %v3968_v19, %s3504_s11 }
 0x28e   : > { %1487 = vrot.lane.b32.xlu0 %v3921_v40, %s3505_s16  ;;  %1562 = vrot.lane.b32.xlu1 %v3968_v19, %s3505_s16 }
 0x292   : > { %1682 = vrot.lane.b32.xlu0 %v3921_v40, %s3506_s21  ;;  %1757 = vrot.lane.b32.xlu1 %v3968_v19, %s3506_s21 }
 0x296   : > { %1294 = vrot.lane.b32.xlu1 %v3947_v53, %s3504_s11  ;;  %1361 = vrot.lane.b32.xlu0 %v3956_v30, %s3504_s11 }
 0x29a   : > { %1489 = vrot.lane.b32.xlu1 %v3947_v53, %s3505_s16  ;;  %1556 = vrot.lane.b32.xlu0 %v3956_v30, %s3505_s16 }
 0x29e   : > { %1684 = vrot.lane.b32.xlu1 %v3947_v53, %s3506_s21  ;;  %1751 = vrot.lane.b32.xlu0 %v3956_v30, %s3506_s21 }
 0x2a2   : > { %1363 = vrot.lane.b32.xlu1 %v3984_v25, %s3504_s11  ;;  %1231 = vrot.lane.b32.xlu0 %v3962_v23, %s3504_s11 }
 0x2a6   : > { %1558 = vrot.lane.b32.xlu1 %v3984_v25, %s3505_s16  ;;  %1426 = vrot.lane.b32.xlu0 %v3962_v23, %s3505_s16 }
 0x2aa   : > { %1753 = vrot.lane.b32.xlu1 %v3984_v25, %s3506_s21  ;;  %1621 = vrot.lane.b32.xlu0 %v3962_v23, %s3506_s21 }
 0x2ae   : > { %1233 = vrot.lane.b32.xlu1 %v3990_v0, %s3504_s11  ;;  %1373 = vrot.lane.b32.xlu0 %v3996_v48, %s3504_s11 }
 0x2b2   : > { %1428 = vrot.lane.b32.xlu1 %v3990_v0, %s3505_s16  ;;  %1568 = vrot.lane.b32.xlu0 %v3996_v48, %s3505_s16 }
 0x2b6   : > { %1623 = vrot.lane.b32.xlu1 %v3990_v0, %s3506_s21  ;;  %1763 = vrot.lane.b32.xlu0 %v3996_v48, %s3506_s21 }
 0x2b8   : > { %v1224_v1 = vpop.permute.xlu0 %1223 }
 0x2b9   : > { %2963 = vst.msk [vmem:[%s3871_s20 + $0x40] sm:$0xf] %vm1062_vm0, %v1224_v1 }
 0x2ba   : > { %1296 = vrot.lane.b32.xlu0 %v3974_v61, %s3504_s11  ;;  %1375 = vrot.lane.b32.xlu1 %v4024_v26, %s3504_s11 }
 0x2bc   : > { %v1226_v31 = vpop.permute.xlu1 %1225  ;;  %v1419_v40 = vpop.permute.xlu0 %1418 }
 0x2bd   : > { %2964 = vst.msk [vmem:[%s3871_s20 + $0x44] sm:$0xf] %vm1062_vm0, %v1226_v31  ;;  %3011 = vst.msk [vmem:[%s3871_s20 + $0x80] sm:$0xf] %vm1062_vm0, %v1419_v40 }
 0x2be   : > { %1491 = vrot.lane.b32.xlu0 %v3974_v61, %s3505_s16  ;;  %1570 = vrot.lane.b32.xlu1 %v4024_v26, %s3505_s16 }
 0x2c0   : > { %v1421_v45 = vpop.permute.xlu1 %1420  ;;  %v1614_v50 = vpop.permute.xlu0 %1613 }
 0x2c1   : > { %3012 = vst.msk [vmem:[%s3871_s20 + $0x84] sm:$0xf] %vm1062_vm0, %v1421_v45  ;;  %3059 = vst.msk [vmem:[%s3871_s20 + $0xc0] sm:$0xf] %vm1062_vm0, %v1614_v50 }
 0x2c2   : > { %1686 = vrot.lane.b32.xlu0 %v3974_v61, %s3506_s21  ;;  %1765 = vrot.lane.b32.xlu1 %v4024_v26, %s3506_s21 }
 0x2c4   : > { %v1616_v53 = vpop.permute.xlu1 %1615  ;;  %v1358_v30 = vpop.permute.xlu0 %1357 }
 0x2c5   : > { %3060 = vst.msk [vmem:[%s3871_s20 + $0xc4] sm:$0xf] %vm1062_vm0, %v1616_v53  ;;  %2997 = vst.msk [vmem:[%s3898_s3 + $0x48] sm:$0xf] %vm1062_vm0, %v1358_v30 }
 0x2c6   : > { %1298 = vrot.lane.b32.xlu1 %v4002_v8, %s3504_s11  ;;  %1369 = vrot.lane.b32.xlu0 %v4012_v18, %s3504_s11 }
 0x2c8   : > { %v1360_v23 = vpop.permute.xlu1 %1359  ;;  %v1553_v19 = vpop.permute.xlu0 %1552 }
 0x2c9   : > { %2998 = vst.msk [vmem:[%s3898_s3 + $0x4c] sm:$0xf] %vm1062_vm0, %v1360_v23  ;;  %3045 = vst.msk [vmem:[%s3898_s3 + $0x88] sm:$0xf] %vm1062_vm0, %v1553_v19 }
 0x2ca   : > { %1493 = vrot.lane.b32.xlu1 %v4002_v8, %s3505_s16  ;;  %1564 = vrot.lane.b32.xlu0 %v4012_v18, %s3505_s16 }
 0x2cc   : > { %v1555_v61 = vpop.permute.xlu1 %1554  ;;  %v1748_v25 = vpop.permute.xlu0 %1747 }
 0x2cd   : > { %3046 = vst.msk [vmem:[%s3898_s3 + $0x8c] sm:$0xf] %vm1062_vm0, %v1555_v61  ;;  %3093 = vst.msk [vmem:[%s3898_s3 + $0xc8] sm:$0xf] %vm1062_vm0, %v1748_v25 }
 0x2ce   : > { %1688 = vrot.lane.b32.xlu1 %v4002_v8, %s3506_s21  ;;  %1759 = vrot.lane.b32.xlu0 %v4012_v18, %s3506_s21 }
 0x2d0   : > { %v1750_v0 = vpop.permute.xlu1 %1749  ;;  %v1289_v48 = vpop.permute.xlu0 %1288 }
 0x2d1   : > { %3094 = vst.msk [vmem:[%s3898_s3 + $0xcc] sm:$0xf] %vm1062_vm0, %v1750_v0  ;;  %2979 = vst.msk [vmem:[%s3881_s24 + $0x40] sm:$0xf] %vm1062_vm0, %v1289_v48 }
 0x2d2   : > { %1371 = vrot.lane.b32.xlu1 %v4040_v35, %s3504_s11  ;;  %1235 = vrot.lane.b32.xlu0 %v4018_v20, %s3504_s11 }
 0x2d4   : > { %v1291_v8 = vpop.permute.xlu1 %1290  ;;  %v1484_v26 = vpop.permute.xlu0 %1483 }
 0x2d5   : > { %2980 = vst.msk [vmem:[%s3881_s24 + $0x44] sm:$0xf] %vm1062_vm0, %v1291_v8  ;;  %3027 = vst.msk [vmem:[%s3881_s24 + $0x80] sm:$0xf] %vm1062_vm0, %v1484_v26 }
 0x2d6   : > { %1566 = vrot.lane.b32.xlu1 %v4040_v35, %s3505_s16  ;;  %1430 = vrot.lane.b32.xlu0 %v4018_v20, %s3505_s16 }
 0x2d8   : > { %v1486_v18 = vpop.permute.xlu1 %1485  ;;  %v1679_v5 = vpop.permute.xlu0 %1678 }
 0x2d9   : > { %3028 = vst.msk [vmem:[%s3881_s24 + $0x84] sm:$0xf] %vm1062_vm0, %v1486_v18  ;;  %3075 = vst.msk [vmem:[%s3881_s24 + $0xc0] sm:$0xf] %vm1062_vm0, %v1679_v5 }
 0x2da   : > { %1761 = vrot.lane.b32.xlu1 %v4040_v35, %s3506_s21  ;;  %1625 = vrot.lane.b32.xlu0 %v4018_v20, %s3506_s21 }
 0x2dc   : > { %v1681_v6 = vpop.permute.xlu1 %1680  ;;  %v1354_v9 = vpop.permute.xlu0 %1353 }
 0x2dd   : > { %3076 = vst.msk [vmem:[%s3881_s24 + $0xc4] sm:$0xf] %vm1062_vm0, %v1681_v6  ;;  %2995 = vst.msk [vmem:[%s3898_s3 + $0x40] sm:$0xf] %vm1062_vm0, %v1354_v9 }
 0x2de   : > { %1237 = vrot.lane.b32.xlu1 %v4046_v15, %s3504_s11  ;;  %1381 = vrot.lane.b32.xlu0 %v4052_v37, %s3504_s11 }
 0x2e0   : > { %v1356_v35 = vpop.permute.xlu1 %1355  ;;  %v1549_v17 = vpop.permute.xlu0 %1548 }
 0x2e1   : > { %2996 = vst.msk [vmem:[%s3898_s3 + $0x44] sm:$0xf] %vm1062_vm0, %v1356_v35  ;;  %3043 = vst.msk [vmem:[%s3898_s3 + $0x80] sm:$0xf] %vm1062_vm0, %v1549_v17 }
 0x2e2   : > { %1432 = vrot.lane.b32.xlu1 %v4046_v15, %s3505_s16  ;;  %1576 = vrot.lane.b32.xlu0 %v4052_v37, %s3505_s16 }
 0x2e4   : > { %v1551_v20 = vpop.permute.xlu1 %1550  ;;  %v1744_v28 = vpop.permute.xlu0 %1743 }
 0x2e5   : > { %3044 = vst.msk [vmem:[%s3898_s3 + $0x84] sm:$0xf] %vm1062_vm0, %v1551_v20  ;;  %3091 = vst.msk [vmem:[%s3898_s3 + $0xc0] sm:$0xf] %vm1062_vm0, %v1744_v28 }
 0x2e6   : > { %1627 = vrot.lane.b32.xlu1 %v4046_v15, %s3506_s21  ;;  %1300 = vrot.lane.b32.xlu0 %v4030_v29, %s3504_s11 }
 0x2e8   : > { %v1746_v10 = vpop.permute.xlu1 %1745  ;;  %v1423_v24 = vpop.permute.xlu0 %1422 }
 0x2e9   : > { %3092 = vst.msk [vmem:[%s3898_s3 + $0xc4] sm:$0xf] %vm1062_vm0, %v1746_v10  ;;  %3013 = vst.msk [vmem:[%s3871_s20 + $0x88] sm:$0xf] %vm1062_vm0, %v1423_v24 }
 0x2ea   : > { %1495 = vrot.lane.b32.xlu0 %v4030_v29, %s3505_s16  ;;  %1383 = vrot.lane.b32.xlu1 %v4080_v56, %s3504_s11 }
 0x2ec   : > { %v1228_v15 = vpop.permute.xlu1 %1227  ;;  %v1618_v46 = vpop.permute.xlu0 %1617 }
 0x2ed   : > { %2965 = vst.msk [vmem:[%s3871_s20 + $0x48] sm:$0xf] %vm1062_vm0, %v1228_v15  ;;  %3061 = vst.msk [vmem:[%s3871_s20 + $0xc8] sm:$0xf] %vm1062_vm0, %v1618_v46 }
 0x2ee   : > { %1690 = vrot.lane.b32.xlu0 %v4030_v29, %s3506_s21  ;;  %1578 = vrot.lane.b32.xlu1 %v4080_v56, %s3505_s16 }
 0x2f0   : > { %v1230_v12 = vpop.permute.xlu1 %1229  ;;  %v1366_v34 = vpop.permute.xlu0 %1365 }
 0x2f1   : > { %2966 = vst.msk [vmem:[%s3871_s20 + $0x4c] sm:$0xf] %vm1062_vm0, %v1230_v12  ;;  %3001 = vst.msk [vmem:[%s3898_s3 + $0x58] sm:$0xf] %vm1062_vm0, %v1366_v34 }
 0x2f2   : > { %1302 = vrot.lane.b32.xlu1 %v4058_v44, %s3504_s11  ;;  %1377 = vrot.lane.b32.xlu0 %v4068_v51, %s3504_s11 }
 0x2f4   : > { %v1425_v29 = vpop.permute.xlu1 %1424  ;;  %v1561_v57 = vpop.permute.xlu0 %1560 }
 0x2f5   : > { %3014 = vst.msk [vmem:[%s3871_s20 + $0x8c] sm:$0xf] %vm1062_vm0, %v1425_v29  ;;  %3049 = vst.msk [vmem:[%s3898_s3 + $0x98] sm:$0xf] %vm1062_vm0, %v1561_v57 }
 0x2f6   : > { %1497 = vrot.lane.b32.xlu1 %v4058_v44, %s3505_s16  ;;  %1572 = vrot.lane.b32.xlu0 %v4068_v51, %s3505_s16 }
 0x2f8   : > { %v1620_v22 = vpop.permute.xlu1 %1619  ;;  %v1756_v42 = vpop.permute.xlu0 %1755 }
 0x2f9   : > { %3062 = vst.msk [vmem:[%s3871_s20 + $0xcc] sm:$0xf] %vm1062_vm0, %v1620_v22  ;;  %3097 = vst.msk [vmem:[%s3898_s3 + $0xd8] sm:$0xf] %vm1062_vm0, %v1756_v42 }
 0x2fa   : > { %1692 = vrot.lane.b32.xlu1 %v4058_v44, %s3506_s21  ;;  %1767 = vrot.lane.b32.xlu0 %v4068_v51, %s3506_s21 }
 0x2fc   : > { %v1368_v33 = vpop.permute.xlu1 %1367  ;;  %v1293_v3 = vpop.permute.xlu0 %1292 }
 0x2fd   : > { %3002 = vst.msk [vmem:[%s3898_s3 + $0x5c] sm:$0xf] %vm1062_vm0, %v1368_v33  ;;  %2981 = vst.msk [vmem:[%s3881_s24 + $0x48] sm:$0xf] %vm1062_vm0, %v1293_v3 }
 0x2fe   : > { %1379 = vrot.lane.b32.xlu1 %v4096_v32, %s3504_s11  ;;  %1239 = vrot.lane.b32.xlu0 %v4074_v11, %s3504_s11 }
 0x300   : > { %v1563_v44 = vpop.permute.xlu1 %1562  ;;  %v1488_v49 = vpop.permute.xlu0 %1487 }
 0x301   : > { %3050 = vst.msk [vmem:[%s3898_s3 + $0x9c] sm:$0xf] %vm1062_vm0, %v1563_v44  ;;  %3029 = vst.msk [vmem:[%s3881_s24 + $0x88] sm:$0xf] %vm1062_vm0, %v1488_v49 }
 0x302   : > { %1574 = vrot.lane.b32.xlu1 %v4096_v32, %s3505_s16  ;;  %1434 = vrot.lane.b32.xlu0 %v4074_v11, %s3505_s16 }
 0x304   : > { %v1758_v51 = vpop.permute.xlu1 %1757  ;;  %v1683_v43 = vpop.permute.xlu0 %1682 }
 0x305   : > { %3098 = vst.msk [vmem:[%s3898_s3 + $0xdc] sm:$0xf] %vm1062_vm0, %v1758_v51  ;;  %3077 = vst.msk [vmem:[%s3881_s24 + $0xc8] sm:$0xf] %vm1062_vm0, %v1683_v43 }
 0x306   : > { %1769 = vrot.lane.b32.xlu1 %v4096_v32, %s3506_s21  ;;  %1629 = vrot.lane.b32.xlu0 %v4074_v11, %s3506_s21 }
 0x308   : > { %v1295_v4 = vpop.permute.xlu1 %1294  ;;  %v1362_v55 = vpop.permute.xlu0 %1361 }
 0x309   : > { %2982 = vst.msk [vmem:[%s3881_s24 + $0x4c] sm:$0xf] %vm1062_vm0, %v1295_v4  ;;  %2999 = vst.msk [vmem:[%s3898_s3 + $0x50] sm:$0xf] %vm1062_vm0, %v1362_v55 }
 0x30a   : > { %1241 = vrot.lane.b32.xlu1 %v4101_v63, %s3504_s11  ;;  %1304 = vrot.lane.b32.xlu0 %v4086_v13, %s3504_s11 }
 0x30c   : > { %v1490_v32 = vpop.permute.xlu1 %1489  ;;  %v1557_v59 = vpop.permute.xlu0 %1556 }
 0x30d   : > { %3030 = vst.msk [vmem:[%s3881_s24 + $0x8c] sm:$0xf] %vm1062_vm0, %v1490_v32  ;;  %3047 = vst.msk [vmem:[%s3898_s3 + $0x90] sm:$0xf] %vm1062_vm0, %v1557_v59 }
 0x30e   : > { %1436 = vrot.lane.b32.xlu1 %v4101_v63, %s3505_s16  ;;  %1499 = vrot.lane.b32.xlu0 %v4086_v13, %s3505_s16 }
 0x310   : > { %v1685_v11 = vpop.permute.xlu1 %1684  ;;  %v1752_v62 = vpop.permute.xlu0 %1751 }
 0x311   : > { %3078 = vst.msk [vmem:[%s3881_s24 + $0xcc] sm:$0xf] %vm1062_vm0, %v1685_v11  ;;  %3095 = vst.msk [vmem:[%s3898_s3 + $0xd0] sm:$0xf] %vm1062_vm0, %v1752_v62 }
 0x312   : > { %1631 = vrot.lane.b32.xlu1 %v4101_v63, %s3506_s21  ;;  %1694 = vrot.lane.b32.xlu0 %v4086_v13, %s3506_s21 }
 0x314   : > { %v1364_v36 = vpop.permute.xlu1 %1363  ;;  %v1232_v14 = vpop.permute.xlu0 %1231 }
 0x315   : > { %3000 = vst.msk [vmem:[%s3898_s3 + $0x54] sm:$0xf] %vm1062_vm0, %v1364_v36  ;;  %2967 = vst.msk [vmem:[%s3871_s20 + $0x50] sm:$0xf] %vm1062_vm0, %v1232_v14 }
 0x316   : > { %1306 = vrot.lane.b32.xlu1 %v4110_v2, %s3504_s11  ;;  %1243 = vrot.lane.b32.xlu0 %v4120_v7, %s3504_s11 }
 0x318   : > { %v1559_v63 = vpop.permute.xlu1 %1558  ;;  %v1427_v1 = vpop.permute.xlu0 %1426 }
 0x319   : > { %3048 = vst.msk [vmem:[%s3898_s3 + $0x94] sm:$0xf] %vm1062_vm0, %v1559_v63  ;;  %3015 = vst.msk [vmem:[%s3871_s20 + $0x90] sm:$0xf] %vm1062_vm0, %v1427_v1 }
 0x31a   : > { %1501 = vrot.lane.b32.xlu1 %v4110_v2, %s3505_s16  ;;  %1438 = vrot.lane.b32.xlu0 %v4120_v7, %s3505_s16 }
 0x31c   : > { %v1754_v13 = vpop.permute.xlu1 %1753  ;;  %v1622_v31 = vpop.permute.xlu0 %1621 }
 0x31d   : > { %3096 = vst.msk [vmem:[%s3898_s3 + $0xd4] sm:$0xf] %vm1062_vm0, %v1754_v13  ;;  %3063 = vst.msk [vmem:[%s3871_s20 + $0xd0] sm:$0xf] %vm1062_vm0, %v1622_v31 }
 0x31e   : > { %1696 = vrot.lane.b32.xlu1 %v4110_v2, %s3506_s21  ;;  %1633 = vrot.lane.b32.xlu0 %v4120_v7, %s3506_s21 }
 0x320   : > { %v1234_v40 = vpop.permute.xlu1 %1233  ;;  %v1374_v45 = vpop.permute.xlu0 %1373 }
 0x321   : > { %2968 = vst.msk [vmem:[%s3871_s20 + $0x54] sm:$0xf] %vm1062_vm0, %v1234_v40  ;;  %3005 = vst.msk [vmem:[%s3898_s3 + $0x68] sm:$0xf] %vm1062_vm0, %v1374_v45 }
 0x322   : > { %1245 = vrot.lane.b32.xlu1 %v4136_v21, %s3504_s11  ;;  %1308 = vrot.lane.b32.xlu0 %v4126_v39, %s3504_s11 }
 0x324   : > { %v1429_v2 = vpop.permute.xlu1 %1428  ;;  %v1569_v50 = vpop.permute.xlu0 %1568 }
 0x325   : > { %3016 = vst.msk [vmem:[%s3871_s20 + $0x94] sm:$0xf] %vm1062_vm0, %v1429_v2  ;;  %3053 = vst.msk [vmem:[%s3898_s3 + $0xa8] sm:$0xf] %vm1062_vm0, %v1569_v50 }
 0x326   : > { %1440 = vrot.lane.b32.xlu1 %v4136_v21, %s3505_s16  ;;  %1503 = vrot.lane.b32.xlu0 %v4126_v39, %s3505_s16 }
 0x328   : > { %v1624_v7 = vpop.permute.xlu1 %1623  ;;  %v1764_v53 = vpop.permute.xlu0 %1763 }
 0x329   : > { %3064 = vst.msk [vmem:[%s3871_s20 + $0xd4] sm:$0xf] %vm1062_vm0, %v1624_v7  ;;  %3101 = vst.msk [vmem:[%s3898_s3 + $0xe8] sm:$0xf] %vm1062_vm0, %v1764_v53 }
 0x32a   : > { %1635 = vrot.lane.b32.xlu1 %v4136_v21, %s3506_s21  ;;  %1698 = vrot.lane.b32.xlu0 %v4126_v39, %s3506_s21 }
 0x32c   : > { %v1376_v30 = vpop.permute.xlu1 %1375  ;;  %v1297_v23 = vpop.permute.xlu0 %1296 }
 0x32d   : > { %3006 = vst.msk [vmem:[%s3898_s3 + $0x6c] sm:$0xf] %vm1062_vm0, %v1376_v30  ;;  %2983 = vst.msk [vmem:[%s3881_s24 + $0x50] sm:$0xf] %vm1062_vm0, %v1297_v23 }
 0x32e   : > { %1310 = vrot.lane.b32.xlu1 %v4142_v27, %s3504_s11  ;;  %1247 = vrot.lane.b32.xlu0 %v4152_v47, %s3504_s11 }
 0x330   : > { %v1571_v21 = vpop.permute.xlu1 %1570  ;;  %v1492_v19 = vpop.permute.xlu0 %1491 }
 0x331   : > { %3054 = vst.msk [vmem:[%s3898_s3 + $0xac] sm:$0xf] %vm1062_vm0, %v1571_v21  ;;  %3031 = vst.msk [vmem:[%s3881_s24 + $0x90] sm:$0xf] %vm1062_vm0, %v1492_v19 }
 0x332   : > { %1505 = vrot.lane.b32.xlu1 %v4142_v27, %s3505_s16  ;;  %1442 = vrot.lane.b32.xlu0 %v4152_v47, %s3505_s16 }
 0x334   : > { %v1766_v39 = vpop.permute.xlu1 %1765  ;;  %v1687_v61 = vpop.permute.xlu0 %1686 }
 0x335   : > { %3102 = vst.msk [vmem:[%s3898_s3 + $0xec] sm:$0xf] %vm1062_vm0, %v1766_v39  ;;  %3079 = vst.msk [vmem:[%s3881_s24 + $0xd0] sm:$0xf] %vm1062_vm0, %v1687_v61 }
 0x336   : > { %1700 = vrot.lane.b32.xlu1 %v4142_v27, %s3506_s21  ;;  %1637 = vrot.lane.b32.xlu0 %v4152_v47, %s3506_s21 }
 0x338   : > { %v1299_v25 = vpop.permute.xlu1 %1298  ;;  %v1370_v0 = vpop.permute.xlu0 %1369 }
 0x339   : > { %2984 = vst.msk [vmem:[%s3881_s24 + $0x54] sm:$0xf] %vm1062_vm0, %v1299_v25  ;;  %3003 = vst.msk [vmem:[%s3898_s3 + $0x60] sm:$0xf] %vm1062_vm0, %v1370_v0 }
 0x33a   : > { %1249 = vrot.lane.b32.xlu1 %v4168_v58, %s3504_s11  ;;  %1312 = vrot.lane.b32.xlu0 %v4158_v41, %s3504_s11 }
 0x33c   : > { %v1494_v27 = vpop.permute.xlu1 %1493  ;;  %v1565_v48 = vpop.permute.xlu0 %1564 }
 0x33d   : > { %3032 = vst.msk [vmem:[%s3881_s24 + $0x94] sm:$0xf] %vm1062_vm0, %v1494_v27  ;;  %3051 = vst.msk [vmem:[%s3898_s3 + $0xa0] sm:$0xf] %vm1062_vm0, %v1565_v48 }
 0x33e   : > { %1444 = vrot.lane.b32.xlu1 %v4168_v58, %s3505_s16  ;;  %1507 = vrot.lane.b32.xlu0 %v4158_v41, %s3505_s16 }
 0x340   : > { %v1689_v47 = vpop.permute.xlu1 %1688  ;;  %v1760_v8 = vpop.permute.xlu0 %1759 }
 0x341   : > { %3080 = vst.msk [vmem:[%s3881_s24 + $0xd4] sm:$0xf] %vm1062_vm0, %v1689_v47  ;;  %3099 = vst.msk [vmem:[%s3898_s3 + $0xe0] sm:$0xf] %vm1062_vm0, %v1760_v8 }
 0x342   : > { %1639 = vrot.lane.b32.xlu1 %v4168_v58, %s3506_s21  ;;  %1702 = vrot.lane.b32.xlu0 %v4158_v41, %s3506_s21 }
 0x344   : > { %v1372_v26 = vpop.permute.xlu1 %1371  ;;  %v1236_v18 = vpop.permute.xlu0 %1235 }
 0x345   : > { %3004 = vst.msk [vmem:[%s3898_s3 + $0x64] sm:$0xf] %vm1062_vm0, %v1372_v26  ;;  %2969 = vst.msk [vmem:[%s3871_s20 + $0x58] sm:$0xf] %vm1062_vm0, %v1236_v18 }
 0x346   : > { %1314 = vrot.lane.b32.xlu1 %v4174_v52, %s3504_s11  ;;  %1251 = vrot.lane.b32.xlu0 %v4184_v54, %s3504_s11 }
 0x348   : > { %v1567_v58 = vpop.permute.xlu1 %1566  ;;  %v1431_v5 = vpop.permute.xlu0 %1430 }
 0x349   : > { %3052 = vst.msk [vmem:[%s3898_s3 + $0xa4] sm:$0xf] %vm1062_vm0, %v1567_v58  ;;  %3017 = vst.msk [vmem:[%s3871_s20 + $0x98] sm:$0xf] %vm1062_vm0, %v1431_v5 }
 0x34a   : > { %1509 = vrot.lane.b32.xlu1 %v4174_v52, %s3505_s16  ;;  %1446 = vrot.lane.b32.xlu0 %v4184_v54, %s3505_s16 }
 0x34c   : > { %v1762_v41 = vpop.permute.xlu1 %1761  ;;  %v1626_v6 = vpop.permute.xlu0 %1625 }
 0x34d   : > { %3100 = vst.msk [vmem:[%s3898_s3 + $0xe4] sm:$0xf] %vm1062_vm0, %v1762_v41  ;;  %3065 = vst.msk [vmem:[%s3871_s20 + $0xd8] sm:$0xf] %vm1062_vm0, %v1626_v6 }
 0x34e   : > { %1704 = vrot.lane.b32.xlu1 %v4174_v52, %s3506_s21  ;;  %1641 = vrot.lane.b32.xlu0 %v4184_v54, %s3506_s21 }
 0x350   : > { %v1238_v9 = vpop.permute.xlu1 %1237  ;;  %v1382_v35 = vpop.permute.xlu0 %1381 }
 0x351   : > { %2970 = vst.msk [vmem:[%s3871_s20 + $0x5c] sm:$0xf] %vm1062_vm0, %v1238_v9  ;;  %3009 = vst.msk [vmem:[%s3898_s3 + $0x78] sm:$0xf] %vm1062_vm0, %v1382_v35 }
 0x352   : > { %1253 = vrot.lane.b32.xlu1 %v4200_v38, %s3504_s11  ;;  %1316 = vrot.lane.b32.xlu0 %v4190_v60, %s3504_s11 }
 0x354   : > { %v1433_v52 = vpop.permute.xlu1 %1432  ;;  %v1577_v17 = vpop.permute.xlu0 %1576 }
 0x355   : > { %3018 = vst.msk [vmem:[%s3871_s20 + $0x9c] sm:$0xf] %vm1062_vm0, %v1433_v52  ;;  %3057 = vst.msk [vmem:[%s3898_s3 + $0xb8] sm:$0xf] %vm1062_vm0, %v1577_v17 }
 0x356   : > { %1448 = vrot.lane.b32.xlu1 %v4200_v38, %s3505_s16  ;;  %1511 = vrot.lane.b32.xlu0 %v4190_v60, %s3505_s16 }
 0x358   : > { %v1628_v54 = vpop.permute.xlu1 %1627  ;;  %v1301_v20 = vpop.permute.xlu0 %1300 }
 0x359   : > { %3066 = vst.msk [vmem:[%s3871_s20 + $0xdc] sm:$0xf] %vm1062_vm0, %v1628_v54  ;;  %2985 = vst.msk [vmem:[%s3881_s24 + $0x58] sm:$0xf] %vm1062_vm0, %v1301_v20  ;;  %v1844_v20 = vld [vmem:[%s3871_s20] sm:$0xff] (%p3631_p10)  }
 0x35a   : > { %1643 = vrot.lane.b32.xlu1 %v4200_v38, %s3506_s21  ;;  %1706 = vrot.lane.b32.xlu0 %v4190_v60, %s3506_s21  ;;  %1845 = vst [vmem:[%s4745_s13] sm:$0xff] (%p3631_p10), %v1844_v20  }
 0x35c   : > { %v1384_v28 = vpop.permute.xlu1 %1383  ;;  %v1496_v10 = vpop.permute.xlu0 %1495 }
 0x35d   : > { %3010 = vst.msk [vmem:[%s3898_s3 + $0x7c] sm:$0xf] %vm1062_vm0, %v1384_v28  ;;  %3033 = vst.msk [vmem:[%s3881_s24 + $0x98] sm:$0xf] %vm1062_vm0, %v1496_v10  ;;  %v1848_v28 = vld [vmem:[%s3871_s20 + $0x8] sm:$0xff] (%p3631_p10)   ;;  %v1852_v10 = vld [vmem:[%s3871_s20 + $0x10] sm:$0xff] (%p3631_p10)  }
 0x35e   : > { %1318 = vrot.lane.b32.xlu1 %v4206_v16, %s3504_s11  ;;  %1771 = vrot.lane.b32.xlu0 %v4052_v37, %s3506_s21  ;;  %1849 = vst [vmem:[%s4745_s13 + $0x8] sm:$0xff] (%p3631_p10), %v1848_v28   ;;  %1853 = vst [vmem:[%s4745_s13 + $0x10] sm:$0xff] (%p3631_p10), %v1852_v10  }
 0x360   : > { %v1579_v24 = vpop.permute.xlu1 %1578  ;;  %v1691_v38 = vpop.permute.xlu0 %1690 }
 0x361   : > { %3058 = vst.msk [vmem:[%s3898_s3 + $0xbc] sm:$0xf] %vm1062_vm0, %v1579_v24  ;;  %3081 = vst.msk [vmem:[%s3881_s24 + $0xd8] sm:$0xf] %vm1062_vm0, %v1691_v38  ;;  %v1856_v24 = vld [vmem:[%s3871_s20 + $0x18] sm:$0xff] (%p3631_p10)   ;;  %v1860_v38 = vld [vmem:[%s3871_s20 + $0x20] sm:$0xff] (%p3631_p10)  }
 0x362   : > { %1513 = vrot.lane.b32.xlu1 %v4206_v16, %s3505_s16  ;;  %1857 = vst [vmem:[%s4745_s13 + $0x18] sm:$0xff] (%p3631_p10), %v1856_v24   ;;  %1861 = vst [vmem:[%s4745_s13 + $0x20] sm:$0xff] (%p3631_p10), %v1860_v38  }
 0x364   : > { %v1303_v60 = vpop.permute.xlu1 %1302  ;;  %v1378_v15 = vpop.permute.xlu0 %1377 }
 0x365   : > { %2986 = vst.msk [vmem:[%s3881_s24 + $0x5c] sm:$0xf] %vm1062_vm0, %v1303_v60  ;;  %3007 = vst.msk [vmem:[%s3898_s3 + $0x70] sm:$0xf] %vm1062_vm0, %v1378_v15  ;;  %v1864_v60 = vld [vmem:[%s3871_s20 + $0x28] sm:$0xff] (%p3631_p10)   ;;  %v1868_v15 = vld [vmem:[%s3871_s20 + $0x30] sm:$0xff] (%p3631_p10)  }
 0x366   : > { %1708 = vrot.lane.b32.xlu1 %v4206_v16, %s3506_s21  ;;  %1865 = vst [vmem:[%s4745_s13 + $0x28] sm:$0xff] (%p3631_p10), %v1864_v60   ;;  %1869 = vst [vmem:[%s4745_s13 + $0x30] sm:$0xff] (%p3631_p10), %v1868_v15  }
 0x368   : > { %v1498_v37 = vpop.permute.xlu1 %1497  ;;  %v1573_v46 = vpop.permute.xlu0 %1572 }
 0x369   : > { %3034 = vst.msk [vmem:[%s3881_s24 + $0x9c] sm:$0xf] %vm1062_vm0, %v1498_v37  ;;  %3055 = vst.msk [vmem:[%s3898_s3 + $0xb0] sm:$0xf] %vm1062_vm0, %v1573_v46  ;;  %v1872_v37 = vld [vmem:[%s3871_s20 + $0x38] sm:$0xff] (%p3631_p10)   ;;  %v1876_v46 = vld [vmem:[%s3871_s20 + $0x40] sm:$0xff] (%p3631_p10)  }
 0x36a   : > { %1773 = vrot.lane.b32.xlu1 %v4080_v56, %s3506_s21  ;;  %1873 = vst [vmem:[%s4745_s13 + $0x38] sm:$0xff] (%p3631_p10), %v1872_v37   ;;  %1877 = vst [vmem:[%s4745_s13 + $0x100] sm:$0xff] (%p3631_p10), %v1876_v46  }
 0x36c   : > { %v1693_v12 = vpop.permute.xlu1 %1692  ;;  %v1768_v34 = vpop.permute.xlu0 %1767 }
 0x36d   : > { %3082 = vst.msk [vmem:[%s3881_s24 + $0xdc] sm:$0xf] %vm1062_vm0, %v1693_v12  ;;  %3103 = vst.msk [vmem:[%s3898_s3 + $0xf0] sm:$0xf] %vm1062_vm0, %v1768_v34  ;;  %v1880_v12 = vld [vmem:[%s3871_s20 + $0x48] sm:$0xff] (%p3631_p10)   ;;  %v1884_v34 = vld [vmem:[%s3871_s20 + $0x50] sm:$0xff] (%p3631_p10)  }
 0x36e   : > { %1881 = vst [vmem:[%s4745_s13 + $0x108] sm:$0xff] (%p3631_p10), %v1880_v12   ;;  %1885 = vst [vmem:[%s4745_s13 + $0x110] sm:$0xff] (%p3631_p10), %v1884_v34  }
 0x370   : > { %v1380_v16 = vpop.permute.xlu1 %1379  ;;  %v1240_v29 = vpop.permute.xlu0 %1239 }
 0x371   : > { %3008 = vst.msk [vmem:[%s3898_s3 + $0x74] sm:$0xf] %vm1062_vm0, %v1380_v16  ;;  %2971 = vst.msk [vmem:[%s3871_s20 + $0x60] sm:$0xf] %vm1062_vm0, %v1240_v29  ;;  %v1888_v16 = vld [vmem:[%s3871_s20 + $0x58] sm:$0xff] (%p3631_p10)  }
 0x372   : > { %1889 = vst [vmem:[%s4745_s13 + $0x118] sm:$0xff] (%p3631_p10), %v1888_v16  }
 0x374   : > { %v1575_v57 = vpop.permute.xlu1 %1574  ;;  %v1435_v22 = vpop.permute.xlu0 %1434 }
 0x375   : > { %3056 = vst.msk [vmem:[%s3898_s3 + $0xb4] sm:$0xf] %vm1062_vm0, %v1575_v57  ;;  %3019 = vst.msk [vmem:[%s3871_s20 + $0xa0] sm:$0xf] %vm1062_vm0, %v1435_v22 }
 0x378   : > { %v1770_v56 = vpop.permute.xlu1 %1769  ;;  %v1630_v42 = vpop.permute.xlu0 %1629 }
 0x379   : > { %3104 = vst.msk [vmem:[%s3898_s3 + $0xf4] sm:$0xf] %vm1062_vm0, %v1770_v56  ;;  %3067 = vst.msk [vmem:[%s3871_s20 + $0xe0] sm:$0xf] %vm1062_vm0, %v1630_v42  ;;  %v1908_v42 = vld [vmem:[%s3871_s20 + $0x80] sm:$0xff] (%p3631_p10)  }
 0x37a   : > { %1909 = vst [vmem:[%s4745_s13 + $0x200] sm:$0xff] (%p3631_p10), %v1908_v42  }
 0x37c   : > { %v1242_v33 = vpop.permute.xlu1 %1241  ;;  %v1305_v3 = vpop.permute.xlu0 %1304 }
 0x37d   : > { %2972 = vst.msk [vmem:[%s3871_s20 + $0x64] sm:$0xf] %vm1062_vm0, %v1242_v33  ;;  %2987 = vst.msk [vmem:[%s3881_s24 + $0x60] sm:$0xf] %vm1062_vm0, %v1305_v3  ;;  %v1912_v33 = vld [vmem:[%s3871_s20 + $0x88] sm:$0xff] (%p3631_p10)   ;;  %v1916_v3 = vld [vmem:[%s3871_s20 + $0x90] sm:$0xff] (%p3631_p10)  }
 0x37e   : > { %1913 = vst [vmem:[%s4745_s13 + $0x208] sm:$0xff] (%p3631_p10), %v1912_v33   ;;  %1917 = vst [vmem:[%s4745_s13 + $0x210] sm:$0xff] (%p3631_p10), %v1916_v3  }
 0x380   : > { %v1437_v44 = vpop.permute.xlu1 %1436  ;;  %v1500_v49 = vpop.permute.xlu0 %1499 }
 0x381   : > { %3020 = vst.msk [vmem:[%s3871_s20 + $0xa4] sm:$0xf] %vm1062_vm0, %v1437_v44  ;;  %3035 = vst.msk [vmem:[%s3881_s24 + $0xa0] sm:$0xf] %vm1062_vm0, %v1500_v49  ;;  %v1920_v44 = vld [vmem:[%s3871_s20 + $0x98] sm:$0xff] (%p3631_p10)  }
 0x382   : > { %1921 = vst [vmem:[%s4745_s13 + $0x218] sm:$0xff] (%p3631_p10), %v1920_v44  }
 0x384   : > { %v1632_v51 = vpop.permute.xlu1 %1631  ;;  %v1695_v43 = vpop.permute.xlu0 %1694  ;;  %v1892_v29 = vld [vmem:[%s3871_s20 + $0x60] sm:$0xff] (%p3631_p10)  }
 0x385   : > { %3068 = vst.msk [vmem:[%s3871_s20 + $0xe4] sm:$0xf] %vm1062_vm0, %v1632_v51  ;;  %3083 = vst.msk [vmem:[%s3881_s24 + $0xe0] sm:$0xf] %vm1062_vm0, %v1695_v43 }
 0x386   : > { %1893 = vst [vmem:[%s4745_s13 + $0x120] sm:$0xff] (%p3631_p10), %v1892_v29  }
 0x388   : > { %v1307_v4 = vpop.permute.xlu1 %1306  ;;  %v1244_v55 = vpop.permute.xlu0 %1243  ;;  %v1924_v49 = vld [vmem:[%s3871_s20 + $0xa0] sm:$0xff] (%p3631_p10)  }
 0x389   : > { %2988 = vst.msk [vmem:[%s3881_s24 + $0x64] sm:$0xf] %vm1062_vm0, %v1307_v4  ;;  %2973 = vst.msk [vmem:[%s3871_s20 + $0x68] sm:$0xf] %vm1062_vm0, %v1244_v55  ;;  %v1940_v55 = vld [vmem:[%s3871_s20 + $0xc0] sm:$0xff] (%p3631_p10)  }
 0x38a   : > { %1925 = vst [vmem:[%s4745_s13 + $0x220] sm:$0xff] (%p3631_p10), %v1924_v49   ;;  %1941 = vst [vmem:[%s4745_s13 + $0x300] sm:$0xff] (%p3631_p10), %v1940_v55  }
 0x38c   : > { %v1502_v32 = vpop.permute.xlu1 %1501  ;;  %v1439_v59 = vpop.permute.xlu0 %1438 }
 0x38d   : > { %3036 = vst.msk [vmem:[%s3881_s24 + $0xa4] sm:$0xf] %vm1062_vm0, %v1502_v32  ;;  %3021 = vst.msk [vmem:[%s3871_s20 + $0xa8] sm:$0xf] %vm1062_vm0, %v1439_v59  ;;  %v1944_v32 = vld [vmem:[%s3871_s20 + $0xc8] sm:$0xff] (%p3631_p10)   ;;  %v1948_v59 = vld [vmem:[%s3871_s20 + $0xd0] sm:$0xff] (%p3631_p10)  }
 0x38e   : > { %1945 = vst [vmem:[%s4745_s13 + $0x308] sm:$0xff] (%p3631_p10), %v1944_v32   ;;  %1949 = vst [vmem:[%s4745_s13 + $0x310] sm:$0xff] (%p3631_p10), %v1948_v59  }
 0x390   : > { %v1697_v11 = vpop.permute.xlu1 %1696  ;;  %v1634_v62 = vpop.permute.xlu0 %1633 }
 0x391   : > { %3084 = vst.msk [vmem:[%s3881_s24 + $0xe4] sm:$0xf] %vm1062_vm0, %v1697_v11  ;;  %3069 = vst.msk [vmem:[%s3871_s20 + $0xe8] sm:$0xf] %vm1062_vm0, %v1634_v62  ;;  %v1952_v11 = vld [vmem:[%s3871_s20 + $0xd8] sm:$0xff] (%p3631_p10)   ;;  %v1956_v62 = vld [vmem:[%s3871_s20 + $0xe0] sm:$0xff] (%p3631_p10)  }
 0x392   : > { %1953 = vst [vmem:[%s4745_s13 + $0x318] sm:$0xff] (%p3631_p10), %v1952_v11   ;;  %1957 = vst [vmem:[%s4745_s13 + $0x320] sm:$0xff] (%p3631_p10), %v1956_v62  }
 0x394   : > { %v1246_v36 = vpop.permute.xlu1 %1245  ;;  %v1309_v14 = vpop.permute.xlu0 %1308 }
 0x395   : > { %2974 = vst.msk [vmem:[%s3871_s20 + $0x6c] sm:$0xf] %vm1062_vm0, %v1246_v36  ;;  %2989 = vst.msk [vmem:[%s3881_s24 + $0x68] sm:$0xf] %vm1062_vm0, %v1309_v14 }
 0x398   : > { %v1441_v63 = vpop.permute.xlu1 %1440  ;;  %v1504_v1 = vpop.permute.xlu0 %1503 }
 0x399   : > { %3022 = vst.msk [vmem:[%s3871_s20 + $0xac] sm:$0xf] %vm1062_vm0, %v1441_v63  ;;  %3037 = vst.msk [vmem:[%s3881_s24 + $0xa8] sm:$0xf] %vm1062_vm0, %v1504_v1 }
 0x39c   : > { %v1636_v13 = vpop.permute.xlu1 %1635  ;;  %v1699_v31 = vpop.permute.xlu0 %1698  ;;  %v1896_v57 = vld [vmem:[%s3871_s20 + $0x68] sm:$0xff] (%p3631_p10)  }
 0x39d   : > { %3070 = vst.msk [vmem:[%s3871_s20 + $0xec] sm:$0xf] %vm1062_vm0, %v1636_v13  ;;  %3085 = vst.msk [vmem:[%s3881_s24 + $0xe8] sm:$0xf] %vm1062_vm0, %v1699_v31 }
 0x39e   : > { %1897 = vst [vmem:[%s4745_s13 + $0x128] sm:$0xff] (%p3631_p10), %v1896_v57  }
 0x3a0   : > { %v1311_v40 = vpop.permute.xlu1 %1310  ;;  %v1248_v45 = vpop.permute.xlu0 %1247  ;;  %v1928_v51 = vld [vmem:[%s3871_s20 + $0xa8] sm:$0xff] (%p3631_p10)  }
 0x3a1   : > { %2990 = vst.msk [vmem:[%s3881_s24 + $0x6c] sm:$0xf] %vm1062_vm0, %v1311_v40  ;;  %2975 = vst.msk [vmem:[%s3871_s20 + $0x70] sm:$0xf] %vm1062_vm0, %v1248_v45 }
 0x3a2   : > { %1929 = vst [vmem:[%s4745_s13 + $0x228] sm:$0xff] (%p3631_p10), %v1928_v51  }
 0x3a4   : > { %v1506_v2 = vpop.permute.xlu1 %1505  ;;  %v1443_v50 = vpop.permute.xlu0 %1442  ;;  %v1960_v36 = vld [vmem:[%s3871_s20 + $0xe8] sm:$0xff] (%p3631_p10)  }
 0x3a5   : > { %3038 = vst.msk [vmem:[%s3881_s24 + $0xac] sm:$0xf] %vm1062_vm0, %v1506_v2  ;;  %3023 = vst.msk [vmem:[%s3871_s20 + $0xb0] sm:$0xf] %vm1062_vm0, %v1443_v50 }
 0x3a6   : > { %1961 = vst [vmem:[%s4745_s13 + $0x328] sm:$0xff] (%p3631_p10), %v1960_v36  }
 0x3a8   : > { %v1701_v7 = vpop.permute.xlu1 %1700  ;;  %v1638_v53 = vpop.permute.xlu0 %1637 }
 0x3a9   : > { %3086 = vst.msk [vmem:[%s3881_s24 + $0xec] sm:$0xf] %vm1062_vm0, %v1701_v7  ;;  %3071 = vst.msk [vmem:[%s3871_s20 + $0xf0] sm:$0xf] %vm1062_vm0, %v1638_v53 }
 0x3ac   : > { %v1250_v30 = vpop.permute.xlu1 %1249  ;;  %v1313_v23 = vpop.permute.xlu0 %1312 }
 0x3ad   : > { %2976 = vst.msk [vmem:[%s3871_s20 + $0x74] sm:$0xf] %vm1062_vm0, %v1250_v30  ;;  %2991 = vst.msk [vmem:[%s3881_s24 + $0x70] sm:$0xf] %vm1062_vm0, %v1313_v23 }
 0x3b0   : > { %v1445_v21 = vpop.permute.xlu1 %1444  ;;  %v1508_v19 = vpop.permute.xlu0 %1507 }
 0x3b1   : > { %3024 = vst.msk [vmem:[%s3871_s20 + $0xb4] sm:$0xf] %vm1062_vm0, %v1445_v21  ;;  %3039 = vst.msk [vmem:[%s3881_s24 + $0xb0] sm:$0xf] %vm1062_vm0, %v1508_v19 }
 0x3b4   : > { %v1640_v39 = vpop.permute.xlu1 %1639  ;;  %v1703_v61 = vpop.permute.xlu0 %1702  ;;  %v1900_v22 = vld [vmem:[%s3871_s20 + $0x70] sm:$0xff] (%p3631_p10)  }
 0x3b5   : > { %3072 = vst.msk [vmem:[%s3871_s20 + $0xf4] sm:$0xf] %vm1062_vm0, %v1640_v39  ;;  %3087 = vst.msk [vmem:[%s3881_s24 + $0xf0] sm:$0xf] %vm1062_vm0, %v1703_v61 }
 0x3b6   : > { %1901 = vst [vmem:[%s4745_s13 + $0x130] sm:$0xff] (%p3631_p10), %v1900_v22  }
 0x3b8   : > { %v1315_v25 = vpop.permute.xlu1 %1314  ;;  %v1252_v0 = vpop.permute.xlu0 %1251  ;;  %v1932_v43 = vld [vmem:[%s3871_s20 + $0xb0] sm:$0xff] (%p3631_p10)  }
 0x3b9   : > { %2992 = vst.msk [vmem:[%s3881_s24 + $0x74] sm:$0xf] %vm1062_vm0, %v1315_v25  ;;  %2977 = vst.msk [vmem:[%s3871_s20 + $0x78] sm:$0xf] %vm1062_vm0, %v1252_v0 }
 0x3ba   : > { %1933 = vst [vmem:[%s4745_s13 + $0x230] sm:$0xff] (%p3631_p10), %v1932_v43  }
 0x3bc   : > { %v1510_v27 = vpop.permute.xlu1 %1509  ;;  %v1447_v48 = vpop.permute.xlu0 %1446  ;;  %v1964_v14 = vld [vmem:[%s3871_s20 + $0xf0] sm:$0xff] (%p3631_p10)  }
 0x3bd   : > { %3040 = vst.msk [vmem:[%s3881_s24 + $0xb4] sm:$0xf] %vm1062_vm0, %v1510_v27  ;;  %3025 = vst.msk [vmem:[%s3871_s20 + $0xb8] sm:$0xf] %vm1062_vm0, %v1447_v48 }
 0x3be   : > { %1965 = vst [vmem:[%s4745_s13 + $0x330] sm:$0xff] (%p3631_p10), %v1964_v14  }
 0x3c0   : > { %v1705_v47 = vpop.permute.xlu1 %1704  ;;  %v1642_v8 = vpop.permute.xlu0 %1641 }
 0x3c1   : > { %3088 = vst.msk [vmem:[%s3881_s24 + $0xf4] sm:$0xf] %vm1062_vm0, %v1705_v47  ;;  %3073 = vst.msk [vmem:[%s3871_s20 + $0xf8] sm:$0xf] %vm1062_vm0, %v1642_v8 }
 0x3c4   : > { %v1254_v26 = vpop.permute.xlu1 %1253  ;;  %v1317_v18 = vpop.permute.xlu0 %1316 }
 0x3c5   : > { %2978 = vst.msk [vmem:[%s3871_s20 + $0x7c] sm:$0xf] %vm1062_vm0, %v1254_v26  ;;  %2993 = vst.msk [vmem:[%s3881_s24 + $0x78] sm:$0xf] %vm1062_vm0, %v1317_v18 }
 0x3c8   : > { %v1449_v58 = vpop.permute.xlu1 %1448  ;;  %v1512_v5 = vpop.permute.xlu0 %1511 }
 0x3c9   : > { %3026 = vst.msk [vmem:[%s3871_s20 + $0xbc] sm:$0xf] %vm1062_vm0, %v1449_v58  ;;  %3041 = vst.msk [vmem:[%s3881_s24 + $0xb8] sm:$0xf] %vm1062_vm0, %v1512_v5 }
 0x3cc   : > { %v1644_v41 = vpop.permute.xlu1 %1643  ;;  %v1707_v6 = vpop.permute.xlu0 %1706  ;;  %v1904_v56 = vld [vmem:[%s3871_s20 + $0x78] sm:$0xff] (%p3631_p10)  }
 0x3cd   : > { %3074 = vst.msk [vmem:[%s3871_s20 + $0xfc] sm:$0xf] %vm1062_vm0, %v1644_v41  ;;  %3089 = vst.msk [vmem:[%s3881_s24 + $0xf8] sm:$0xf] %vm1062_vm0, %v1707_v6 }
 0x3ce   : > { %1905 = vst [vmem:[%s4745_s13 + $0x138] sm:$0xff] (%p3631_p10), %v1904_v56  }
 0x3d0   : > { %v1319_v9 = vpop.permute.xlu1 %1318  ;;  %v1772_v35 = vpop.permute.xlu0 %1771  ;;  %v1936_v4 = vld [vmem:[%s3871_s20 + $0xb8] sm:$0xff] (%p3631_p10)  }
 0x3d1   : > { %2994 = vst.msk [vmem:[%s3881_s24 + $0x7c] sm:$0xf] %vm1062_vm0, %v1319_v9  ;;  %3105 = vst.msk [vmem:[%s3898_s3 + $0xf8] sm:$0xf] %vm1062_vm0, %v1772_v35 }
 0x3d2   : > { %1937 = vst [vmem:[%s4745_s13 + $0x238] sm:$0xff] (%p3631_p10), %v1936_v4  }
 0x3d4   : > { %v1514_v52 = vpop.permute.xlu1 %1513  ;;  %v1968_v63 = vld [vmem:[%s3871_s20 + $0xf8] sm:$0xff] (%p3631_p10)  }
 0x3d5   : > { %3042 = vst.msk [vmem:[%s3881_s24 + $0xbc] sm:$0xf] %vm1062_vm0, %v1514_v52  ;;  %1969 = vst [vmem:[%s4745_s13 + $0x338] sm:$0xff] (%p3631_p10), %v1968_v63  }
 0x3d8   : > { %v1709_v17 = vpop.permute.xlu1 %1708 }
 0x3d9   : > { %3090 = vst.msk [vmem:[%s3881_s24 + $0xfc] sm:$0xf] %vm1062_vm0, %v1709_v17  ;;  %1822 = sbr.rel (!%p3631_p10) target bundleno = 990 (0x3de), region = 52 }
 0x3dc   : > { %v1774_v54 = vpop.permute.xlu1 %1773 }
 0x3dd   : > { %3106 = vst.msk [vmem:[%s3898_s3 + $0xfc] sm:$0xf] %vm1062_vm0, %v1774_v54 }
 0x3de PF: > { %2123 = sbr.rel (!%p3631_p10) target bundleno = 1017 (0x3f9), region = 93  ;;  %s5005_s18 = sld [smem:[#allocation11_spill]] (%p3631_p10)  ;;  %v2145_v1 = vld [vmem:[%s3881_s24] sm:$0xff] (%p3631_p10)   ;;  %v2149_v13 = vld [vmem:[%s3881_s24 + $0x8] sm:$0xff] (%p3631_p10)   ;;  %v2153_v31 = vld [vmem:[%s3881_s24 + $0x10] sm:$0xff] (%p3631_p10)  }
 0x3df   : > { %s5006_s19 = sld [smem:[#allocation12_spill]] (%p3631_p10)  ;;  %v2157_v40 = vld [vmem:[%s3881_s24 + $0x18] sm:$0xff] (%p3631_p10)   ;;  %v2161_v45 = vld [vmem:[%s3881_s24 + $0x20] sm:$0xff] (%p3631_p10)   ;;  %v2165_v2 = vld [vmem:[%s3881_s24 + $0x28] sm:$0xff] (%p3631_p10)  }
 0x3e0   : > { %v2169_v50 = vld [vmem:[%s3881_s24 + $0x30] sm:$0xff] (%p3631_p10)   ;;  %v2173_v7 = vld [vmem:[%s3881_s24 + $0x38] sm:$0xff] (%p3631_p10)   ;;  %v2177_v53 = vld [vmem:[%s3881_s24 + $0x40] sm:$0xff] (%p3631_p10)   ;;  %s5007_s6 = sld [smem:[#allocation17_spill]] (%p3631_p10) }
 0x3e1   : > { %v2181_v30 = vld [vmem:[%s3881_s24 + $0x48] sm:$0xff] (%p3631_p10)   ;;  %v2185_v23 = vld [vmem:[%s3881_s24 + $0x50] sm:$0xff] (%p3631_p10)   ;;  %v2189_v21 = vld [vmem:[%s3881_s24 + $0x58] sm:$0xff] (%p3631_p10)  }
 0x3e2   : > { %v2193_v19 = vld [vmem:[%s3881_s24 + $0x60] sm:$0xff] (%p3631_p10)   ;;  %v2197_v39 = vld [vmem:[%s3881_s24 + $0x68] sm:$0xff] (%p3631_p10)   ;;  %v2201_v61 = vld [vmem:[%s3881_s24 + $0x70] sm:$0xff] (%p3631_p10)  }
 0x3e3   : > { %v2205_v25 = vld [vmem:[%s3881_s24 + $0x78] sm:$0xff]   ;;  %v2209_v0 = vld [vmem:[%s3881_s24 + $0x80] sm:$0xff]   ;;  %v2213_v27 = vld [vmem:[%s3881_s24 + $0x88] sm:$0xff]  }
 0x3e4   : > { %s3113_s20 = sshll.u32 %s5005_s18, 4  ;;  %v2217_v48 = vld [vmem:[%s3881_s24 + $0x90] sm:$0xff]   ;;  %v2221_v47 = vld [vmem:[%s3881_s24 + $0x98] sm:$0xff]   ;;  %v2225_v8 = vld [vmem:[%s3881_s24 + $0xa0] sm:$0xff]  }
 0x3e5   : > { %s3114_s11 = sshll.u32 %s5006_s19, 8  ;;  %v2229_v26 = vld [vmem:[%s3881_s24 + $0xa8] sm:$0xff]   ;;  %v2233_v18 = vld [vmem:[%s3881_s24 + $0xb0] sm:$0xff]   ;;  %v2237_v58 = vld [vmem:[%s3881_s24 + $0xb8] sm:$0xff]  }
 0x3e6   : > { %s2126_s16 = sadd.s32 %s3114_s11, %s3113_s20  ;;  %v2241_v5 = vld [vmem:[%s3881_s24 + $0xc0] sm:$0xff]   ;;  %v2245_v41 = vld [vmem:[%s3881_s24 + $0xc8] sm:$0xff]   ;;  %v2249_v6 = vld [vmem:[%s3881_s24 + $0xd0] sm:$0xff]  }
 0x3e7   : > { %s3115_s21 = sshll.u32 %s2126_s16, 2  ;;  %v2253_v9 = vld [vmem:[%s3881_s24 + $0xd8] sm:$0xff]   ;;  %v2257_v35 = vld [vmem:[%s3881_s24 + $0xe0] sm:$0xff]   ;;  %v2261_v52 = vld [vmem:[%s3881_s24 + $0xe8] sm:$0xff]  }
 0x3e8   : > { %s4818_s28 = scalar_lea.vmem %s5007_s6, %s3115_s21  ;;  %v2265_v17 = vld [vmem:[%s3881_s24 + $0xf0] sm:$0xff]   ;;  %v2269_v54 = vld [vmem:[%s3881_s24 + $0xf8] sm:$0xff]  }
 0x3e9   : > { %2146 = vst [vmem:[%s4818_s28] sm:$0xff] %v2145_v1   ;;  %2150 = vst [vmem:[%s4818_s28 + $0x8] sm:$0xff] %v2149_v13  }
 0x3ea   : > { %2154 = vst [vmem:[%s4818_s28 + $0x10] sm:$0xff] %v2153_v31   ;;  %2158 = vst [vmem:[%s4818_s28 + $0x18] sm:$0xff] %v2157_v40  }
 0x3eb   : > { %2162 = vst [vmem:[%s4818_s28 + $0x20] sm:$0xff] %v2161_v45   ;;  %2166 = vst [vmem:[%s4818_s28 + $0x28] sm:$0xff] %v2165_v2  }
 0x3ec   : > { %2170 = vst [vmem:[%s4818_s28 + $0x30] sm:$0xff] %v2169_v50   ;;  %2174 = vst [vmem:[%s4818_s28 + $0x38] sm:$0xff] %v2173_v7  }
 0x3ed   : > { %2178 = vst [vmem:[%s4818_s28 + $0x100] sm:$0xff] %v2177_v53   ;;  %2182 = vst [vmem:[%s4818_s28 + $0x108] sm:$0xff] %v2181_v30  }
 0x3ee   : > { %2186 = vst [vmem:[%s4818_s28 + $0x110] sm:$0xff] %v2185_v23   ;;  %2190 = vst [vmem:[%s4818_s28 + $0x118] sm:$0xff] %v2189_v21  }
 0x3ef   : > { %2194 = vst [vmem:[%s4818_s28 + $0x120] sm:$0xff] %v2193_v19   ;;  %2198 = vst [vmem:[%s4818_s28 + $0x128] sm:$0xff] %v2197_v39  }
 0x3f0   : > { %2202 = vst [vmem:[%s4818_s28 + $0x130] sm:$0xff] %v2201_v61   ;;  %2206 = vst [vmem:[%s4818_s28 + $0x138] sm:$0xff] %v2205_v25  }
 0x3f1   : > { %2210 = vst [vmem:[%s4818_s28 + $0x200] sm:$0xff] %v2209_v0   ;;  %2214 = vst [vmem:[%s4818_s28 + $0x208] sm:$0xff] %v2213_v27  }
 0x3f2   : > { %2218 = vst [vmem:[%s4818_s28 + $0x210] sm:$0xff] %v2217_v48   ;;  %2222 = vst [vmem:[%s4818_s28 + $0x218] sm:$0xff] %v2221_v47  }
 0x3f3   : > { %2226 = vst [vmem:[%s4818_s28 + $0x220] sm:$0xff] %v2225_v8   ;;  %2230 = vst [vmem:[%s4818_s28 + $0x228] sm:$0xff] %v2229_v26  }
 0x3f4   : > { %2234 = vst [vmem:[%s4818_s28 + $0x230] sm:$0xff] %v2233_v18   ;;  %2238 = vst [vmem:[%s4818_s28 + $0x238] sm:$0xff] %v2237_v58  }
 0x3f5   : > { %2242 = vst [vmem:[%s4818_s28 + $0x300] sm:$0xff] %v2241_v5   ;;  %2246 = vst [vmem:[%s4818_s28 + $0x308] sm:$0xff] %v2245_v41  }
 0x3f6   : > { %2250 = vst [vmem:[%s4818_s28 + $0x310] sm:$0xff] %v2249_v6   ;;  %2254 = vst [vmem:[%s4818_s28 + $0x318] sm:$0xff] %v2253_v9  }
 0x3f7   : > { %2258 = vst [vmem:[%s4818_s28 + $0x320] sm:$0xff] %v2257_v35   ;;  %2262 = vst [vmem:[%s4818_s28 + $0x328] sm:$0xff] %v2261_v52  }
 0x3f8   : > { %2266 = vst [vmem:[%s4818_s28 + $0x330] sm:$0xff] %v2265_v17   ;;  %2270 = vst [vmem:[%s4818_s28 + $0x338] sm:$0xff] %v2269_v54  }
 0x3f9 PF: > { %2424 = sbr.rel (!%p3631_p10) target bundleno = 1044 (0x414), region = 134  ;;  %s5009_s15 = sld [smem:[#allocation11_spill]] (%p3631_p10)  ;;  %v2446_v20 = vld [vmem:[%s3898_s3] sm:$0xff] (%p3631_p10)   ;;  %v2450_v28 = vld [vmem:[%s3898_s3 + $0x8] sm:$0xff] (%p3631_p10)   ;;  %v2454_v10 = vld [vmem:[%s3898_s3 + $0x10] sm:$0xff] (%p3631_p10)  }
 0x3fa   : > { %s5010_s17 = sld [smem:[#allocation12_spill]] (%p3631_p10)  ;;  %v2458_v24 = vld [vmem:[%s3898_s3 + $0x18] sm:$0xff] (%p3631_p10)   ;;  %v2462_v38 = vld [vmem:[%s3898_s3 + $0x20] sm:$0xff] (%p3631_p10)   ;;  %v2466_v60 = vld [vmem:[%s3898_s3 + $0x28] sm:$0xff] (%p3631_p10)  }
 0x3fb   : > { %v2470_v15 = vld [vmem:[%s3898_s3 + $0x30] sm:$0xff] (%p3631_p10)   ;;  %v2474_v37 = vld [vmem:[%s3898_s3 + $0x38] sm:$0xff] (%p3631_p10)   ;;  %v2478_v46 = vld [vmem:[%s3898_s3 + $0x40] sm:$0xff] (%p3631_p10)   ;;  %s5011_s18 = sld [smem:[#allocation18_spill]] (%p3631_p10) }
 0x3fc   : > { %v2482_v12 = vld [vmem:[%s3898_s3 + $0x48] sm:$0xff] (%p3631_p10)   ;;  %v2486_v34 = vld [vmem:[%s3898_s3 + $0x50] sm:$0xff] (%p3631_p10)   ;;  %v2490_v16 = vld [vmem:[%s3898_s3 + $0x58] sm:$0xff] (%p3631_p10)  }
 0x3fd   : > { %v2494_v29 = vld [vmem:[%s3898_s3 + $0x60] sm:$0xff] (%p3631_p10)   ;;  %v2498_v57 = vld [vmem:[%s3898_s3 + $0x68] sm:$0xff] (%p3631_p10)   ;;  %v2502_v22 = vld [vmem:[%s3898_s3 + $0x70] sm:$0xff] (%p3631_p10)  }
 0x3fe   : > { %v2506_v56 = vld [vmem:[%s3898_s3 + $0x78] sm:$0xff]   ;;  %v2510_v42 = vld [vmem:[%s3898_s3 + $0x80] sm:$0xff]   ;;  %v2514_v33 = vld [vmem:[%s3898_s3 + $0x88] sm:$0xff]  }
 0x3ff   : > { %s3116_s24 = sshll.u32 %s5009_s15, 4  ;;  %v2518_v3 = vld [vmem:[%s3898_s3 + $0x90] sm:$0xff]   ;;  %v2522_v44 = vld [vmem:[%s3898_s3 + $0x98] sm:$0xff]   ;;  %v2526_v49 = vld [vmem:[%s3898_s3 + $0xa0] sm:$0xff]  }
 0x400   : > { %s3117_s27 = sshll.u32 %s5010_s17, 8  ;;  %v2530_v51 = vld [vmem:[%s3898_s3 + $0xa8] sm:$0xff]   ;;  %v2534_v43 = vld [vmem:[%s3898_s3 + $0xb0] sm:$0xff]   ;;  %v2538_v4 = vld [vmem:[%s3898_s3 + $0xb8] sm:$0xff]  }
 0x401   : > { %s2427_s10 = sadd.s32 %s3117_s27, %s3116_s24  ;;  %v2542_v55 = vld [vmem:[%s3898_s3 + $0xc0] sm:$0xff]   ;;  %v2546_v32 = vld [vmem:[%s3898_s3 + $0xc8] sm:$0xff]   ;;  %v2550_v59 = vld [vmem:[%s3898_s3 + $0xd0] sm:$0xff]  }
 0x402   : > { %s3118_s12 = sshll.u32 %s2427_s10, 2  ;;  %v2554_v11 = vld [vmem:[%s3898_s3 + $0xd8] sm:$0xff]   ;;  %v2558_v62 = vld [vmem:[%s3898_s3 + $0xe0] sm:$0xff]   ;;  %v2562_v36 = vld [vmem:[%s3898_s3 + $0xe8] sm:$0xff]  }
 0x403   : > { %s4891_s19 = scalar_lea.vmem %s5011_s18, %s3118_s12  ;;  %v2566_v14 = vld [vmem:[%s3898_s3 + $0xf0] sm:$0xff]   ;;  %v2570_v63 = vld [vmem:[%s3898_s3 + $0xf8] sm:$0xff]  }
 0x404   : > { %2447 = vst [vmem:[%s4891_s19] sm:$0xff] %v2446_v20   ;;  %2451 = vst [vmem:[%s4891_s19 + $0x8] sm:$0xff] %v2450_v28  }
 0x405   : > { %2455 = vst [vmem:[%s4891_s19 + $0x10] sm:$0xff] %v2454_v10   ;;  %2459 = vst [vmem:[%s4891_s19 + $0x18] sm:$0xff] %v2458_v24  }
 0x406   : > { %2463 = vst [vmem:[%s4891_s19 + $0x20] sm:$0xff] %v2462_v38   ;;  %2467 = vst [vmem:[%s4891_s19 + $0x28] sm:$0xff] %v2466_v60  }
 0x407   : > { %2471 = vst [vmem:[%s4891_s19 + $0x30] sm:$0xff] %v2470_v15   ;;  %2475 = vst [vmem:[%s4891_s19 + $0x38] sm:$0xff] %v2474_v37  }
 0x408   : > { %2479 = vst [vmem:[%s4891_s19 + $0x100] sm:$0xff] %v2478_v46   ;;  %2483 = vst [vmem:[%s4891_s19 + $0x108] sm:$0xff] %v2482_v12  }
 0x409   : > { %2487 = vst [vmem:[%s4891_s19 + $0x110] sm:$0xff] %v2486_v34   ;;  %2491 = vst [vmem:[%s4891_s19 + $0x118] sm:$0xff] %v2490_v16  }
 0x40a   : > { %2495 = vst [vmem:[%s4891_s19 + $0x120] sm:$0xff] %v2494_v29   ;;  %2499 = vst [vmem:[%s4891_s19 + $0x128] sm:$0xff] %v2498_v57  }
 0x40b   : > { %2503 = vst [vmem:[%s4891_s19 + $0x130] sm:$0xff] %v2502_v22   ;;  %2507 = vst [vmem:[%s4891_s19 + $0x138] sm:$0xff] %v2506_v56  }
 0x40c   : > { %2511 = vst [vmem:[%s4891_s19 + $0x200] sm:$0xff] %v2510_v42   ;;  %2515 = vst [vmem:[%s4891_s19 + $0x208] sm:$0xff] %v2514_v33  }
 0x40d   : > { %2519 = vst [vmem:[%s4891_s19 + $0x210] sm:$0xff] %v2518_v3   ;;  %2523 = vst [vmem:[%s4891_s19 + $0x218] sm:$0xff] %v2522_v44  }
 0x40e   : > { %2527 = vst [vmem:[%s4891_s19 + $0x220] sm:$0xff] %v2526_v49   ;;  %2531 = vst [vmem:[%s4891_s19 + $0x228] sm:$0xff] %v2530_v51  }
 0x40f   : > { %2535 = vst [vmem:[%s4891_s19 + $0x230] sm:$0xff] %v2534_v43   ;;  %2539 = vst [vmem:[%s4891_s19 + $0x238] sm:$0xff] %v2538_v4  }
 0x410   : > { %2543 = vst [vmem:[%s4891_s19 + $0x300] sm:$0xff] %v2542_v55   ;;  %2547 = vst [vmem:[%s4891_s19 + $0x308] sm:$0xff] %v2546_v32  }
 0x411   : > { %2551 = vst [vmem:[%s4891_s19 + $0x310] sm:$0xff] %v2550_v59   ;;  %2555 = vst [vmem:[%s4891_s19 + $0x318] sm:$0xff] %v2554_v11  }
 0x412   : > { %2559 = vst [vmem:[%s4891_s19 + $0x320] sm:$0xff] %v2558_v62   ;;  %2563 = vst [vmem:[%s4891_s19 + $0x328] sm:$0xff] %v2562_v36  }
 0x413   : > { %2567 = vst [vmem:[%s4891_s19 + $0x330] sm:$0xff] %v2566_v14   ;;  %2571 = vst [vmem:[%s4891_s19 + $0x338] sm:$0xff] %v2570_v63  }
 0x414 PF: > { %s22_s8 = sadd.s32 1, %s3495_s8   ;;  %s5012_s20 = sld [smem:[#allocation13_spill]] }
 0x415   : > { %p19_p1 = scmp.ge.s32.totalorder %s22_s8, 10   ;;  %s5013_s24 = smov %s3471_s25 }
 0x416   : > { %s5014_s25 = smov %s3475_s26  ;;  %s5015_s26 = smov %s3644_s7 }
 0x417   : > { %s5016_s27 = smov %s3487_s29  ;;  %s5017_s28 = smov %s3491_s30 }
 0x418   : > { %s5019_s30 = smov %s5025_s22  ;;  %21 = sbr.rel (!%p19_p1) target bundleno = 11 (0xb), region = 240 }
 0x41a   : > { %s5018_s29 = smov %s5012_s20 }
 0x41d   :  { %2749 = vsyncpa [#allocation3], 1 }
 0x41e   :  { %2751 = vsyncpa [#allocation3 + $0x1], 1 }
 0x41f   :  { %2752 = vsyncpa [#allocation5], 1 }

// kernel: tpu_custom_call.1
= control target key start
LH: loop header
LB: loop body
LE: loop exit
PB: predicated region body
PF: predicated region fallthrough
CT: control target
= control target key end

     0   :  { %s4972_s0 = inlined_call_operand.hbm [shape: f32[2,512,128], index: 0, kind: input, shape index: {}]   ;;  %s4973_s1 = inlined_call_operand.vmem [shape: f32[1,128], index: 1, kind: input, shape index: {}]   ;;  %s4974_s2 = inlined_call_operand.vmem [shape: f32[1,128], index: 2, kind: input, shape index: {}]   ;;  %s4975_s3 = inlined_call_operand.hbm [shape: bf16[128,384], index: 3, kind: input, shape index: {}]   ;;  %s4976_s4 = inlined_call_operand.vmem [shape: f32[1,384], index: 4, kind: input, shape index: {}]   ;;  %s4977_s5 = inlined_call_operand.vmem [shape: bf16[2,4,512,32], index: 5, kind: output, shape index: {0}]   ;;  %s4978_s6 = inlined_call_operand.vmem [shape: bf16[2,4,512,32], index: 6, kind: output, shape index: {1}]   ;;  %s4979_s7 = inlined_call_operand.vmem [shape: bf16[2,4,512,32], index: 7, kind: output, shape index: {2}]  }
   0x1   :  { %4983 = sst [smem:[#allocation15_spill]] %s4975_s3 }
   0x2   :  { %4984 = sst [smem:[#allocation16_spill]] %s4977_s5 }
   0x3   :  { %4985 = sst [smem:[#allocation17_spill]] %s4978_s6 }
   0x4   :  { %4986 = sst [smem:[#allocation18_spill]] %s4979_s7 }
   0x5   :  { %13 = vsyncpa [#allocation3], 0 }
   0x6   :  { %15 = vsyncpa [#allocation3 + $0x1], 0 }
   0x7   :  { %16 = vsyncpa [#allocation5], 0  ;;  %s3547_s24 = smov 0   ;;  %s3549_s25 = smov 0  }
   0x8   :  { %s3551_s26 = smov 0   ;;  %s3553_s27 = smov 0  }
   0x9   :  { %s3555_s28 = smov 0   ;;  %s3557_s29 = smov 0  }
   0xa   :  { %s3559_s30 = smov 0   ;;  %s3561_s8 = smov 0  }
   0xb LB: > { %4987 = sst [smem:[#allocation11_spill]] %s3479_s27  ;;  %s2874_s9 = sadd.s32 4294967295, %s3495_s8   ;;  %s3495_s8 = sphi %s3561_s8, %s22_s8   ;;  %s3491_s30 = sphi %s3559_s30, %s5019_s30   ;;  %s3487_s29 = sphi %s3557_s29, %s5018_s29   ;;  %s3483_s28 = sphi %s3555_s28, %s5017_s28   ;;  %s3479_s27 = sphi %s3553_s27, %s5016_s27   ;;  %s3475_s26 = sphi %s3551_s26, %s5015_s26   ;;  %s3471_s25 = sphi %s3549_s25, %s5014_s25   ;;  %s3467_s24 = sphi %s3547_s24, %s5013_s24  }
   0xc   : > { %4988 = sst [smem:[#allocation12_spill]] %s3483_s28  ;;  %p56_p0 = scmp.ne.s32.totalorder %s3471_s25, %s3467_s24 }
   0xd   : > { %p3587_p1 = scmp.eq.s32.totalorder %s2874_s9, 0  ;;  %p3591_p2 = scmp.eq.s32.totalorder %s2874_s9, 7 }
   0xe   : > { %p2876_p3 = scmp.ge.s32.totalorder %s3495_s8, 1  ;;  %p235_p4 = scmp.lt.s32.totalorder %s3495_s8, 9 }
   0xf   : > { %p3599_p5 = por %p3587_p1, %p56_p0  ;;  %s3497_s14 = smov [#allocation4]  }
  0x10   : > { %p3603_p6 = pnand %p2876_p3, %p235_p4  ;;  %s253_s15 = sshll.u32 %s3497_s14, 4  ;;  %s254_s15 = int_to_ptr.vmem [resolvable:$true] %s253_s15 }
  0x11   : > { %s4991_s12 = scalar_select %p3599_p5, 1, 0 }
  0x12   : > { %p3223_p7 = pneg %p3603_p6  ;;  %s3382_s16 = scalar_lea.vmem %s254_s15, 3072 }
  0x13   : > { %p3383_p10 = scmp.ne.s32.totalorder %s254_s15, %s3382_s16  ;;  %p3390_p13 = scmp.lt.s32.totalorder %s254_s15, %s254_s15 }
  0x14   : > { %p3224_p8 = pnand %p3223_p7, %p3587_p1  ;;  %p3391_p0 = scmp.lt.s32.totalorder %s3382_s16, %s3382_s16 }
  0x16   : > { %p3373_p9 = pneg %p3224_p8  ;;  %p3392_p5 = por %p3391_p0, %p3390_p13 }
  0x18   : > { %p3385_p11 = pnand %p3383_p10, %p3373_p9 }
  0x1a   : > { %p3386_p12 = pneg %p3385_p11 }
  0x1c   : > { %p3393_p3 = pnand %p3392_p5, %p3386_p12 }
  0x1e   : > { %3396 = shalt.err (!%p3393_p3)
}
  0x1f   : > { %s3498_s17 = smov 192   ;;  %s3499_s18 = smov 12  }
  0x20   : > { %s4993_s3 = sld [smem:[#allocation15_spill]]  ;;  %s31_s21 = sadd.s32 1, %s3487_s29 }
  0x21   : > { %s34_s22 = sadd.s32 1, %s3491_s30  ;;  %p32_p4 = scmp.ge.s32.totalorder %s31_s21, 4 }
  0x22   : > { %s43_s23 = sadd.s32 1, %s3475_s26  ;;  %p50_p5 = scmp.ne.s32.totalorder %s3475_s26, %s3471_s25 }
  0x23   : > { %p51_p7 = scmp.eq.s32.totalorder %s3495_s8, 0  ;;  %s5021_s21 = smov (%p32_p4, %s31_s21), 0 }
  0x24   : > { %4994 = sst [smem:[#allocation13_spill]] %s5021_s21  ;;  %s5023_s22 = smov (!%p32_p4, %s34_s22), %s3491_s30 }
  0x25   : > { %s39_s24 = ssub.s32 %s3487_s29, %s5021_s21  ;;  %p3625_p9 = por %p51_p7, %p50_p5 }
  0x26   : > { %3226 = dma.hbm_to_vmem [thread:$0]  (!%p3224_p8), %s4993_s3, 3072, %s254_s15, [#allocation5], %s3498_s17, %s3498_s17, %s3499_s18  }
  0x27   : > { %p36_p8 = scmp.ge.s32.totalorder %s5023_s22, 2  ;;  %p3631_p10 = por %p3591_p2, %p50_p5 }
  0x28   : > { %p3232_p11 = scmp.lt.s32.totalorder %s3495_s8, 8  ;;  %s270_s15 = sand.u32 1, %s3475_s26  }
  0x29   : > { %s4996_s14 = scalar_select %p3631_p10, 1, 0 }
  0x2a   : > { %s5025_s22 = smov (%p36_p8, %s5023_s22), 0  ;;  %s2879_s16 = sshll.u32 %s270_s15, 7 }
  0x2b   : > { %4997 = sst [smem:[#allocation14_spill]] %s4996_s14  ;;  %s38_s17 = ssub.s32 %s3491_s30, %s5025_s22 }
  0x2c   : > { %s40_s18 = sor.u32 %s39_s24, %s38_s17  ;;  %s2880_s19 = sshll.u32 %s3487_s29, 4 }
  0x2d   : > { %p41_p12 = scmp.eq.s32.totalorder %s40_s18, 0  ;;  %s2881_s20 = sshll.u32 %s3491_s30, 6 }
  0x2e   : > { %s280_s3 = sadd.s32 %s2881_s20, %s2880_s19  ;;  %s274_s21 = scalar_lea.vmem [#allocation2], %s2879_s16 }
  0x2f   : > { %s283_s11 = sshll.u32 %s274_s21, 4  ;;  %s2882_s6 = sshll.u32 %s280_s3, 7  ;;  %s284_s11 = int_to_ptr.vmem [resolvable:$true] %s283_s11 }
  0x30   : > { %s3644_s7 = scalar_select %p41_p12, %s3475_s26, %s43_s23  }
  0x31   : > { %s282_s27 = scalar_lea.hbm %s4972_s0, %s2882_s6  ;;  %p3653_p2 = pnand %p3232_p11, %p3625_p9 }
  0x32   : > { %s271_s24 = scalar_lea.sflag [#allocation3], %s270_s15  ;;  %s3410_s16 = scalar_lea.vmem %s284_s11, 2048 }
  0x33   : > { %p3399_p13 = pneg %p3653_p2  ;;  %p3411_p0 = scmp.ne.s32.totalorder %s284_s11, %s3410_s16 }
  0x34   : > { %s3500_s3 = smov [#allocation2]  }
  0x35   : > { %p3413_p3 = pnand %p3411_p0, %p3399_p13  ;;  %s3415_s21 = sshll.u32 %s3500_s3, 4  ;;  %s3416_s21 = int_to_ptr.vmem [resolvable:$false] %s3415_s21 }
  0x36   : > { %s3417_s23 = scalar_lea.vmem %s3416_s21, 4096  ;;  %p3418_p5 = scmp.lt.s32.totalorder %s284_s11, %s3416_s21 }
  0x37   : > { %p3414_p4 = pneg %p3413_p3  ;;  %p3419_p7 = scmp.lt.s32.totalorder %s3417_s23, %s3410_s16 }
  0x39   : > { %p3420_p8 = por %p3419_p7, %p3418_p5 }
  0x3b   : > { %p3421_p12 = pnand %p3420_p8, %p3414_p4 }
  0x3d   : > { %3424 = shalt.err (!%p3421_p12)
}
  0x3e   : > { %s3501_s5 = smov 128   ;;  %s3502_s6 = smov 8  }
  0x3f   : > { %3230 = dma.hbm_to_vmem [thread:$0]  (!%p3653_p2), %s282_s27, 2048, %s284_s11, %s271_s24, %s3501_s5, %s3501_s5, %s3502_s6  }
  0x40   : > { %295 = sbr.rel (%p3603_p6) target bundleno = 1044 (0x414), region = 40  ;;  %s3664_s28 = sand.u32 (!%p3603_p6), 1, %s3471_s25  }
  0x41   : > { %s2884_s9 = sshll.u32 (!%p3603_p6), %s3664_s28, 7  ;;  %s298_s15 = scalar_lea.sflag (!%p3603_p6), [#allocation3], %s3664_s28 }
  0x42   : > { %s3668_s17 = scalar_lea.vmem (!%p3603_p6), [#allocation2], %s2884_s9  ;;  %p4999_p9 = scmp.ne.s32.totalorder (!%p3603_p6), %s4991_s12, 0 }
  0x45   : > { %3458 = dma.done.wait (%p4999_p9), %s298_s15, 2048  }
  0x46   : > { %3460 = vsyncadd (%p4999_p9), %s298_s15, 4294965248 }
  0x47   : > { %3462 = dma.done.wait (%p3587_p1), [#allocation5], 3072  }
  0x48   : > { %3464 = vsyncadd (%p3587_p1), [#allocation5], 4294964224  ;;  %v348_v0 = vld [vmem:[%s3668_s17] sm:$0xff]  ;;  %v350_v1 = vld [vmem:[%s3668_s17 + $0x10] sm:$0xff]  ;;  %s3862_s19 = sshll.u32 %s3664_s28, 8  ;;  %vm1062_vm0 = vcmask 257024  }
  0x49   : > { %366 = vadd.xlane.f32.xlu0 %v348_v0  ;;  %370 = vadd.xlane.f32.xlu1 %v350_v1  ;;  %v349_v2 = vld [vmem:[%s3668_s17 + $0x8] sm:$0xff]  ;;  %v351_v3 = vld [vmem:[%s3668_s17 + $0x18] sm:$0xff]  ;;  %v352_v4 = vld [vmem:[%s3668_s17 + $0x20] sm:$0xff]  ;;  %s3871_s20 = scalar_lea.vmem [#allocation6], %s3862_s19  ;;  %s3504_s11 = smov 96  }
  0x4a   : > { %v353_v5 = vld [vmem:[%s3668_s17 + $0x28] sm:$0xff]  ;;  %v354_v6 = vld [vmem:[%s3668_s17 + $0x30] sm:$0xff]  ;;  %v355_v7 = vld [vmem:[%s3668_s17 + $0x38] sm:$0xff]  ;;  %s3881_s24 = scalar_lea.vmem [#allocation7], %s3862_s19  ;;  %s3505_s16 = smov 64  }
  0x4b   : > { %v3687_v8 = vld [vmem:[%s3668_s17 + $0x40] sm:$0xff]  ;;  %v3690_v9 = vld [vmem:[%s3668_s17 + $0x48] sm:$0xff]  ;;  %v3695_v10 = vld [vmem:[%s3668_s17 + $0x50] sm:$0xff]  ;;  %s3898_s3 = scalar_lea.vmem [#allocation8], %s3862_s19  ;;  %s3506_s21 = smov 32  }
  0x4c   : > { %v3698_v11 = vld [vmem:[%s3668_s17 + $0x58] sm:$0xff]  ;;  %v3703_v12 = vld [vmem:[%s3668_s17 + $0x60] sm:$0xff]  ;;  %v3706_v13 = vld [vmem:[%s3668_s17 + $0x68] sm:$0xff]  ;;  %s5001_s5 = sld [smem:[#allocation11_spill]] (%p3631_p10) }
  0x4d   : > { %368 = vadd.xlane.f32.xlu0 %v349_v2  ;;  %372 = vadd.xlane.f32.xlu1 %v351_v3  ;;  %v3711_v14 = vld [vmem:[%s3668_s17 + $0x70] sm:$0xff]  ;;  %v3714_v15 = vld [vmem:[%s3668_s17 + $0x78] sm:$0xff]  ;;  %s5002_s6 = sld [smem:[#allocation12_spill]] (%p3631_p10) }
  0x4e   : > { %v3307_v16 = vld [vmem:[#allocation4 + $0xac] ss:$12 sps:$4 sm:$0xff]   ;;  %v3309_v17 = vld [vmem:[#allocation4 + $0xa8] ss:$12 sps:$4 sm:$0xff]   ;;  %v3312_v54 = vld [vmem:[#allocation4 + $0xb0] ss:$12 sps:$4 sm:$0xff]  }
  0x4f   : > { %772 = vmatprep.subr.bf16.mxu0 %v3307_v16  ;;  %v3310_v53 = vld [vmem:[#allocation4 + $0x94] ss:$12 sps:$4 sm:$0xff]   ;;  %v3313_v55 = vld [vmem:[#allocation4 + $0x90] ss:$12 sps:$4 sm:$0xff]   ;;  %3185 = vmatprep.subr.bf16.mxu1 %v3312_v54  ;;  %s5003_s12 = sld [smem:[#allocation16_spill]] (%p3631_p10) }
  0x50   : > { %773 = vmatpush1.bf16.msra.mxu0 %v3309_v17  ;;  %3186 = vmatpush3.bf16.msra.mxu1 %v3312_v54  ;;  %v3318_v17 = vld [vmem:[#allocation4 + $0x64] ss:$12 sps:$4 sm:$0xff]  }
  0x51   : > { %374 = vadd.xlane.f32.xlu0 %v352_v4  ;;  %376 = vadd.xlane.f32.xlu1 %v353_v5 }
  0x52   : > { %774 = vmatprep.subr.bf16.mxu0 %v3310_v53  ;;  %s3110_s28 = sshll.u32 (%p3631_p10), %s5001_s5, 4 }
  0x53   : > { %s3111_s9 = sshll.u32 (%p3631_p10), %s5002_s6, 8 }
  0x54   : > { %775 = vmatpush1.bf16.msra.mxu0 %v3313_v55  ;;  %s1825_s15 = sadd.s32 (%p3631_p10), %s3111_s9, %s3110_s28 }
  0x55   : > { %378 = vadd.xlane.f32.xlu0 %v354_v6  ;;  %380 = vadd.xlane.f32.xlu1 %v355_v7  ;;  %s3112_s17 = sshll.u32 (%p3631_p10), %s1825_s15, 2 }
  0x56   : > { %s4745_s13 = scalar_lea.vmem (%p3631_p10), %s5003_s12, %s3112_s17 }
  0x59   : > { %382 = vadd.xlane.f32.xlu0 %v3687_v8  ;;  %384 = vadd.xlane.f32.xlu1 %v3690_v9 }
  0x5d   : > { %386 = vadd.xlane.f32.xlu0 %v3695_v10  ;;  %388 = vadd.xlane.f32.xlu1 %v3698_v11 }
  0x61   : > { %390 = vadd.xlane.f32.xlu0 %v3703_v12  ;;  %392 = vadd.xlane.f32.xlu1 %v3706_v13 }
  0x65   : > { %394 = vadd.xlane.f32.xlu0 %v3711_v14  ;;  %396 = vadd.xlane.f32.xlu1 %v3714_v15 }
  0xd2   : > { %v367_v18 = vpop.xlane.xlu0 %366  ;;  %v371_v19 = vpop.xlane.xlu1 %370 }
  0xd3   : > { %v399_v20 = vmul.f32 0.0078125, %v367_v18  ;;  %v401_v21 = vmul.f32 0.0078125, %v371_v19  ;;  %v3320_v18 = vld [vmem:[#allocation4 + $0x80] ss:$12 sps:$4 sm:$0xff]  }
  0xd5   : > { %v3718_v22 = vsub.f32 %v348_v0, %v399_v20  ;;  %v3720_v23 = vsub.f32 %v350_v1, %v401_v21  ;;  %v3314_v0 = vld [vmem:[#allocation4 + $0x7c] ss:$12 sps:$4 sm:$0xff]   ;;  %v3316_v1 = vld [vmem:[#allocation4 + $0x98] ss:$12 sps:$4 sm:$0xff]   ;;  %v3321_v20 = vld [vmem:[#allocation4 + $0x60] ss:$12 sps:$4 sm:$0xff]  }
  0xd6   : > { %v369_v24 = vpop.xlane.xlu0 %368  ;;  %v373_v25 = vpop.xlane.xlu1 %372  ;;  %776 = vmatprep.subr.bf16.mxu0 %v3314_v0  ;;  %3187 = vmatprep.subr.bf16.mxu1 %v3316_v1 }
  0xd7   : > { %v400_v26 = vmul.f32 0.0078125, %v369_v24  ;;  %v431_v27 = vmul.f32 %v3718_v22, %v3718_v22  ;;  %v402_v28 = vmul.f32 0.0078125, %v373_v25  ;;  %v433_v29 = vmul.f32 %v3720_v23, %v3720_v23  ;;  %3188 = vmatpush3.bf16.msra.mxu1 %v3316_v1 }
  0xd8   : > { %3189 = vmatprep.subr.bf16.mxu1 %v3320_v18 }
  0xd9   : > { %447 = vadd.xlane.f32.xlu0 %v431_v27  ;;  %v3726_v30 = vsub.f32 %v349_v2, %v400_v26  ;;  %v3728_v31 = vsub.f32 %v351_v3, %v402_v28  ;;  %v3322_v28 = vld [vmem:[#allocation4 + $0x4c] ss:$12 sps:$4 sm:$0xff]  }
  0xda   : > { %v375_v32 = vpop.xlane.xlu0 %374  ;;  %v377_v33 = vpop.xlane.xlu1 %376 }
  0xdb   : > { %v403_v34 = vmul.f32 0.0078125, %v375_v32  ;;  %v432_v35 = vmul.f32 %v3726_v30, %v3726_v30  ;;  %v404_v36 = vmul.f32 0.0078125, %v377_v33  ;;  %v434_v37 = vmul.f32 %v3728_v31, %v3728_v31  ;;  %3190 = vmatpush3.bf16.msra.mxu1 %v3320_v18  ;;  %v3325_v33 = vld [vmem:[#allocation4 + $0x48] ss:$12 sps:$4 sm:$0xff]  }
  0xdd   : > { %451 = vadd.xlane.f32.xlu0 %v433_v29  ;;  %449 = vadd.xlane.f32.xlu1 %v432_v35  ;;  %v3734_v38 = vsub.f32 %v352_v4, %v403_v34  ;;  %v3736_v39 = vsub.f32 %v353_v5, %v404_v36  ;;  %v3317_v5 = vld [vmem:[#allocation4 + $0x78] ss:$12 sps:$4 sm:$0xff]   ;;  %v3324_v29 = vld [vmem:[#allocation4 + $0x68] ss:$12 sps:$4 sm:$0xff]   ;;  %v3328_v36 = vld [vmem:[#allocation4 + $0x50] ss:$12 sps:$4 sm:$0xff]  }
  0xde   : > { %v379_v40 = vpop.xlane.xlu0 %378  ;;  %v381_v41 = vpop.xlane.xlu1 %380  ;;  %777 = vmatpush1.bf16.msra.mxu0 %v3317_v5  ;;  %3191 = vmatprep.subr.bf16.mxu1 %v3324_v29  ;;  %v3326_v35 = vld [vmem:[#allocation4 + $0x34] ss:$12 sps:$4 sm:$0xff]  }
  0xdf   : > { %v405_v42 = vmul.f32 0.0078125, %v379_v40  ;;  %v435_v43 = vmul.f32 %v3734_v38, %v3734_v38  ;;  %v406_v44 = vmul.f32 0.0078125, %v381_v41  ;;  %v436_v45 = vmul.f32 %v3736_v39, %v3736_v39  ;;  %778 = vmatprep.subr.bf16.mxu0 %v3318_v17  ;;  %3192 = vmatpush3.bf16.msra.mxu1 %v3324_v29  ;;  %v3332_v40 = vld [vmem:[#allocation4 + $0x38] ss:$12 sps:$4 sm:$0xff]  }
  0xe0   : > { %3193 = vmatprep.subr.bf16.mxu1 %v3328_v36  ;;  %v3333_v41 = vld [vmem:[#allocation4 + $0x18] ss:$12 sps:$4 sm:$0xff]  }
  0xe1   : > { %453 = vadd.xlane.f32.xlu1 %v434_v37  ;;  %455 = vadd.xlane.f32.xlu0 %v435_v43  ;;  %v3742_v46 = vsub.f32 %v354_v6, %v405_v42  ;;  %v3744_v47 = vsub.f32 %v355_v7, %v406_v44  ;;  %v3334_v42 = vld [vmem:[#allocation4 + $0x4] ss:$12 sps:$4 sm:$0xff]   ;;  %v3336_v43 = vld [vmem:[#allocation4 + $0x20] ss:$12 sps:$4 sm:$0xff]  }
  0xe2   : > { %v383_v48 = vpop.xlane.xlu0 %382  ;;  %v385_v49 = vpop.xlane.xlu1 %384  ;;  %779 = vmatpush1.bf16.msra.mxu0 %v3321_v20  ;;  %v3337_v44 = vld [vmem:[#allocation4] ss:$12 sps:$4 sm:$0xff]  }
  0xe3   : > { %v407_v50 = vmul.f32 0.0078125, %v383_v48  ;;  %v437_v51 = vmul.f32 %v3742_v46, %v3742_v46  ;;  %v408_v52 = vmul.f32 0.0078125, %v385_v49  ;;  %v438_v56 = vmul.f32 %v3744_v47, %v3744_v47  ;;  %780 = vmatprep.subr.bf16.mxu0 %v3322_v28  ;;  %3194 = vmatpush3.bf16.msra.mxu1 %v3328_v36 }
  0xe4   : > { %3195 = vmatprep.subr.bf16.mxu1 %v3332_v40  ;;  %v3503_v48 = vmov 0  }
  0xe5   : > { %457 = vadd.xlane.f32.xlu1 %v436_v45  ;;  %459 = vadd.xlane.f32.xlu0 %v437_v51  ;;  %v3751_v57 = vsub.f32 %v3687_v8, %v407_v50  ;;  %v3754_v58 = vsub.f32 %v3690_v9, %v408_v52  ;;  %v3338_v45 = vld [vmem:[#allocation4 + $0x8] ss:$12 sps:$4 sm:$0xff]  }
  0xe6   : > { %v387_v59 = vpop.xlane.xlu0 %386  ;;  %v389_v60 = vpop.xlane.xlu1 %388  ;;  %781 = vmatpush1.bf16.msra.mxu0 %v3325_v33  ;;  %804 = vmatprep.mubr.bf16.mxu0 %v3503_v48 }
  0xe7   : > { %v409_v61 = vmul.f32 0.0078125, %v387_v59  ;;  %v439_v62 = vmul.f32 %v3751_v57, %v3751_v57  ;;  %v410_v63 = vmul.f32 0.0078125, %v389_v60  ;;  %v440_v2 = vmul.f32 %v3754_v58, %v3754_v58  ;;  %782 = vmatprep.subr.bf16.mxu0 %v3326_v35  ;;  %3196 = vmatpush3.bf16.msra.mxu1 %v3332_v40 }
  0xe8   : > { %3197 = vmatprep.subr.bf16.mxu1 %v3336_v43 }
  0xe9   : > { %461 = vadd.xlane.f32.xlu1 %v438_v56  ;;  %463 = vadd.xlane.f32.xlu0 %v439_v62  ;;  %v3761_v3 = vsub.f32 %v3695_v10, %v409_v61  ;;  %v3764_v4 = vsub.f32 %v3698_v11, %v410_v63 }
  0xea   : > { %v391_v6 = vpop.xlane.xlu0 %390  ;;  %v393_v7 = vpop.xlane.xlu1 %392 }
  0xeb   : > { %v411_v8 = vmul.f32 0.0078125, %v391_v6  ;;  %v441_v9 = vmul.f32 %v3761_v3, %v3761_v3  ;;  %v412_v16 = vmul.f32 0.0078125, %v393_v7  ;;  %v442_v10 = vmul.f32 %v3764_v4, %v3764_v4  ;;  %3198 = vmatpush3.bf16.msra.mxu1 %v3336_v43 }
  0xec   : > { %3199 = vmatprep.subr.bf16.mxu1 %v3338_v45 }
  0xed   : > { %465 = vadd.xlane.f32.xlu1 %v440_v2  ;;  %467 = vadd.xlane.f32.xlu0 %v441_v9  ;;  %v3771_v11 = vsub.f32 %v3703_v12, %v411_v8  ;;  %v3774_v19 = vsub.f32 %v3706_v13, %v412_v16 }
  0xee   : > { %v395_v21 = vpop.xlane.xlu0 %394  ;;  %v397_v24 = vpop.xlane.xlu1 %396 }
  0xef   : > { %v413_v25 = vmul.f32 0.0078125, %v395_v21  ;;  %v443_v26 = vmul.f32 %v3771_v11, %v3771_v11  ;;  %v414_v27 = vmul.f32 0.0078125, %v397_v24  ;;  %v444_v12 = vmul.f32 %v3774_v19, %v3774_v19  ;;  %3200 = vmatpush3.bf16.msra.mxu1 %v3338_v45 }
  0xf1   : > { %469 = vadd.xlane.f32.xlu1 %v442_v10  ;;  %471 = vadd.xlane.f32.xlu0 %v443_v26  ;;  %v3781_v13 = vsub.f32 %v3711_v14, %v413_v25  ;;  %v3784_v32 = vsub.f32 %v3714_v15, %v414_v27  ;;  %v3329_v14 = vld [vmem:[#allocation4 + $0x30] ss:$12 sps:$4 sm:$0xff]   ;;  %v3794_v25 = vld [vmem:[%s4973_s1] ss:$0 sm:$0xff] }
  0xf2   : > { %783 = vmatpush1.bf16.msra.mxu0 %v3329_v14  ;;  %v3330_v15 = vld [vmem:[#allocation4 + $0x1c] ss:$12 sps:$4 sm:$0xff]   ;;  %v3801_v14 = vld [vmem:[%s4974_s2] ss:$0 sm:$0xff] }
  0xf3   : > { %v445_v34 = vmul.f32 %v3781_v13, %v3781_v13  ;;  %v446_v37 = vmul.f32 %v3784_v32, %v3784_v32  ;;  %784 = vmatprep.subr.bf16.mxu0 %v3330_v15 }
  0xf5   : > { %473 = vadd.xlane.f32.xlu1 %v444_v12  ;;  %475 = vadd.xlane.f32.xlu0 %v445_v34 }
  0xf6   : > { %785 = vmatpush1.bf16.msra.mxu0 %v3333_v41 }
  0xf7   : > { %786 = vmatprep.subr.bf16.mxu0 %v3334_v42 }
  0xf9   : > { %477 = vadd.xlane.f32.xlu1 %v446_v37 }
  0xfa   : > { %787 = vmatpush1.bf16.msra.mxu0 %v3337_v44 }
 0x162   : > { %v448_v49 = vpop.xlane.xlu0 %447 }
 0x163   : > { %v479_v50 = vmul.f32 0.0078125, %v448_v49 }
 0x165   : > { %v495_v51 = vadd.f32 1e-05, %v479_v50 }
 0x166   : > { %v450_v52 = vpop.xlane.xlu1 %449  ;;  %v452_v53 = vpop.xlane.xlu0 %451 }
 0x167   : > { %3339 = vrsqrt.f32 %v495_v51  ;;  %v480_v54 = vmul.f32 0.0078125, %v450_v52  ;;  %v481_v55 = vmul.f32 0.0078125, %v452_v53 }
 0x169   : > { %v496_v56 = vadd.f32 1e-05, %v480_v54  ;;  %v497_v59 = vadd.f32 1e-05, %v481_v55 }
 0x16a   : > { %v454_v60 = vpop.xlane.xlu1 %453  ;;  %v456_v61 = vpop.xlane.xlu0 %455 }
 0x16b   : > { %3341 = vrsqrt.f32 %v496_v56  ;;  %v482_v62 = vmul.f32 0.0078125, %v454_v60  ;;  %v483_v63 = vmul.f32 0.0078125, %v456_v61 }
 0x16c   : > { %3343 = vrsqrt.f32 %v497_v59 }
 0x16d   : > { %v498_v0 = vadd.f32 1e-05, %v482_v62  ;;  %v499_v1 = vadd.f32 1e-05, %v483_v63 }
 0x16e   : > { %v458_v2 = vpop.xlane.xlu1 %457  ;;  %v460_v5 = vpop.xlane.xlu0 %459 }
 0x16f   : > { %3345 = vrsqrt.f32 %v498_v0  ;;  %v484_v6 = vmul.f32 0.0078125, %v458_v2  ;;  %v485_v7 = vmul.f32 0.0078125, %v460_v5 }
 0x170   : > { %3347 = vrsqrt.f32 %v499_v1 }
 0x171   : > { %v500_v8 = vadd.f32 1e-05, %v484_v6  ;;  %v501_v9 = vadd.f32 1e-05, %v485_v7 }
 0x172   : > { %v462_v16 = vpop.xlane.xlu1 %461  ;;  %v464_v17 = vpop.xlane.xlu0 %463 }
 0x173   : > { %3349 = vrsqrt.f32 %v500_v8  ;;  %v486_v18 = vmul.f32 0.0078125, %v462_v16  ;;  %v487_v10 = vmul.f32 0.0078125, %v464_v17 }
 0x174   : > { %v3340_v20 = vpop.eup %3339  ;;  %3351 = vrsqrt.f32 %v501_v9 }
 0x175   : > { %v502_v21 = vadd.f32 1e-05, %v486_v18  ;;  %v503_v24 = vadd.f32 1e-05, %v487_v10  ;;  %v527_v26 = vmul.f32 %v3340_v20, %v3718_v22 }
 0x176   : > { %v466_v27 = vpop.xlane.xlu1 %465  ;;  %v468_v28 = vpop.xlane.xlu0 %467 }
 0x177   : > { %3353 = vrsqrt.f32 %v502_v21  ;;  %v488_v29 = vmul.f32 0.0078125, %v466_v27  ;;  %v489_v12 = vmul.f32 0.0078125, %v468_v28  ;;  %v549_v34 = vmul.f32 %v3794_v25, %v527_v26 }
 0x178   : > { %v3342_v33 = vpop.eup %3341  ;;  %3355 = vrsqrt.f32 %v503_v24 }
 0x179   : > { %v3344_v35 = vpop.eup %3343  ;;  %v504_v36 = vadd.f32 1e-05, %v488_v29  ;;  %v505_v37 = vadd.f32 1e-05, %v489_v12  ;;  %v528_v15 = vmul.f32 %v3342_v33, %v3726_v30  ;;  %v571_v49 = vadd.f32 %v3801_v14, %v549_v34 }
 0x17a   : > { %v470_v22 = vpop.xlane.xlu1 %469  ;;  %v472_v40 = vpop.xlane.xlu0 %471  ;;  %v529_v41 = vmul.f32 %v3344_v35, %v3720_v23 }
 0x17b   : > { %3357 = vrsqrt.f32 %v504_v36  ;;  %v490_v42 = vmul.f32 0.0078125, %v470_v22  ;;  %v491_v43 = vmul.f32 0.0078125, %v472_v40  ;;  %v550_v44 = vmul.f32 %v3794_v25, %v528_v15 }
 0x17c   : > { %v3346_v45 = vpop.eup %3345  ;;  %3359 = vrsqrt.f32 %v505_v37  ;;  %v551_v23 = vmul.f32 %v3794_v25, %v529_v41 }
 0x17d   : > { %v3348_v50 = vpop.eup %3347  ;;  %v506_v51 = vadd.f32 1e-05, %v490_v42  ;;  %v507_v52 = vadd.f32 1e-05, %v491_v43  ;;  %v572_v53 = vadd.f32 %v3801_v14, %v550_v44  ;;  %v530_v30 = vmul.f32 %v3346_v45, %v3728_v31 }
 0x17e   : > { %v474_v54 = vpop.xlane.xlu1 %473  ;;  %v476_v55 = vpop.xlane.xlu0 %475  ;;  %v531_v56 = vmul.f32 %v3348_v50, %v3734_v38  ;;  %v573_v38 = vadd.f32 %v3801_v14, %v551_v23 }
 0x17f   : > { %3361 = vrsqrt.f32 %v506_v51  ;;  %v492_v59 = vmul.f32 0.0078125, %v474_v54  ;;  %v493_v60 = vmul.f32 0.0078125, %v476_v55  ;;  %v587_v61 = vpack.c.bf16 %v572_v53, %v571_v49 }
 0x180   : > { %v3350_v62 = vpop.eup %3349  ;;  %3363 = vrsqrt.f32 %v507_v52  ;;  %v552_v63 = vmul.f32 %v3794_v25, %v530_v30  ;;  %v553_v5 = vmul.f32 %v3794_v25, %v531_v56 }
 0x181   : > { %v3352_v0 = vpop.eup %3351  ;;  %v508_v1 = vadd.f32 1e-05, %v492_v59  ;;  %v509_v2 = vadd.f32 1e-05, %v493_v60  ;;  %805 = vmatmul.mubr.bf16.vlgmr.msra.gmra.mxu0 %v587_v61  ;;  %3201 = vmatprep.mubr.bf16.mxu1 %v587_v61  ;;  %v532_v31 = vmul.f32 %v3350_v62, %v3736_v39 }
 0x182   : > { %v478_v6 = vpop.xlane.xlu1 %477  ;;  %v574_v7 = vadd.f32 %v3801_v14, %v552_v63  ;;  %814 = vmatprep.mubr.bf16.mxu0 %v3503_v48  ;;  %v533_v8 = vmul.f32 %v3352_v0, %v3742_v46  ;;  %v575_v21 = vadd.f32 %v3801_v14, %v553_v5 }
 0x183   : > { %3365 = vrsqrt.f32 %v508_v1  ;;  %v494_v9 = vmul.f32 0.0078125, %v478_v6  ;;  %v554_v16 = vmul.f32 %v3794_v25, %v532_v31 }
 0x184   : > { %v3354_v17 = vpop.eup %3353  ;;  %3367 = vrsqrt.f32 %v509_v2  ;;  %v588_v18 = vpack.c.bf16 %v574_v7, %v573_v38  ;;  %v555_v39 = vmul.f32 %v3794_v25, %v533_v8 }
 0x185   : > { %v3356_v10 = vpop.eup %3355  ;;  %v510_v20 = vadd.f32 1e-05, %v494_v9  ;;  %v576_v24 = vadd.f32 %v3801_v14, %v554_v16  ;;  %v534_v26 = vmul.f32 %v3354_v17, %v3744_v47 }
 0x186   : > { %3202 = vmatmul.mubr.bf16.vlgmr.msra.gmra.mxu1 %v588_v18  ;;  %v535_v46 = vmul.f32 %v3356_v10, %v3751_v57  ;;  %v577_v12 = vadd.f32 %v3801_v14, %v555_v39 }
 0x187   : > { %3369 = vrsqrt.f32 %v510_v20  ;;  %v589_v27 = vpack.c.bf16 %v576_v24, %v575_v21  ;;  %v556_v28 = vmul.f32 %v3794_v25, %v534_v26 }
 0x188   : > { %v3358_v29 = vpop.eup %3357  ;;  %v557_v36 = vmul.f32 %v3794_v25, %v535_v46 }
 0x189   : > { %v3360_v33 = vpop.eup %3359  ;;  %815 = vmatmul.mubr.bf16.gmra.mxu0 %v588_v18  ;;  %3205 = vmatprep.mubr.bf16.mxu1 %v589_v27  ;;  %v578_v34 = vadd.f32 %v3801_v14, %v556_v28  ;;  %v536_v35 = vmul.f32 %v3358_v29, %v3754_v58 }
 0x18a   : > { %824 = vmatprep.mubr.bf16.mxu0 %v3503_v48  ;;  %v537_v47 = vmul.f32 %v3360_v33, %v3761_v3  ;;  %v579_v41 = vadd.f32 %v3801_v14, %v557_v36 }
 0x18b   : > { %v590_v57 = vpack.c.bf16 %v578_v34, %v577_v12  ;;  %v558_v37 = vmul.f32 %v3794_v25, %v536_v35 }
 0x18c   : > { %v3362_v15 = vpop.eup %3361  ;;  %v559_v22 = vmul.f32 %v3794_v25, %v537_v47 }
 0x18d   : > { %v3364_v40 = vpop.eup %3363  ;;  %v580_v42 = vadd.f32 %v3801_v14, %v558_v37  ;;  %v538_v43 = vmul.f32 %v3362_v15, %v3764_v4 }
 0x18e   : > { %3206 = vmatmul.mubr.bf16.gmra.mxu1 %v590_v57  ;;  %v539_v58 = vmul.f32 %v3364_v40, %v3771_v11  ;;  %v581_v49 = vadd.f32 %v3801_v14, %v559_v22 }
 0x18f   : > { %v591_v44 = vpack.c.bf16 %v580_v42, %v579_v41  ;;  %v560_v45 = vmul.f32 %v3794_v25, %v538_v43 }
 0x190   : > { %v3366_v3 = vpop.eup %3365  ;;  %v561_v53 = vmul.f32 %v3794_v25, %v539_v58 }
 0x191   : > { %v3368_v50 = vpop.eup %3367  ;;  %825 = vmatmul.mubr.bf16.gmra.mxu0 %v589_v27  ;;  %3209 = vmatprep.mubr.bf16.mxu1 %v591_v44  ;;  %v582_v51 = vadd.f32 %v3801_v14, %v560_v45  ;;  %v540_v52 = vmul.f32 %v3366_v3, %v3774_v19 }
 0x192   : > { %834 = vmatprep.mubr.bf16.mxu0 %v3503_v48  ;;  %v541_v4 = vmul.f32 %v3368_v50, %v3781_v13  ;;  %v583_v55 = vadd.f32 %v3801_v14, %v561_v53 }
 0x193   : > { %v592_v11 = vpack.c.bf16 %v582_v51, %v581_v49  ;;  %v562_v30 = vmul.f32 %v3794_v25, %v540_v52 }
 0x194   : > { %v3370_v54 = vpop.eup %3369  ;;  %v563_v59 = vmul.f32 %v3794_v25, %v541_v4 }
 0x195   : > { %v584_v23 = vadd.f32 %v3801_v14, %v562_v30  ;;  %v542_v56 = vmul.f32 %v3370_v54, %v3784_v32  ;;  %v629_v32 = vlaneseq }
 0x196   : > { %3210 = vmatmul.mubr.bf16.gmra.mxu1 %v592_v11  ;;  %v585_v13 = vadd.f32 %v3801_v14, %v563_v59 }
 0x197   : > { %v593_v19 = vpack.c.bf16 %v584_v23, %v583_v55  ;;  %v564_v60 = vmul.f32 %v3794_v25, %v542_v56  ;;  %v630_v25 = vshrl.u32 %v629_v32, 7 }
 0x199   : > { %835 = vmatmul.mubr.bf16.gmra.mxu0 %v590_v57  ;;  %3213 = vmatprep.mubr.bf16.mxu1 %v593_v19  ;;  %v586_v61 = vadd.f32 %v3801_v14, %v564_v60  ;;  %v631_v63 = vsub.s32 0, %v630_v25  ;;  %v627_v14 = vld [vmem:[%s4976_s4] sm:$0x7]  ;;  %v635_v0 = vsub.s32 1, %v630_v25  ;;  %v639_v2 = vsub.s32 2, %v630_v25 }
 0x19a   : > { %844 = vmatprep.mubr.bf16.mxu0 %v3503_v48 }
 0x19b   : > { %v594_v62 = vpack.c.bf16 %v586_v61, %v585_v13  ;;  %v3859_v1 = vrot.slane %v627_v14, %v631_v63  ;;  %v3864_v31 = vrot.slane %v627_v14, %v635_v0  ;;  %v3867_v38 = vrot.slane %v627_v14, %v639_v2 }
 0x19e   : > { %3214 = vmatmul.mubr.bf16.gmra.mxu1 %v594_v62 }
 0x1a1   : > { %845 = vmatmul.mubr.bf16.gmra.mxu0 %v591_v44 }
 0x1a2   : > { %854 = vmatprep.mubr.bf16.mxu0 %v3503_v48 }
 0x1a9   : > { %855 = vmatmul.mubr.bf16.gmra.mxu0 %v592_v11 }
 0x1aa   : > { %864 = vmatprep.mubr.bf16.mxu0 %v3503_v48 }
 0x1b1   : > { %865 = vmatmul.mubr.bf16.gmra.mxu0 %v593_v19 }
 0x1b2   : > { %874 = vmatprep.mubr.bf16.mxu0 %v3503_v48 }
 0x1b9   : > { %875 = vmatmul.mubr.bf16.gmra.mxu0 %v594_v62 }
 0x241   : > { %v806_v5 = vpop.f32.mrf.mxu0 }
 0x242   : > { %v807_v48 = vadd.f32 %v806_v5, %v3859_v1 }
 0x243   : > { %v808_v6 = vpop.f32.mrf.mxu0 }
 0x244   : > { %v3121_v7 = vpack.c.bf16 %v807_v48, %v807_v48  ;;  %v809_v8 = vadd.f32 %v808_v6, %v3864_v31 }
 0x245   : > { %v810_v9 = vpop.f32.mrf.mxu0 }
 0x246   : > { %1063 = vst.msk [vmem:[%s3871_s20] sm:$0xf] %vm1062_vm0, %v3121_v7  ;;  %v3875_v16 = vpack.c.bf16 %v809_v8, %v809_v8  ;;  %v811_v17 = vadd.f32 %v810_v9, %v3859_v1  ;;  %v3203_v18 = vpop.f32.mrf.mxu1  ;;  %1223 = vrot.lane.b32.xlu0 %v3121_v7, %s3504_s11 }
 0x247   : > { %v928_v39 = vadd.f32 %v3203_v18, %v3867_v38  ;;  %v812_v10 = vpop.f32.mrf.mxu0 }
 0x248   : > { %1135 = vst.msk [vmem:[%s3881_s24] sm:$0xf] %vm1062_vm0, %v3875_v16  ;;  %v3122_v20 = vpack.c.bf16 %v811_v17, %v811_v17  ;;  %v813_v21 = vadd.f32 %v812_v10, %v3864_v31  ;;  %v919_v24 = vpop.f32.mrf.mxu1 }
 0x249   : > { %v3887_v26 = vpack.c.bf16 %v928_v39, %v928_v39  ;;  %v920_v46 = vadd.f32 %v919_v24, %v3867_v38  ;;  %v816_v27 = vpop.f32.mrf.mxu0 }
 0x24a   : > { %1064 = vst.msk [vmem:[%s3871_s20 + $0x4] sm:$0xf] %vm1062_vm0, %v3122_v20  ;;  %v3892_v28 = vpack.c.bf16 %v813_v21, %v813_v21  ;;  %v817_v29 = vadd.f32 %v816_v27, %v3859_v1  ;;  %v3204_v12 = vpop.f32.mrf.mxu1  ;;  %1225 = vrot.lane.b32.xlu1 %v3122_v20, %s3504_s11  ;;  %1418 = vrot.lane.b32.xlu0 %v3121_v7, %s3505_s16 }
 0x24b   : > { %1209 = vst.msk [vmem:[%s3898_s3 + $0x8] sm:$0xf] %vm1062_vm0, %v3887_v26  ;;  %v3903_v33 = vpack.c.bf16 %v920_v46, %v920_v46  ;;  %v931_v34 = vadd.f32 %v3204_v12, %v3867_v38  ;;  %v818_v35 = vpop.f32.mrf.mxu0 }
 0x24c   : > { %1136 = vst.msk [vmem:[%s3881_s24 + $0x4] sm:$0xf] %vm1062_vm0, %v3892_v28  ;;  %v3909_v36 = vpack.c.bf16 %v817_v29, %v817_v29  ;;  %v819_v47 = vadd.f32 %v818_v35, %v3864_v31  ;;  %v922_v57 = vpop.f32.mrf.mxu1 }
 0x24d   : > { %1207 = vst.msk [vmem:[%s3898_s3] sm:$0xf] %vm1062_vm0, %v3903_v33  ;;  %v3915_v37 = vpack.c.bf16 %v931_v34, %v931_v34  ;;  %v923_v15 = vadd.f32 %v922_v57, %v3867_v38  ;;  %v820_v22 = vpop.f32.mrf.mxu0 }
 0x24e   : > { %1065 = vst.msk [vmem:[%s3871_s20 + $0x8] sm:$0xf] %vm1062_vm0, %v3909_v36  ;;  %v3921_v40 = vpack.c.bf16 %v819_v47, %v819_v47  ;;  %v821_v41 = vadd.f32 %v820_v22, %v3859_v1  ;;  %v3207_v42 = vpop.f32.mrf.mxu1  ;;  %1420 = vrot.lane.b32.xlu1 %v3122_v20, %s3505_s16  ;;  %1613 = vrot.lane.b32.xlu0 %v3121_v7, %s3506_s21 }
 0x24f   : > { %1210 = vst.msk [vmem:[%s3898_s3 + $0xc] sm:$0xf] %vm1062_vm0, %v3915_v37  ;;  %v3929_v43 = vpack.c.bf16 %v923_v15, %v923_v15  ;;  %v944_v58 = vadd.f32 %v3207_v42, %v3867_v38  ;;  %v822_v44 = vpop.f32.mrf.mxu0 }
 0x250   : > { %1137 = vst.msk [vmem:[%s3881_s24 + $0x8] sm:$0xf] %vm1062_vm0, %v3921_v40  ;;  %v3935_v45 = vpack.c.bf16 %v821_v41, %v821_v41  ;;  %v823_v3 = vadd.f32 %v822_v44, %v3864_v31  ;;  %v935_v49 = vpop.f32.mrf.mxu1 }
 0x251   : > { %1208 = vst.msk [vmem:[%s3898_s3 + $0x4] sm:$0xf] %vm1062_vm0, %v3929_v43  ;;  %v3941_v50 = vpack.c.bf16 %v944_v58, %v944_v58  ;;  %v936_v51 = vadd.f32 %v935_v49, %v3867_v38  ;;  %v826_v52 = vpop.f32.mrf.mxu0 }
 0x252   : > { %1066 = vst.msk [vmem:[%s3871_s20 + $0xc] sm:$0xf] %vm1062_vm0, %v3935_v45  ;;  %v3947_v53 = vpack.c.bf16 %v823_v3, %v823_v3  ;;  %v827_v4 = vadd.f32 %v826_v52, %v3859_v1  ;;  %v3208_v11 = vpop.f32.mrf.mxu1  ;;  %1615 = vrot.lane.b32.xlu1 %v3122_v20, %s3506_s21  ;;  %1357 = vrot.lane.b32.xlu0 %v3887_v26, %s3504_s11 }
 0x253   : > { %1213 = vst.msk [vmem:[%s3898_s3 + $0x18] sm:$0xf] %vm1062_vm0, %v3941_v50  ;;  %v3956_v30 = vpack.c.bf16 %v936_v51, %v936_v51  ;;  %v947_v54 = vadd.f32 %v3208_v11, %v3867_v38  ;;  %v828_v55 = vpop.f32.mrf.mxu0 }
 0x254   : > { %1138 = vst.msk [vmem:[%s3881_s24 + $0xc] sm:$0xf] %vm1062_vm0, %v3947_v53  ;;  %v3962_v23 = vpack.c.bf16 %v827_v4, %v827_v4  ;;  %v829_v56 = vadd.f32 %v828_v55, %v3864_v31  ;;  %v938_v59 = vpop.f32.mrf.mxu1 }
 0x255   : > { %1211 = vst.msk [vmem:[%s3898_s3 + $0x10] sm:$0xf] %vm1062_vm0, %v3956_v30  ;;  %v3968_v19 = vpack.c.bf16 %v947_v54, %v947_v54  ;;  %v939_v60 = vadd.f32 %v938_v59, %v3867_v38  ;;  %v830_v13 = vpop.f32.mrf.mxu0 }
 0x256   : > { %1067 = vst.msk [vmem:[%s3871_s20 + $0x10] sm:$0xf] %vm1062_vm0, %v3962_v23  ;;  %v3974_v61 = vpack.c.bf16 %v829_v56, %v829_v56  ;;  %v831_v62 = vadd.f32 %v830_v13, %v3859_v1  ;;  %v3211_v32 = vpop.f32.mrf.mxu1  ;;  %1552 = vrot.lane.b32.xlu0 %v3887_v26, %s3505_s16  ;;  %1359 = vrot.lane.b32.xlu1 %v3915_v37, %s3504_s11 }
 0x257   : > { %1214 = vst.msk [vmem:[%s3898_s3 + $0x1c] sm:$0xf] %vm1062_vm0, %v3968_v19  ;;  %v3984_v25 = vpack.c.bf16 %v939_v60, %v939_v60  ;;  %v960_v63 = vadd.f32 %v3211_v32, %v3867_v38  ;;  %v832_v14 = vpop.f32.mrf.mxu0 }
 0x258   : > { %1139 = vst.msk [vmem:[%s3881_s24 + $0x10] sm:$0xf] %vm1062_vm0, %v3974_v61  ;;  %v3990_v0 = vpack.c.bf16 %v831_v62, %v831_v62  ;;  %v833_v2 = vadd.f32 %v832_v14, %v3864_v31  ;;  %v951_v5 = vpop.f32.mrf.mxu1 }
 0x259   : > { %1212 = vst.msk [vmem:[%s3898_s3 + $0x14] sm:$0xf] %vm1062_vm0, %v3984_v25  ;;  %v3996_v48 = vpack.c.bf16 %v960_v63, %v960_v63  ;;  %v952_v6 = vadd.f32 %v951_v5, %v3867_v38  ;;  %v836_v7 = vpop.f32.mrf.mxu0 }
 0x25a   : > { %1068 = vst.msk [vmem:[%s3871_s20 + $0x14] sm:$0xf] %vm1062_vm0, %v3990_v0  ;;  %v4002_v8 = vpack.c.bf16 %v833_v2, %v833_v2  ;;  %v837_v9 = vadd.f32 %v836_v7, %v3859_v1  ;;  %v3212_v17 = vpop.f32.mrf.mxu1  ;;  %1747 = vrot.lane.b32.xlu0 %v3887_v26, %s3506_s21  ;;  %1554 = vrot.lane.b32.xlu1 %v3915_v37, %s3505_s16 }
 0x25b   : > { %1217 = vst.msk [vmem:[%s3898_s3 + $0x28] sm:$0xf] %vm1062_vm0, %v3996_v48  ;;  %v4012_v18 = vpack.c.bf16 %v952_v6, %v952_v6  ;;  %v963_v39 = vadd.f32 %v3212_v17, %v3867_v38  ;;  %v838_v10 = vpop.f32.mrf.mxu0 }
 0x25c   : > { %1140 = vst.msk [vmem:[%s3881_s24 + $0x14] sm:$0xf] %vm1062_vm0, %v4002_v8  ;;  %v4018_v20 = vpack.c.bf16 %v837_v9, %v837_v9  ;;  %v839_v21 = vadd.f32 %v838_v10, %v3864_v31  ;;  %v954_v24 = vpop.f32.mrf.mxu1 }
 0x25d   : > { %1215 = vst.msk [vmem:[%s3898_s3 + $0x20] sm:$0xf] %vm1062_vm0, %v4012_v18  ;;  %v4024_v26 = vpack.c.bf16 %v963_v39, %v963_v39  ;;  %v955_v46 = vadd.f32 %v954_v24, %v3867_v38  ;;  %v840_v27 = vpop.f32.mrf.mxu0 }
 0x25e   : > { %1069 = vst.msk [vmem:[%s3871_s20 + $0x18] sm:$0xf] %vm1062_vm0, %v4018_v20  ;;  %v4030_v29 = vpack.c.bf16 %v839_v21, %v839_v21  ;;  %v841_v12 = vadd.f32 %v840_v27, %v3859_v1  ;;  %v3215_v34 = vpop.f32.mrf.mxu1  ;;  %1288 = vrot.lane.b32.xlu0 %v3875_v16, %s3504_s11  ;;  %1749 = vrot.lane.b32.xlu1 %v3915_v37, %s3506_s21 }
 0x25f   : > { %1218 = vst.msk [vmem:[%s3898_s3 + $0x2c] sm:$0xf] %vm1062_vm0, %v4024_v26  ;;  %v4040_v35 = vpack.c.bf16 %v955_v46, %v955_v46  ;;  %v976_v47 = vadd.f32 %v3215_v34, %v3867_v38  ;;  %v842_v57 = vpop.f32.mrf.mxu0 }
 0x260   : > { %1141 = vst.msk [vmem:[%s3881_s24 + $0x18] sm:$0xf] %vm1062_vm0, %v4030_v29  ;;  %v4046_v15 = vpack.c.bf16 %v841_v12, %v841_v12  ;;  %v843_v22 = vadd.f32 %v842_v57, %v3864_v31  ;;  %v967_v41 = vpop.f32.mrf.mxu1 }
 0x261   : > { %1216 = vst.msk [vmem:[%s3898_s3 + $0x24] sm:$0xf] %vm1062_vm0, %v4040_v35  ;;  %v4052_v37 = vpack.c.bf16 %v976_v47, %v976_v47  ;;  %v968_v42 = vadd.f32 %v967_v41, %v3867_v38  ;;  %v846_v58 = vpop.f32.mrf.mxu0 }
 0x262   : > { %1070 = vst.msk [vmem:[%s3871_s20 + $0x1c] sm:$0xf] %vm1062_vm0, %v4046_v15  ;;  %v4058_v44 = vpack.c.bf16 %v843_v22, %v843_v22  ;;  %v847_v3 = vadd.f32 %v846_v58, %v3859_v1  ;;  %v3216_v49 = vpop.f32.mrf.mxu1  ;;  %1483 = vrot.lane.b32.xlu0 %v3875_v16, %s3505_s16  ;;  %1290 = vrot.lane.b32.xlu1 %v3892_v28, %s3504_s11 }
 0x263   : > { %1221 = vst.msk [vmem:[%s3898_s3 + $0x38] sm:$0xf] %vm1062_vm0, %v4052_v37  ;;  %v4068_v51 = vpack.c.bf16 %v968_v42, %v968_v42  ;;  %v979_v52 = vadd.f32 %v3216_v49, %v3867_v38  ;;  %v848_v4 = vpop.f32.mrf.mxu0 }
 0x264   : > { %1142 = vst.msk [vmem:[%s3881_s24 + $0x1c] sm:$0xf] %vm1062_vm0, %v4058_v44  ;;  %v4074_v11 = vpack.c.bf16 %v847_v3, %v847_v3  ;;  %v849_v54 = vadd.f32 %v848_v4, %v3864_v31  ;;  %v970_v55 = vpop.f32.mrf.mxu1 }
 0x265   : > { %1219 = vst.msk [vmem:[%s3898_s3 + $0x30] sm:$0xf] %vm1062_vm0, %v4068_v51  ;;  %v4080_v56 = vpack.c.bf16 %v979_v52, %v979_v52  ;;  %v971_v59 = vadd.f32 %v970_v55, %v3867_v38  ;;  %v850_v60 = vpop.f32.mrf.mxu0 }
 0x266   : > { %1071 = vst.msk [vmem:[%s3871_s20 + $0x20] sm:$0xf] %vm1062_vm0, %v4074_v11  ;;  %v4086_v13 = vpack.c.bf16 %v849_v54, %v849_v54  ;;  %v851_v62 = vadd.f32 %v850_v60, %v3859_v1  ;;  %1678 = vrot.lane.b32.xlu0 %v3875_v16, %s3506_s21  ;;  %1485 = vrot.lane.b32.xlu1 %v3892_v28, %s3505_s16 }
 0x267   : > { %1222 = vst.msk [vmem:[%s3898_s3 + $0x3c] sm:$0xf] %vm1062_vm0, %v4080_v56  ;;  %v4096_v32 = vpack.c.bf16 %v971_v59, %v971_v59  ;;  %v852_v38 = vpop.f32.mrf.mxu0 }
 0x268   : > { %1143 = vst.msk [vmem:[%s3881_s24 + $0x20] sm:$0xf] %vm1062_vm0, %v4086_v13  ;;  %v4101_v63 = vpack.c.bf16 %v851_v62, %v851_v62  ;;  %v853_v14 = vadd.f32 %v852_v38, %v3864_v31 }
 0x269   : > { %1220 = vst.msk [vmem:[%s3898_s3 + $0x34] sm:$0xf] %vm1062_vm0, %v4096_v32  ;;  %v856_v16 = vpop.f32.mrf.mxu0 }
 0x26a   : > { %1072 = vst.msk [vmem:[%s3871_s20 + $0x24] sm:$0xf] %vm1062_vm0, %v4101_v63  ;;  %v4110_v2 = vpack.c.bf16 %v853_v14, %v853_v14  ;;  %v857_v5 = vadd.f32 %v856_v16, %v3859_v1  ;;  %1680 = vrot.lane.b32.xlu1 %v3892_v28, %s3506_s21  ;;  %1353 = vrot.lane.b32.xlu0 %v3903_v33, %s3504_s11 }
 0x26b   : > { %v858_v6 = vpop.f32.mrf.mxu0 }
 0x26c   : > { %1144 = vst.msk [vmem:[%s3881_s24 + $0x24] sm:$0xf] %vm1062_vm0, %v4110_v2  ;;  %v4120_v7 = vpack.c.bf16 %v857_v5, %v857_v5  ;;  %v859_v9 = vadd.f32 %v858_v6, %v3864_v31 }
 0x26d   : > { %v860_v17 = vpop.f32.mrf.mxu0 }
 0x26e   : > { %1073 = vst.msk [vmem:[%s3871_s20 + $0x28] sm:$0xf] %vm1062_vm0, %v4120_v7  ;;  %v4126_v39 = vpack.c.bf16 %v859_v9, %v859_v9  ;;  %v861_v28 = vadd.f32 %v860_v17, %v3859_v1  ;;  %1355 = vrot.lane.b32.xlu1 %v3929_v43, %s3504_s11  ;;  %1548 = vrot.lane.b32.xlu0 %v3903_v33, %s3505_s16 }
 0x26f   : > { %v862_v10 = vpop.f32.mrf.mxu0 }
 0x270   : > { %1145 = vst.msk [vmem:[%s3881_s24 + $0x28] sm:$0xf] %vm1062_vm0, %v4126_v39  ;;  %v4136_v21 = vpack.c.bf16 %v861_v28, %v861_v28  ;;  %v863_v24 = vadd.f32 %v862_v10, %v3864_v31 }
 0x271   : > { %v866_v46 = vpop.f32.mrf.mxu0 }
 0x272   : > { %1074 = vst.msk [vmem:[%s3871_s20 + $0x2c] sm:$0xf] %vm1062_vm0, %v4136_v21  ;;  %v4142_v27 = vpack.c.bf16 %v863_v24, %v863_v24  ;;  %v867_v12 = vadd.f32 %v866_v46, %v3859_v1  ;;  %1550 = vrot.lane.b32.xlu1 %v3929_v43, %s3505_s16  ;;  %1743 = vrot.lane.b32.xlu0 %v3903_v33, %s3506_s21 }
 0x273   : > { %v868_v34 = vpop.f32.mrf.mxu0 }
 0x274   : > { %1146 = vst.msk [vmem:[%s3881_s24 + $0x2c] sm:$0xf] %vm1062_vm0, %v4142_v27  ;;  %v4152_v47 = vpack.c.bf16 %v867_v12, %v867_v12  ;;  %v869_v57 = vadd.f32 %v868_v34, %v3864_v31 }
 0x275   : > { %v870_v22 = vpop.f32.mrf.mxu0 }
 0x276   : > { %1075 = vst.msk [vmem:[%s3871_s20 + $0x30] sm:$0xf] %vm1062_vm0, %v4152_v47  ;;  %v4158_v41 = vpack.c.bf16 %v869_v57, %v869_v57  ;;  %v871_v42 = vadd.f32 %v870_v22, %v3859_v1  ;;  %1745 = vrot.lane.b32.xlu1 %v3929_v43, %s3506_s21  ;;  %1422 = vrot.lane.b32.xlu0 %v3909_v36, %s3505_s16 }
 0x277   : > { %v872_v33 = vpop.f32.mrf.mxu0 }
 0x278   : > { %1147 = vst.msk [vmem:[%s3881_s24 + $0x30] sm:$0xf] %vm1062_vm0, %v4158_v41  ;;  %v4168_v58 = vpack.c.bf16 %v871_v42, %v871_v42  ;;  %v873_v3 = vadd.f32 %v872_v33, %v3864_v31 }
 0x279   : > { %v876_v49 = vpop.f32.mrf.mxu0 }
 0x27a   : > { %1076 = vst.msk [vmem:[%s3871_s20 + $0x34] sm:$0xf] %vm1062_vm0, %v4168_v58  ;;  %v4174_v52 = vpack.c.bf16 %v873_v3, %v873_v3  ;;  %v877_v43 = vadd.f32 %v876_v49, %v3859_v1  ;;  %1617 = vrot.lane.b32.xlu0 %v3909_v36, %s3506_s21  ;;  %1227 = vrot.lane.b32.xlu1 %v3909_v36, %s3504_s11 }
 0x27b   : > { %v878_v4 = vpop.f32.mrf.mxu0 }
 0x27c   : > { %1148 = vst.msk [vmem:[%s3881_s24 + $0x34] sm:$0xf] %vm1062_vm0, %v4174_v52  ;;  %v4184_v54 = vpack.c.bf16 %v877_v43, %v877_v43  ;;  %v879_v55 = vadd.f32 %v878_v4, %v3864_v31 }
 0x27d   : > { %v880_v59 = vpop.f32.mrf.mxu0 }
 0x27e   : > { %1077 = vst.msk [vmem:[%s3871_s20 + $0x38] sm:$0xf] %vm1062_vm0, %v4184_v54  ;;  %v4190_v60 = vpack.c.bf16 %v879_v55, %v879_v55  ;;  %v881_v62 = vadd.f32 %v880_v59, %v3859_v1  ;;  %1229 = vrot.lane.b32.xlu1 %v3935_v45, %s3504_s11  ;;  %1365 = vrot.lane.b32.xlu0 %v3941_v50, %s3504_s11 }
 0x27f   : > { %v882_v36 = vpop.f32.mrf.mxu0 }
 0x280   : > { %1149 = vst.msk [vmem:[%s3881_s24 + $0x38] sm:$0xf] %vm1062_vm0, %v4190_v60  ;;  %v4200_v38 = vpack.c.bf16 %v881_v62, %v881_v62  ;;  %v883_v14 = vadd.f32 %v882_v36, %v3864_v31 }
 0x282   : > { %1078 = vst.msk [vmem:[%s3871_s20 + $0x3c] sm:$0xf] %vm1062_vm0, %v4200_v38  ;;  %v4206_v16 = vpack.c.bf16 %v883_v14, %v883_v14  ;;  %1424 = vrot.lane.b32.xlu1 %v3935_v45, %s3505_s16  ;;  %1560 = vrot.lane.b32.xlu0 %v3941_v50, %s3505_s16 }
 0x284   : > { %1150 = vst.msk [vmem:[%s3881_s24 + $0x3c] sm:$0xf] %vm1062_vm0, %v4206_v16 }
 0x286   : > { %1619 = vrot.lane.b32.xlu1 %v3935_v45, %s3506_s21  ;;  %1755 = vrot.lane.b32.xlu0 %v3941_v50, %s3506_s21 }
 0x28a   : > { %1292 = vrot.lane.b32.xlu0 %v3921_v40, %s3504_s11  ;;  %1367 = vrot.lane.b32.xlu1 %v3968_v19, %s3504_s11 }
 0x28e   : > { %1487 = vrot.lane.b32.xlu0 %v3921_v40, %s3505_s16  ;;  %1562 = vrot.lane.b32.xlu1 %v3968_v19, %s3505_s16 }
 0x292   : > { %1682 = vrot.lane.b32.xlu0 %v3921_v40, %s3506_s21  ;;  %1757 = vrot.lane.b32.xlu1 %v3968_v19, %s3506_s21 }
 0x296   : > { %1294 = vrot.lane.b32.xlu1 %v3947_v53, %s3504_s11  ;;  %1361 = vrot.lane.b32.xlu0 %v3956_v30, %s3504_s11 }
 0x29a   : > { %1489 = vrot.lane.b32.xlu1 %v3947_v53, %s3505_s16  ;;  %1556 = vrot.lane.b32.xlu0 %v3956_v30, %s3505_s16 }
 0x29e   : > { %1684 = vrot.lane.b32.xlu1 %v3947_v53, %s3506_s21  ;;  %1751 = vrot.lane.b32.xlu0 %v3956_v30, %s3506_s21 }
 0x2a2   : > { %1363 = vrot.lane.b32.xlu1 %v3984_v25, %s3504_s11  ;;  %1231 = vrot.lane.b32.xlu0 %v3962_v23, %s3504_s11 }
 0x2a6   : > { %1558 = vrot.lane.b32.xlu1 %v3984_v25, %s3505_s16  ;;  %1426 = vrot.lane.b32.xlu0 %v3962_v23, %s3505_s16 }
 0x2aa   : > { %1753 = vrot.lane.b32.xlu1 %v3984_v25, %s3506_s21  ;;  %1621 = vrot.lane.b32.xlu0 %v3962_v23, %s3506_s21 }
 0x2ae   : > { %1233 = vrot.lane.b32.xlu1 %v3990_v0, %s3504_s11  ;;  %1373 = vrot.lane.b32.xlu0 %v3996_v48, %s3504_s11 }
 0x2b2   : > { %1428 = vrot.lane.b32.xlu1 %v3990_v0, %s3505_s16  ;;  %1568 = vrot.lane.b32.xlu0 %v3996_v48, %s3505_s16 }
 0x2b6   : > { %1623 = vrot.lane.b32.xlu1 %v3990_v0, %s3506_s21  ;;  %1763 = vrot.lane.b32.xlu0 %v3996_v48, %s3506_s21 }
 0x2b8   : > { %v1224_v1 = vpop.permute.xlu0 %1223 }
 0x2b9   : > { %2963 = vst.msk [vmem:[%s3871_s20 + $0x40] sm:$0xf] %vm1062_vm0, %v1224_v1 }
 0x2ba   : > { %1296 = vrot.lane.b32.xlu0 %v3974_v61, %s3504_s11  ;;  %1375 = vrot.lane.b32.xlu1 %v4024_v26, %s3504_s11 }
 0x2bc   : > { %v1226_v31 = vpop.permute.xlu1 %1225  ;;  %v1419_v40 = vpop.permute.xlu0 %1418 }
 0x2bd   : > { %2964 = vst.msk [vmem:[%s3871_s20 + $0x44] sm:$0xf] %vm1062_vm0, %v1226_v31  ;;  %3011 = vst.msk [vmem:[%s3871_s20 + $0x80] sm:$0xf] %vm1062_vm0, %v1419_v40 }
 0x2be   : > { %1491 = vrot.lane.b32.xlu0 %v3974_v61, %s3505_s16  ;;  %1570 = vrot.lane.b32.xlu1 %v4024_v26, %s3505_s16 }
 0x2c0   : > { %v1421_v45 = vpop.permute.xlu1 %1420  ;;  %v1614_v50 = vpop.permute.xlu0 %1613 }
 0x2c1   : > { %3012 = vst.msk [vmem:[%s3871_s20 + $0x84] sm:$0xf] %vm1062_vm0, %v1421_v45  ;;  %3059 = vst.msk [vmem:[%s3871_s20 + $0xc0] sm:$0xf] %vm1062_vm0, %v1614_v50 }
 0x2c2   : > { %1686 = vrot.lane.b32.xlu0 %v3974_v61, %s3506_s21  ;;  %1765 = vrot.lane.b32.xlu1 %v4024_v26, %s3506_s21 }
 0x2c4   : > { %v1616_v53 = vpop.permute.xlu1 %1615  ;;  %v1358_v30 = vpop.permute.xlu0 %1357 }
 0x2c5   : > { %3060 = vst.msk [vmem:[%s3871_s20 + $0xc4] sm:$0xf] %vm1062_vm0, %v1616_v53  ;;  %2997 = vst.msk [vmem:[%s3898_s3 + $0x48] sm:$0xf] %vm1062_vm0, %v1358_v30 }
 0x2c6   : > { %1298 = vrot.lane.b32.xlu1 %v4002_v8, %s3504_s11  ;;  %1369 = vrot.lane.b32.xlu0 %v4012_v18, %s3504_s11 }
 0x2c8   : > { %v1360_v23 = vpop.permute.xlu1 %1359  ;;  %v1553_v19 = vpop.permute.xlu0 %1552 }
 0x2c9   : > { %2998 = vst.msk [vmem:[%s3898_s3 + $0x4c] sm:$0xf] %vm1062_vm0, %v1360_v23  ;;  %3045 = vst.msk [vmem:[%s3898_s3 + $0x88] sm:$0xf] %vm1062_vm0, %v1553_v19 }
 0x2ca   : > { %1493 = vrot.lane.b32.xlu1 %v4002_v8, %s3505_s16  ;;  %1564 = vrot.lane.b32.xlu0 %v4012_v18, %s3505_s16 }
 0x2cc   : > { %v1555_v61 = vpop.permute.xlu1 %1554  ;;  %v1748_v25 = vpop.permute.xlu0 %1747 }
 0x2cd   : > { %3046 = vst.msk [vmem:[%s3898_s3 + $0x8c] sm:$0xf] %vm1062_vm0, %v1555_v61  ;;  %3093 = vst.msk [vmem:[%s3898_s3 + $0xc8] sm:$0xf] %vm1062_vm0, %v1748_v25 }
 0x2ce   : > { %1688 = vrot.lane.b32.xlu1 %v4002_v8, %s3506_s21  ;;  %1759 = vrot.lane.b32.xlu0 %v4012_v18, %s3506_s21 }
 0x2d0   : > { %v1750_v0 = vpop.permute.xlu1 %1749  ;;  %v1289_v48 = vpop.permute.xlu0 %1288 }
 0x2d1   : > { %3094 = vst.msk [vmem:[%s3898_s3 + $0xcc] sm:$0xf] %vm1062_vm0, %v1750_v0  ;;  %2979 = vst.msk [vmem:[%s3881_s24 + $0x40] sm:$0xf] %vm1062_vm0, %v1289_v48 }
 0x2d2   : > { %1371 = vrot.lane.b32.xlu1 %v4040_v35, %s3504_s11  ;;  %1235 = vrot.lane.b32.xlu0 %v4018_v20, %s3504_s11 }
 0x2d4   : > { %v1291_v8 = vpop.permute.xlu1 %1290  ;;  %v1484_v26 = vpop.permute.xlu0 %1483 }
 0x2d5   : > { %2980 = vst.msk [vmem:[%s3881_s24 + $0x44] sm:$0xf] %vm1062_vm0, %v1291_v8  ;;  %3027 = vst.msk [vmem:[%s3881_s24 + $0x80] sm:$0xf] %vm1062_vm0, %v1484_v26 }
 0x2d6   : > { %1566 = vrot.lane.b32.xlu1 %v4040_v35, %s3505_s16  ;;  %1430 = vrot.lane.b32.xlu0 %v4018_v20, %s3505_s16 }
 0x2d8   : > { %v1486_v18 = vpop.permute.xlu1 %1485  ;;  %v1679_v5 = vpop.permute.xlu0 %1678 }
 0x2d9   : > { %3028 = vst.msk [vmem:[%s3881_s24 + $0x84] sm:$0xf] %vm1062_vm0, %v1486_v18  ;;  %3075 = vst.msk [vmem:[%s3881_s24 + $0xc0] sm:$0xf] %vm1062_vm0, %v1679_v5 }
 0x2da   : > { %1761 = vrot.lane.b32.xlu1 %v4040_v35, %s3506_s21  ;;  %1625 = vrot.lane.b32.xlu0 %v4018_v20, %s3506_s21 }
 0x2dc   : > { %v1681_v6 = vpop.permute.xlu1 %1680  ;;  %v1354_v9 = vpop.permute.xlu0 %1353 }
 0x2dd   : > { %3076 = vst.msk [vmem:[%s3881_s24 + $0xc4] sm:$0xf] %vm1062_vm0, %v1681_v6  ;;  %2995 = vst.msk [vmem:[%s3898_s3 + $0x40] sm:$0xf] %vm1062_vm0, %v1354_v9 }
 0x2de   : > { %1237 = vrot.lane.b32.xlu1 %v4046_v15, %s3504_s11  ;;  %1381 = vrot.lane.b32.xlu0 %v4052_v37, %s3504_s11 }
 0x2e0   : > { %v1356_v35 = vpop.permute.xlu1 %1355  ;;  %v1549_v17 = vpop.permute.xlu0 %1548 }
 0x2e1   : > { %2996 = vst.msk [vmem:[%s3898_s3 + $0x44] sm:$0xf] %vm1062_vm0, %v1356_v35  ;;  %3043 = vst.msk [vmem:[%s3898_s3 + $0x80] sm:$0xf] %vm1062_vm0, %v1549_v17 }
 0x2e2   : > { %1432 = vrot.lane.b32.xlu1 %v4046_v15, %s3505_s16  ;;  %1576 = vrot.lane.b32.xlu0 %v4052_v37, %s3505_s16 }
 0x2e4   : > { %v1551_v20 = vpop.permute.xlu1 %1550  ;;  %v1744_v28 = vpop.permute.xlu0 %1743 }
 0x2e5   : > { %3044 = vst.msk [vmem:[%s3898_s3 + $0x84] sm:$0xf] %vm1062_vm0, %v1551_v20  ;;  %3091 = vst.msk [vmem:[%s3898_s3 + $0xc0] sm:$0xf] %vm1062_vm0, %v1744_v28 }
 0x2e6   : > { %1627 = vrot.lane.b32.xlu1 %v4046_v15, %s3506_s21  ;;  %1300 = vrot.lane.b32.xlu0 %v4030_v29, %s3504_s11 }
 0x2e8   : > { %v1746_v10 = vpop.permute.xlu1 %1745  ;;  %v1423_v24 = vpop.permute.xlu0 %1422 }
 0x2e9   : > { %3092 = vst.msk [vmem:[%s3898_s3 + $0xc4] sm:$0xf] %vm1062_vm0, %v1746_v10  ;;  %3013 = vst.msk [vmem:[%s3871_s20 + $0x88] sm:$0xf] %vm1062_vm0, %v1423_v24 }
 0x2ea   : > { %1495 = vrot.lane.b32.xlu0 %v4030_v29, %s3505_s16  ;;  %1383 = vrot.lane.b32.xlu1 %v4080_v56, %s3504_s11 }
 0x2ec   : > { %v1228_v15 = vpop.permute.xlu1 %1227  ;;  %v1618_v46 = vpop.permute.xlu0 %1617 }
 0x2ed   : > { %2965 = vst.msk [vmem:[%s3871_s20 + $0x48] sm:$0xf] %vm1062_vm0, %v1228_v15  ;;  %3061 = vst.msk [vmem:[%s3871_s20 + $0xc8] sm:$0xf] %vm1062_vm0, %v1618_v46 }
 0x2ee   : > { %1690 = vrot.lane.b32.xlu0 %v4030_v29, %s3506_s21  ;;  %1578 = vrot.lane.b32.xlu1 %v4080_v56, %s3505_s16 }
 0x2f0   : > { %v1230_v12 = vpop.permute.xlu1 %1229  ;;  %v1366_v34 = vpop.permute.xlu0 %1365 }
 0x2f1   : > { %2966 = vst.msk [vmem:[%s3871_s20 + $0x4c] sm:$0xf] %vm1062_vm0, %v1230_v12  ;;  %3001 = vst.msk [vmem:[%s3898_s3 + $0x58] sm:$0xf] %vm1062_vm0, %v1366_v34 }
 0x2f2   : > { %1302 = vrot.lane.b32.xlu1 %v4058_v44, %s3504_s11  ;;  %1377 = vrot.lane.b32.xlu0 %v4068_v51, %s3504_s11 }
 0x2f4   : > { %v1425_v29 = vpop.permute.xlu1 %1424  ;;  %v1561_v57 = vpop.permute.xlu0 %1560 }
 0x2f5   : > { %3014 = vst.msk [vmem:[%s3871_s20 + $0x8c] sm:$0xf] %vm1062_vm0, %v1425_v29  ;;  %3049 = vst.msk [vmem:[%s3898_s3 + $0x98] sm:$0xf] %vm1062_vm0, %v1561_v57 }
 0x2f6   : > { %1497 = vrot.lane.b32.xlu1 %v4058_v44, %s3505_s16  ;;  %1572 = vrot.lane.b32.xlu0 %v4068_v51, %s3505_s16 }
 0x2f8   : > { %v1620_v22 = vpop.permute.xlu1 %1619  ;;  %v1756_v42 = vpop.permute.xlu0 %1755 }
 0x2f9   : > { %3062 = vst.msk [vmem:[%s3871_s20 + $0xcc] sm:$0xf] %vm1062_vm0, %v1620_v22  ;;  %3097 = vst.msk [vmem:[%s3898_s3 + $0xd8] sm:$0xf] %vm1062_vm0, %v1756_v42 }
 0x2fa   : > { %1692 = vrot.lane.b32.xlu1 %v4058_v44, %s3506_s21  ;;  %1767 = vrot.lane.b32.xlu0 %v4068_v51, %s3506_s21 }
 0x2fc   : > { %v1368_v33 = vpop.permute.xlu1 %1367  ;;  %v1293_v3 = vpop.permute.xlu0 %1292 }
 0x2fd   : > { %3002 = vst.msk [vmem:[%s3898_s3 + $0x5c] sm:$0xf] %vm1062_vm0, %v1368_v33  ;;  %2981 = vst.msk [vmem:[%s3881_s24 + $0x48] sm:$0xf] %vm1062_vm0, %v1293_v3 }
 0x2fe   : > { %1379 = vrot.lane.b32.xlu1 %v4096_v32, %s3504_s11  ;;  %1239 = vrot.lane.b32.xlu0 %v4074_v11, %s3504_s11 }
 0x300   : > { %v1563_v44 = vpop.permute.xlu1 %1562  ;;  %v1488_v49 = vpop.permute.xlu0 %1487 }
 0x301   : > { %3050 = vst.msk [vmem:[%s3898_s3 + $0x9c] sm:$0xf] %vm1062_vm0, %v1563_v44  ;;  %3029 = vst.msk [vmem:[%s3881_s24 + $0x88] sm:$0xf] %vm1062_vm0, %v1488_v49 }
 0x302   : > { %1574 = vrot.lane.b32.xlu1 %v4096_v32, %s3505_s16  ;;  %1434 = vrot.lane.b32.xlu0 %v4074_v11, %s3505_s16 }
 0x304   : > { %v1758_v51 = vpop.permute.xlu1 %1757  ;;  %v1683_v43 = vpop.permute.xlu0 %1682 }
 0x305   : > { %3098 = vst.msk [vmem:[%s3898_s3 + $0xdc] sm:$0xf] %vm1062_vm0, %v1758_v51  ;;  %3077 = vst.msk [vmem:[%s3881_s24 + $0xc8] sm:$0xf] %vm1062_vm0, %v1683_v43 }
 0x306   : > { %1769 = vrot.lane.b32.xlu1 %v4096_v32, %s3506_s21  ;;  %1629 = vrot.lane.b32.xlu0 %v4074_v11, %s3506_s21 }
 0x308   : > { %v1295_v4 = vpop.permute.xlu1 %1294  ;;  %v1362_v55 = vpop.permute.xlu0 %1361 }
 0x309   : > { %2982 = vst.msk [vmem:[%s3881_s24 + $0x4c] sm:$0xf] %vm1062_vm0, %v1295_v4  ;;  %2999 = vst.msk [vmem:[%s3898_s3 + $0x50] sm:$0xf] %vm1062_vm0, %v1362_v55 }
 0x30a   : > { %1241 = vrot.lane.b32.xlu1 %v4101_v63, %s3504_s11  ;;  %1304 = vrot.lane.b32.xlu0 %v4086_v13, %s3504_s11 }
 0x30c   : > { %v1490_v32 = vpop.permute.xlu1 %1489  ;;  %v1557_v59 = vpop.permute.xlu0 %1556 }
 0x30d   : > { %3030 = vst.msk [vmem:[%s3881_s24 + $0x8c] sm:$0xf] %vm1062_vm0, %v1490_v32  ;;  %3047 = vst.msk [vmem:[%s3898_s3 + $0x90] sm:$0xf] %vm1062_vm0, %v1557_v59 }
 0x30e   : > { %1436 = vrot.lane.b32.xlu1 %v4101_v63, %s3505_s16  ;;  %1499 = vrot.lane.b32.xlu0 %v4086_v13, %s3505_s16 }
 0x310   : > { %v1685_v11 = vpop.permute.xlu1 %1684  ;;  %v1752_v62 = vpop.permute.xlu0 %1751 }
 0x311   : > { %3078 = vst.msk [vmem:[%s3881_s24 + $0xcc] sm:$0xf] %vm1062_vm0, %v1685_v11  ;;  %3095 = vst.msk [vmem:[%s3898_s3 + $0xd0] sm:$0xf] %vm1062_vm0, %v1752_v62 }
 0x312   : > { %1631 = vrot.lane.b32.xlu1 %v4101_v63, %s3506_s21  ;;  %1694 = vrot.lane.b32.xlu0 %v4086_v13, %s3506_s21 }
 0x314   : > { %v1364_v36 = vpop.permute.xlu1 %1363  ;;  %v1232_v14 = vpop.permute.xlu0 %1231 }
 0x315   : > { %3000 = vst.msk [vmem:[%s3898_s3 + $0x54] sm:$0xf] %vm1062_vm0, %v1364_v36  ;;  %2967 = vst.msk [vmem:[%s3871_s20 + $0x50] sm:$0xf] %vm1062_vm0, %v1232_v14 }
 0x316   : > { %1306 = vrot.lane.b32.xlu1 %v4110_v2, %s3504_s11  ;;  %1243 = vrot.lane.b32.xlu0 %v4120_v7, %s3504_s11 }
 0x318   : > { %v1559_v63 = vpop.permute.xlu1 %1558  ;;  %v1427_v1 = vpop.permute.xlu0 %1426 }
 0x319   : > { %3048 = vst.msk [vmem:[%s3898_s3 + $0x94] sm:$0xf] %vm1062_vm0, %v1559_v63  ;;  %3015 = vst.msk [vmem:[%s3871_s20 + $0x90] sm:$0xf] %vm1062_vm0, %v1427_v1 }
 0x31a   : > { %1501 = vrot.lane.b32.xlu1 %v4110_v2, %s3505_s16  ;;  %1438 = vrot.lane.b32.xlu0 %v4120_v7, %s3505_s16 }
 0x31c   : > { %v1754_v13 = vpop.permute.xlu1 %1753  ;;  %v1622_v31 = vpop.permute.xlu0 %1621 }
 0x31d   : > { %3096 = vst.msk [vmem:[%s3898_s3 + $0xd4] sm:$0xf] %vm1062_vm0, %v1754_v13  ;;  %3063 = vst.msk [vmem:[%s3871_s20 + $0xd0] sm:$0xf] %vm1062_vm0, %v1622_v31 }
 0x31e   : > { %1696 = vrot.lane.b32.xlu1 %v4110_v2, %s3506_s21  ;;  %1633 = vrot.lane.b32.xlu0 %v4120_v7, %s3506_s21 }
 0x320   : > { %v1234_v40 = vpop.permute.xlu1 %1233  ;;  %v1374_v45 = vpop.permute.xlu0 %1373 }
 0x321   : > { %2968 = vst.msk [vmem:[%s3871_s20 + $0x54] sm:$0xf] %vm1062_vm0, %v1234_v40  ;;  %3005 = vst.msk [vmem:[%s3898_s3 + $0x68] sm:$0xf] %vm1062_vm0, %v1374_v45 }
 0x322   : > { %1245 = vrot.lane.b32.xlu1 %v4136_v21, %s3504_s11  ;;  %1308 = vrot.lane.b32.xlu0 %v4126_v39, %s3504_s11 }
 0x324   : > { %v1429_v2 = vpop.permute.xlu1 %1428  ;;  %v1569_v50 = vpop.permute.xlu0 %1568 }
 0x325   : > { %3016 = vst.msk [vmem:[%s3871_s20 + $0x94] sm:$0xf] %vm1062_vm0, %v1429_v2  ;;  %3053 = vst.msk [vmem:[%s3898_s3 + $0xa8] sm:$0xf] %vm1062_vm0, %v1569_v50 }
 0x326   : > { %1440 = vrot.lane.b32.xlu1 %v4136_v21, %s3505_s16  ;;  %1503 = vrot.lane.b32.xlu0 %v4126_v39, %s3505_s16 }
 0x328   : > { %v1624_v7 = vpop.permute.xlu1 %1623  ;;  %v1764_v53 = vpop.permute.xlu0 %1763 }
 0x329   : > { %3064 = vst.msk [vmem:[%s3871_s20 + $0xd4] sm:$0xf] %vm1062_vm0, %v1624_v7  ;;  %3101 = vst.msk [vmem:[%s3898_s3 + $0xe8] sm:$0xf] %vm1062_vm0, %v1764_v53 }
 0x32a   : > { %1635 = vrot.lane.b32.xlu1 %v4136_v21, %s3506_s21  ;;  %1698 = vrot.lane.b32.xlu0 %v4126_v39, %s3506_s21 }
 0x32c   : > { %v1376_v30 = vpop.permute.xlu1 %1375  ;;  %v1297_v23 = vpop.permute.xlu0 %1296 }
 0x32d   : > { %3006 = vst.msk [vmem:[%s3898_s3 + $0x6c] sm:$0xf] %vm1062_vm0, %v1376_v30  ;;  %2983 = vst.msk [vmem:[%s3881_s24 + $0x50] sm:$0xf] %vm1062_vm0, %v1297_v23 }
 0x32e   : > { %1310 = vrot.lane.b32.xlu1 %v4142_v27, %s3504_s11  ;;  %1247 = vrot.lane.b32.xlu0 %v4152_v47, %s3504_s11 }
 0x330   : > { %v1571_v21 = vpop.permute.xlu1 %1570  ;;  %v1492_v19 = vpop.permute.xlu0 %1491 }
 0x331   : > { %3054 = vst.msk [vmem:[%s3898_s3 + $0xac] sm:$0xf] %vm1062_vm0, %v1571_v21  ;;  %3031 = vst.msk [vmem:[%s3881_s24 + $0x90] sm:$0xf] %vm1062_vm0, %v1492_v19 }
 0x332   : > { %1505 = vrot.lane.b32.xlu1 %v4142_v27, %s3505_s16  ;;  %1442 = vrot.lane.b32.xlu0 %v4152_v47, %s3505_s16 }
 0x334   : > { %v1766_v39 = vpop.permute.xlu1 %1765  ;;  %v1687_v61 = vpop.permute.xlu0 %1686 }
 0x335   : > { %3102 = vst.msk [vmem:[%s3898_s3 + $0xec] sm:$0xf] %vm1062_vm0, %v1766_v39  ;;  %3079 = vst.msk [vmem:[%s3881_s24 + $0xd0] sm:$0xf] %vm1062_vm0, %v1687_v61 }
 0x336   : > { %1700 = vrot.lane.b32.xlu1 %v4142_v27, %s3506_s21  ;;  %1637 = vrot.lane.b32.xlu0 %v4152_v47, %s3506_s21 }
 0x338   : > { %v1299_v25 = vpop.permute.xlu1 %1298  ;;  %v1370_v0 = vpop.permute.xlu0 %1369 }
 0x339   : > { %2984 = vst.msk [vmem:[%s3881_s24 + $0x54] sm:$0xf] %vm1062_vm0, %v1299_v25  ;;  %3003 = vst.msk [vmem:[%s3898_s3 + $0x60] sm:$0xf] %vm1062_vm0, %v1370_v0 }
 0x33a   : > { %1249 = vrot.lane.b32.xlu1 %v4168_v58, %s3504_s11  ;;  %1312 = vrot.lane.b32.xlu0 %v4158_v41, %s3504_s11 }
 0x33c   : > { %v1494_v27 = vpop.permute.xlu1 %1493  ;;  %v1565_v48 = vpop.permute.xlu0 %1564 }
 0x33d   : > { %3032 = vst.msk [vmem:[%s3881_s24 + $0x94] sm:$0xf] %vm1062_vm0, %v1494_v27  ;;  %3051 = vst.msk [vmem:[%s3898_s3 + $0xa0] sm:$0xf] %vm1062_vm0, %v1565_v48 }
 0x33e   : > { %1444 = vrot.lane.b32.xlu1 %v4168_v58, %s3505_s16  ;;  %1507 = vrot.lane.b32.xlu0 %v4158_v41, %s3505_s16 }
 0x340   : > { %v1689_v47 = vpop.permute.xlu1 %1688  ;;  %v1760_v8 = vpop.permute.xlu0 %1759 }
 0x341   : > { %3080 = vst.msk [vmem:[%s3881_s24 + $0xd4] sm:$0xf] %vm1062_vm0, %v1689_v47  ;;  %3099 = vst.msk [vmem:[%s3898_s3 + $0xe0] sm:$0xf] %vm1062_vm0, %v1760_v8 }
 0x342   : > { %1639 = vrot.lane.b32.xlu1 %v4168_v58, %s3506_s21  ;;  %1702 = vrot.lane.b32.xlu0 %v4158_v41, %s3506_s21 }
 0x344   : > { %v1372_v26 = vpop.permute.xlu1 %1371  ;;  %v1236_v18 = vpop.permute.xlu0 %1235 }
 0x345   : > { %3004 = vst.msk [vmem:[%s3898_s3 + $0x64] sm:$0xf] %vm1062_vm0, %v1372_v26  ;;  %2969 = vst.msk [vmem:[%s3871_s20 + $0x58] sm:$0xf] %vm1062_vm0, %v1236_v18 }
 0x346   : > { %1314 = vrot.lane.b32.xlu1 %v4174_v52, %s3504_s11  ;;  %1251 = vrot.lane.b32.xlu0 %v4184_v54, %s3504_s11 }
 0x348   : > { %v1567_v58 = vpop.permute.xlu1 %1566  ;;  %v1431_v5 = vpop.permute.xlu0 %1430 }
 0x349   : > { %3052 = vst.msk [vmem:[%s3898_s3 + $0xa4] sm:$0xf] %vm1062_vm0, %v1567_v58  ;;  %3017 = vst.msk [vmem:[%s3871_s20 + $0x98] sm:$0xf] %vm1062_vm0, %v1431_v5 }
 0x34a   : > { %1509 = vrot.lane.b32.xlu1 %v4174_v52, %s3505_s16  ;;  %1446 = vrot.lane.b32.xlu0 %v4184_v54, %s3505_s16 }
 0x34c   : > { %v1762_v41 = vpop.permute.xlu1 %1761  ;;  %v1626_v6 = vpop.permute.xlu0 %1625 }
 0x34d   : > { %3100 = vst.msk [vmem:[%s3898_s3 + $0xe4] sm:$0xf] %vm1062_vm0, %v1762_v41  ;;  %3065 = vst.msk [vmem:[%s3871_s20 + $0xd8] sm:$0xf] %vm1062_vm0, %v1626_v6 }
 0x34e   : > { %1704 = vrot.lane.b32.xlu1 %v4174_v52, %s3506_s21  ;;  %1641 = vrot.lane.b32.xlu0 %v4184_v54, %s3506_s21 }
 0x350   : > { %v1238_v9 = vpop.permute.xlu1 %1237  ;;  %v1382_v35 = vpop.permute.xlu0 %1381 }
 0x351   : > { %2970 = vst.msk [vmem:[%s3871_s20 + $0x5c] sm:$0xf] %vm1062_vm0, %v1238_v9  ;;  %3009 = vst.msk [vmem:[%s3898_s3 + $0x78] sm:$0xf] %vm1062_vm0, %v1382_v35 }
 0x352   : > { %1253 = vrot.lane.b32.xlu1 %v4200_v38, %s3504_s11  ;;  %1316 = vrot.lane.b32.xlu0 %v4190_v60, %s3504_s11 }
 0x354   : > { %v1433_v52 = vpop.permute.xlu1 %1432  ;;  %v1577_v17 = vpop.permute.xlu0 %1576 }
 0x355   : > { %3018 = vst.msk [vmem:[%s3871_s20 + $0x9c] sm:$0xf] %vm1062_vm0, %v1433_v52  ;;  %3057 = vst.msk [vmem:[%s3898_s3 + $0xb8] sm:$0xf] %vm1062_vm0, %v1577_v17 }
 0x356   : > { %1448 = vrot.lane.b32.xlu1 %v4200_v38, %s3505_s16  ;;  %1511 = vrot.lane.b32.xlu0 %v4190_v60, %s3505_s16 }
 0x358   : > { %v1628_v54 = vpop.permute.xlu1 %1627  ;;  %v1301_v20 = vpop.permute.xlu0 %1300 }
 0x359   : > { %3066 = vst.msk [vmem:[%s3871_s20 + $0xdc] sm:$0xf] %vm1062_vm0, %v1628_v54  ;;  %2985 = vst.msk [vmem:[%s3881_s24 + $0x58] sm:$0xf] %vm1062_vm0, %v1301_v20  ;;  %v1844_v20 = vld [vmem:[%s3871_s20] sm:$0xff] (%p3631_p10)  }
 0x35a   : > { %1643 = vrot.lane.b32.xlu1 %v4200_v38, %s3506_s21  ;;  %1706 = vrot.lane.b32.xlu0 %v4190_v60, %s3506_s21  ;;  %1845 = vst [vmem:[%s4745_s13] sm:$0xff] (%p3631_p10), %v1844_v20  }
 0x35c   : > { %v1384_v28 = vpop.permute.xlu1 %1383  ;;  %v1496_v10 = vpop.permute.xlu0 %1495 }
 0x35d   : > { %3010 = vst.msk [vmem:[%s3898_s3 + $0x7c] sm:$0xf] %vm1062_vm0, %v1384_v28  ;;  %3033 = vst.msk [vmem:[%s3881_s24 + $0x98] sm:$0xf] %vm1062_vm0, %v1496_v10  ;;  %v1848_v28 = vld [vmem:[%s3871_s20 + $0x8] sm:$0xff] (%p3631_p10)   ;;  %v1852_v10 = vld [vmem:[%s3871_s20 + $0x10] sm:$0xff] (%p3631_p10)  }
 0x35e   : > { %1318 = vrot.lane.b32.xlu1 %v4206_v16, %s3504_s11  ;;  %1771 = vrot.lane.b32.xlu0 %v4052_v37, %s3506_s21  ;;  %1849 = vst [vmem:[%s4745_s13 + $0x8] sm:$0xff] (%p3631_p10), %v1848_v28   ;;  %1853 = vst [vmem:[%s4745_s13 + $0x10] sm:$0xff] (%p3631_p10), %v1852_v10  }
 0x360   : > { %v1579_v24 = vpop.permute.xlu1 %1578  ;;  %v1691_v38 = vpop.permute.xlu0 %1690 }
 0x361   : > { %3058 = vst.msk [vmem:[%s3898_s3 + $0xbc] sm:$0xf] %vm1062_vm0, %v1579_v24  ;;  %3081 = vst.msk [vmem:[%s3881_s24 + $0xd8] sm:$0xf] %vm1062_vm0, %v1691_v38  ;;  %v1856_v24 = vld [vmem:[%s3871_s20 + $0x18] sm:$0xff] (%p3631_p10)   ;;  %v1860_v38 = vld [vmem:[%s3871_s20 + $0x20] sm:$0xff] (%p3631_p10)  }
 0x362   : > { %1513 = vrot.lane.b32.xlu1 %v4206_v16, %s3505_s16  ;;  %1857 = vst [vmem:[%s4745_s13 + $0x18] sm:$0xff] (%p3631_p10), %v1856_v24   ;;  %1861 = vst [vmem:[%s4745_s13 + $0x20] sm:$0xff] (%p3631_p10), %v1860_v38  }
 0x364   : > { %v1303_v60 = vpop.permute.xlu1 %1302  ;;  %v1378_v15 = vpop.permute.xlu0 %1377 }
 0x365   : > { %2986 = vst.msk [vmem:[%s3881_s24 + $0x5c] sm:$0xf] %vm1062_vm0, %v1303_v60  ;;  %3007 = vst.msk [vmem:[%s3898_s3 + $0x70] sm:$0xf] %vm1062_vm0, %v1378_v15  ;;  %v1864_v60 = vld [vmem:[%s3871_s20 + $0x28] sm:$0xff] (%p3631_p10)   ;;  %v1868_v15 = vld [vmem:[%s3871_s20 + $0x30] sm:$0xff] (%p3631_p10)  }
 0x366   : > { %1708 = vrot.lane.b32.xlu1 %v4206_v16, %s3506_s21  ;;  %1865 = vst [vmem:[%s4745_s13 + $0x28] sm:$0xff] (%p3631_p10), %v1864_v60   ;;  %1869 = vst [vmem:[%s4745_s13 + $0x30] sm:$0xff] (%p3631_p10), %v1868_v15  }
 0x368   : > { %v1498_v37 = vpop.permute.xlu1 %1497  ;;  %v1573_v46 = vpop.permute.xlu0 %1572 }
 0x369   : > { %3034 = vst.msk [vmem:[%s3881_s24 + $0x9c] sm:$0xf] %vm1062_vm0, %v1498_v37  ;;  %3055 = vst.msk [vmem:[%s3898_s3 + $0xb0] sm:$0xf] %vm1062_vm0, %v1573_v46  ;;  %v1872_v37 = vld [vmem:[%s3871_s20 + $0x38] sm:$0xff] (%p3631_p10)   ;;  %v1876_v46 = vld [vmem:[%s3871_s20 + $0x40] sm:$0xff] (%p3631_p10)  }
 0x36a   : > { %1773 = vrot.lane.b32.xlu1 %v4080_v56, %s3506_s21  ;;  %1873 = vst [vmem:[%s4745_s13 + $0x38] sm:$0xff] (%p3631_p10), %v1872_v37   ;;  %1877 = vst [vmem:[%s4745_s13 + $0x100] sm:$0xff] (%p3631_p10), %v1876_v46  }
 0x36c   : > { %v1693_v12 = vpop.permute.xlu1 %1692  ;;  %v1768_v34 = vpop.permute.xlu0 %1767 }
 0x36d   : > { %3082 = vst.msk [vmem:[%s3881_s24 + $0xdc] sm:$0xf] %vm1062_vm0, %v1693_v12  ;;  %3103 = vst.msk [vmem:[%s3898_s3 + $0xf0] sm:$0xf] %vm1062_vm0, %v1768_v34  ;;  %v1880_v12 = vld [vmem:[%s3871_s20 + $0x48] sm:$0xff] (%p3631_p10)   ;;  %v1884_v34 = vld [vmem:[%s3871_s20 + $0x50] sm:$0xff] (%p3631_p10)  }
 0x36e   : > { %1881 = vst [vmem:[%s4745_s13 + $0x108] sm:$0xff] (%p3631_p10), %v1880_v12   ;;  %1885 = vst [vmem:[%s4745_s13 + $0x110] sm:$0xff] (%p3631_p10), %v1884_v34  }
 0x370   : > { %v1380_v16 = vpop.permute.xlu1 %1379  ;;  %v1240_v29 = vpop.permute.xlu0 %1239 }
 0x371   : > { %3008 = vst.msk [vmem:[%s3898_s3 + $0x74] sm:$0xf] %vm1062_vm0, %v1380_v16  ;;  %2971 = vst.msk [vmem:[%s3871_s20 + $0x60] sm:$0xf] %vm1062_vm0, %v1240_v29  ;;  %v1888_v16 = vld [vmem:[%s3871_s20 + $0x58] sm:$0xff] (%p3631_p10)  }
 0x372   : > { %1889 = vst [vmem:[%s4745_s13 + $0x118] sm:$0xff] (%p3631_p10), %v1888_v16  }
 0x374   : > { %v1575_v57 = vpop.permute.xlu1 %1574  ;;  %v1435_v22 = vpop.permute.xlu0 %1434 }
 0x375   : > { %3056 = vst.msk [vmem:[%s3898_s3 + $0xb4] sm:$0xf] %vm1062_vm0, %v1575_v57  ;;  %3019 = vst.msk [vmem:[%s3871_s20 + $0xa0] sm:$0xf] %vm1062_vm0, %v1435_v22 }
 0x378   : > { %v1770_v56 = vpop.permute.xlu1 %1769  ;;  %v1630_v42 = vpop.permute.xlu0 %1629 }
 0x379   : > { %3104 = vst.msk [vmem:[%s3898_s3 + $0xf4] sm:$0xf] %vm1062_vm0, %v1770_v56  ;;  %3067 = vst.msk [vmem:[%s3871_s20 + $0xe0] sm:$0xf] %vm1062_vm0, %v1630_v42  ;;  %v1908_v42 = vld [vmem:[%s3871_s20 + $0x80] sm:$0xff] (%p3631_p10)  }
 0x37a   : > { %1909 = vst [vmem:[%s4745_s13 + $0x200] sm:$0xff] (%p3631_p10), %v1908_v42  }
 0x37c   : > { %v1242_v33 = vpop.permute.xlu1 %1241  ;;  %v1305_v3 = vpop.permute.xlu0 %1304 }
 0x37d   : > { %2972 = vst.msk [vmem:[%s3871_s20 + $0x64] sm:$0xf] %vm1062_vm0, %v1242_v33  ;;  %2987 = vst.msk [vmem:[%s3881_s24 + $0x60] sm:$0xf] %vm1062_vm0, %v1305_v3  ;;  %v1912_v33 = vld [vmem:[%s3871_s20 + $0x88] sm:$0xff] (%p3631_p10)   ;;  %v1916_v3 = vld [vmem:[%s3871_s20 + $0x90] sm:$0xff] (%p3631_p10)  }
 0x37e   : > { %1913 = vst [vmem:[%s4745_s13 + $0x208] sm:$0xff] (%p3631_p10), %v1912_v33   ;;  %1917 = vst [vmem:[%s4745_s13 + $0x210] sm:$0xff] (%p3631_p10), %v1916_v3  }
 0x380   : > { %v1437_v44 = vpop.permute.xlu1 %1436  ;;  %v1500_v49 = vpop.permute.xlu0 %1499 }
 0x381   : > { %3020 = vst.msk [vmem:[%s3871_s20 + $0xa4] sm:$0xf] %vm1062_vm0, %v1437_v44  ;;  %3035 = vst.msk [vmem:[%s3881_s24 + $0xa0] sm:$0xf] %vm1062_vm0, %v1500_v49  ;;  %v1920_v44 = vld [vmem:[%s3871_s20 + $0x98] sm:$0xff] (%p3631_p10)  }
 0x382   : > { %1921 = vst [vmem:[%s4745_s13 + $0x218] sm:$0xff] (%p3631_p10), %v1920_v44  }
 0x384   : > { %v1632_v51 = vpop.permute.xlu1 %1631  ;;  %v1695_v43 = vpop.permute.xlu0 %1694  ;;  %v1892_v29 = vld [vmem:[%s3871_s20 + $0x60] sm:$0xff] (%p3631_p10)  }
 0x385   : > { %3068 = vst.msk [vmem:[%s3871_s20 + $0xe4] sm:$0xf] %vm1062_vm0, %v1632_v51  ;;  %3083 = vst.msk [vmem:[%s3881_s24 + $0xe0] sm:$0xf] %vm1062_vm0, %v1695_v43 }
 0x386   : > { %1893 = vst [vmem:[%s4745_s13 + $0x120] sm:$0xff] (%p3631_p10), %v1892_v29  }
 0x388   : > { %v1307_v4 = vpop.permute.xlu1 %1306  ;;  %v1244_v55 = vpop.permute.xlu0 %1243  ;;  %v1924_v49 = vld [vmem:[%s3871_s20 + $0xa0] sm:$0xff] (%p3631_p10)  }
 0x389   : > { %2988 = vst.msk [vmem:[%s3881_s24 + $0x64] sm:$0xf] %vm1062_vm0, %v1307_v4  ;;  %2973 = vst.msk [vmem:[%s3871_s20 + $0x68] sm:$0xf] %vm1062_vm0, %v1244_v55  ;;  %v1940_v55 = vld [vmem:[%s3871_s20 + $0xc0] sm:$0xff] (%p3631_p10)  }
 0x38a   : > { %1925 = vst [vmem:[%s4745_s13 + $0x220] sm:$0xff] (%p3631_p10), %v1924_v49   ;;  %1941 = vst [vmem:[%s4745_s13 + $0x300] sm:$0xff] (%p3631_p10), %v1940_v55  }
 0x38c   : > { %v1502_v32 = vpop.permute.xlu1 %1501  ;;  %v1439_v59 = vpop.permute.xlu0 %1438 }
 0x38d   : > { %3036 = vst.msk [vmem:[%s3881_s24 + $0xa4] sm:$0xf] %vm1062_vm0, %v1502_v32  ;;  %3021 = vst.msk [vmem:[%s3871_s20 + $0xa8] sm:$0xf] %vm1062_vm0, %v1439_v59  ;;  %v1944_v32 = vld [vmem:[%s3871_s20 + $0xc8] sm:$0xff] (%p3631_p10)   ;;  %v1948_v59 = vld [vmem:[%s3871_s20 + $0xd0] sm:$0xff] (%p3631_p10)  }
 0x38e   : > { %1945 = vst [vmem:[%s4745_s13 + $0x308] sm:$0xff] (%p3631_p10), %v1944_v32   ;;  %1949 = vst [vmem:[%s4745_s13 + $0x310] sm:$0xff] (%p3631_p10), %v1948_v59  }
 0x390   : > { %v1697_v11 = vpop.permute.xlu1 %1696  ;;  %v1634_v62 = vpop.permute.xlu0 %1633 }
 0x391   : > { %3084 = vst.msk [vmem:[%s3881_s24 + $0xe4] sm:$0xf] %vm1062_vm0, %v1697_v11  ;;  %3069 = vst.msk [vmem:[%s3871_s20 + $0xe8] sm:$0xf] %vm1062_vm0, %v1634_v62  ;;  %v1952_v11 = vld [vmem:[%s3871_s20 + $0xd8] sm:$0xff] (%p3631_p10)   ;;  %v1956_v62 = vld [vmem:[%s3871_s20 + $0xe0] sm:$0xff] (%p3631_p10)  }
 0x392   : > { %1953 = vst [vmem:[%s4745_s13 + $0x318] sm:$0xff] (%p3631_p10), %v1952_v11   ;;  %1957 = vst [vmem:[%s4745_s13 + $0x320] sm:$0xff] (%p3631_p10), %v1956_v62  }
 0x394   : > { %v1246_v36 = vpop.permute.xlu1 %1245  ;;  %v1309_v14 = vpop.permute.xlu0 %1308 }
 0x395   : > { %2974 = vst.msk [vmem:[%s3871_s20 + $0x6c] sm:$0xf] %vm1062_vm0, %v1246_v36  ;;  %2989 = vst.msk [vmem:[%s3881_s24 + $0x68] sm:$0xf] %vm1062_vm0, %v1309_v14 }
 0x398   : > { %v1441_v63 = vpop.permute.xlu1 %1440  ;;  %v1504_v1 = vpop.permute.xlu0 %1503 }
 0x399   : > { %3022 = vst.msk [vmem:[%s3871_s20 + $0xac] sm:$0xf] %vm1062_vm0, %v1441_v63  ;;  %3037 = vst.msk [vmem:[%s3881_s24 + $0xa8] sm:$0xf] %vm1062_vm0, %v1504_v1 }
 0x39c   : > { %v1636_v13 = vpop.permute.xlu1 %1635  ;;  %v1699_v31 = vpop.permute.xlu0 %1698  ;;  %v1896_v57 = vld [vmem:[%s3871_s20 + $0x68] sm:$0xff] (%p3631_p10)  }
 0x39d   : > { %3070 = vst.msk [vmem:[%s3871_s20 + $0xec] sm:$0xf] %vm1062_vm0, %v1636_v13  ;;  %3085 = vst.msk [vmem:[%s3881_s24 + $0xe8] sm:$0xf] %vm1062_vm0, %v1699_v31 }
 0x39e   : > { %1897 = vst [vmem:[%s4745_s13 + $0x128] sm:$0xff] (%p3631_p10), %v1896_v57  }
 0x3a0   : > { %v1311_v40 = vpop.permute.xlu1 %1310  ;;  %v1248_v45 = vpop.permute.xlu0 %1247  ;;  %v1928_v51 = vld [vmem:[%s3871_s20 + $0xa8] sm:$0xff] (%p3631_p10)  }
 0x3a1   : > { %2990 = vst.msk [vmem:[%s3881_s24 + $0x6c] sm:$0xf] %vm1062_vm0, %v1311_v40  ;;  %2975 = vst.msk [vmem:[%s3871_s20 + $0x70] sm:$0xf] %vm1062_vm0, %v1248_v45 }
 0x3a2   : > { %1929 = vst [vmem:[%s4745_s13 + $0x228] sm:$0xff] (%p3631_p10), %v1928_v51  }
 0x3a4   : > { %v1506_v2 = vpop.permute.xlu1 %1505  ;;  %v1443_v50 = vpop.permute.xlu0 %1442  ;;  %v1960_v36 = vld [vmem:[%s3871_s20 + $0xe8] sm:$0xff] (%p3631_p10)  }
 0x3a5   : > { %3038 = vst.msk [vmem:[%s3881_s24 + $0xac] sm:$0xf] %vm1062_vm0, %v1506_v2  ;;  %3023 = vst.msk [vmem:[%s3871_s20 + $0xb0] sm:$0xf] %vm1062_vm0, %v1443_v50 }
 0x3a6   : > { %1961 = vst [vmem:[%s4745_s13 + $0x328] sm:$0xff] (%p3631_p10), %v1960_v36  }
 0x3a8   : > { %v1701_v7 = vpop.permute.xlu1 %1700  ;;  %v1638_v53 = vpop.permute.xlu0 %1637 }
 0x3a9   : > { %3086 = vst.msk [vmem:[%s3881_s24 + $0xec] sm:$0xf] %vm1062_vm0, %v1701_v7  ;;  %3071 = vst.msk [vmem:[%s3871_s20 + $0xf0] sm:$0xf] %vm1062_vm0, %v1638_v53 }
 0x3ac   : > { %v1250_v30 = vpop.permute.xlu1 %1249  ;;  %v1313_v23 = vpop.permute.xlu0 %1312 }
 0x3ad   : > { %2976 = vst.msk [vmem:[%s3871_s20 + $0x74] sm:$0xf] %vm1062_vm0, %v1250_v30  ;;  %2991 = vst.msk [vmem:[%s3881_s24 + $0x70] sm:$0xf] %vm1062_vm0, %v1313_v23 }
 0x3b0   : > { %v1445_v21 = vpop.permute.xlu1 %1444  ;;  %v1508_v19 = vpop.permute.xlu0 %1507 }
 0x3b1   : > { %3024 = vst.msk [vmem:[%s3871_s20 + $0xb4] sm:$0xf] %vm1062_vm0, %v1445_v21  ;;  %3039 = vst.msk [vmem:[%s3881_s24 + $0xb0] sm:$0xf] %vm1062_vm0, %v1508_v19 }
 0x3b4   : > { %v1640_v39 = vpop.permute.xlu1 %1639  ;;  %v1703_v61 = vpop.permute.xlu0 %1702  ;;  %v1900_v22 = vld [vmem:[%s3871_s20 + $0x70] sm:$0xff] (%p3631_p10)  }
 0x3b5   : > { %3072 = vst.msk [vmem:[%s3871_s20 + $0xf4] sm:$0xf] %vm1062_vm0, %v1640_v39  ;;  %3087 = vst.msk [vmem:[%s3881_s24 + $0xf0] sm:$0xf] %vm1062_vm0, %v1703_v61 }
 0x3b6   : > { %1901 = vst [vmem:[%s4745_s13 + $0x130] sm:$0xff] (%p3631_p10), %v1900_v22  }
 0x3b8   : > { %v1315_v25 = vpop.permute.xlu1 %1314  ;;  %v1252_v0 = vpop.permute.xlu0 %1251  ;;  %v1932_v43 = vld [vmem:[%s3871_s20 + $0xb0] sm:$0xff] (%p3631_p10)  }
 0x3b9   : > { %2992 = vst.msk [vmem:[%s3881_s24 + $0x74] sm:$0xf] %vm1062_vm0, %v1315_v25  ;;  %2977 = vst.msk [vmem:[%s3871_s20 + $0x78] sm:$0xf] %vm1062_vm0, %v1252_v0 }
 0x3ba   : > { %1933 = vst [vmem:[%s4745_s13 + $0x230] sm:$0xff] (%p3631_p10), %v1932_v43  }
 0x3bc   : > { %v1510_v27 = vpop.permute.xlu1 %1509  ;;  %v1447_v48 = vpop.permute.xlu0 %1446  ;;  %v1964_v14 = vld [vmem:[%s3871_s20 + $0xf0] sm:$0xff] (%p3631_p10)  }
 0x3bd   : > { %3040 = vst.msk [vmem:[%s3881_s24 + $0xb4] sm:$0xf] %vm1062_vm0, %v1510_v27  ;;  %3025 = vst.msk [vmem:[%s3871_s20 + $0xb8] sm:$0xf] %vm1062_vm0, %v1447_v48 }
 0x3be   : > { %1965 = vst [vmem:[%s4745_s13 + $0x330] sm:$0xff] (%p3631_p10), %v1964_v14  }
 0x3c0   : > { %v1705_v47 = vpop.permute.xlu1 %1704  ;;  %v1642_v8 = vpop.permute.xlu0 %1641 }
 0x3c1   : > { %3088 = vst.msk [vmem:[%s3881_s24 + $0xf4] sm:$0xf] %vm1062_vm0, %v1705_v47  ;;  %3073 = vst.msk [vmem:[%s3871_s20 + $0xf8] sm:$0xf] %vm1062_vm0, %v1642_v8 }
 0x3c4   : > { %v1254_v26 = vpop.permute.xlu1 %1253  ;;  %v1317_v18 = vpop.permute.xlu0 %1316 }
 0x3c5   : > { %2978 = vst.msk [vmem:[%s3871_s20 + $0x7c] sm:$0xf] %vm1062_vm0, %v1254_v26  ;;  %2993 = vst.msk [vmem:[%s3881_s24 + $0x78] sm:$0xf] %vm1062_vm0, %v1317_v18 }
 0x3c8   : > { %v1449_v58 = vpop.permute.xlu1 %1448  ;;  %v1512_v5 = vpop.permute.xlu0 %1511 }
 0x3c9   : > { %3026 = vst.msk [vmem:[%s3871_s20 + $0xbc] sm:$0xf] %vm1062_vm0, %v1449_v58  ;;  %3041 = vst.msk [vmem:[%s3881_s24 + $0xb8] sm:$0xf] %vm1062_vm0, %v1512_v5 }
 0x3cc   : > { %v1644_v41 = vpop.permute.xlu1 %1643  ;;  %v1707_v6 = vpop.permute.xlu0 %1706  ;;  %v1904_v56 = vld [vmem:[%s3871_s20 + $0x78] sm:$0xff] (%p3631_p10)  }
 0x3cd   : > { %3074 = vst.msk [vmem:[%s3871_s20 + $0xfc] sm:$0xf] %vm1062_vm0, %v1644_v41  ;;  %3089 = vst.msk [vmem:[%s3881_s24 + $0xf8] sm:$0xf] %vm1062_vm0, %v1707_v6 }
 0x3ce   : > { %1905 = vst [vmem:[%s4745_s13 + $0x138] sm:$0xff] (%p3631_p10), %v1904_v56  }
 0x3d0   : > { %v1319_v9 = vpop.permute.xlu1 %1318  ;;  %v1772_v35 = vpop.permute.xlu0 %1771  ;;  %v1936_v4 = vld [vmem:[%s3871_s20 + $0xb8] sm:$0xff] (%p3631_p10)  }
 0x3d1   : > { %2994 = vst.msk [vmem:[%s3881_s24 + $0x7c] sm:$0xf] %vm1062_vm0, %v1319_v9  ;;  %3105 = vst.msk [vmem:[%s3898_s3 + $0xf8] sm:$0xf] %vm1062_vm0, %v1772_v35 }
 0x3d2   : > { %1937 = vst [vmem:[%s4745_s13 + $0x238] sm:$0xff] (%p3631_p10), %v1936_v4  }
 0x3d4   : > { %v1514_v52 = vpop.permute.xlu1 %1513  ;;  %v1968_v63 = vld [vmem:[%s3871_s20 + $0xf8] sm:$0xff] (%p3631_p10)  }
 0x3d5   : > { %3042 = vst.msk [vmem:[%s3881_s24 + $0xbc] sm:$0xf] %vm1062_vm0, %v1514_v52  ;;  %1969 = vst [vmem:[%s4745_s13 + $0x338] sm:$0xff] (%p3631_p10), %v1968_v63  }
 0x3d8   : > { %v1709_v17 = vpop.permute.xlu1 %1708 }
 0x3d9   : > { %3090 = vst.msk [vmem:[%s3881_s24 + $0xfc] sm:$0xf] %vm1062_vm0, %v1709_v17  ;;  %1822 = sbr.rel (!%p3631_p10) target bundleno = 990 (0x3de), region = 52 }
 0x3dc   : > { %v1774_v54 = vpop.permute.xlu1 %1773 }
 0x3dd   : > { %3106 = vst.msk [vmem:[%s3898_s3 + $0xfc] sm:$0xf] %vm1062_vm0, %v1774_v54 }
 0x3de PF: > { %2123 = sbr.rel (!%p3631_p10) target bundleno = 1017 (0x3f9), region = 93  ;;  %s5005_s18 = sld [smem:[#allocation11_spill]] (%p3631_p10)  ;;  %v2145_v1 = vld [vmem:[%s3881_s24] sm:$0xff] (%p3631_p10)   ;;  %v2149_v13 = vld [vmem:[%s3881_s24 + $0x8] sm:$0xff] (%p3631_p10)   ;;  %v2153_v31 = vld [vmem:[%s3881_s24 + $0x10] sm:$0xff] (%p3631_p10)  }
 0x3df   : > { %s5006_s19 = sld [smem:[#allocation12_spill]] (%p3631_p10)  ;;  %v2157_v40 = vld [vmem:[%s3881_s24 + $0x18] sm:$0xff] (%p3631_p10)   ;;  %v2161_v45 = vld [vmem:[%s3881_s24 + $0x20] sm:$0xff] (%p3631_p10)   ;;  %v2165_v2 = vld [vmem:[%s3881_s24 + $0x28] sm:$0xff] (%p3631_p10)  }
 0x3e0   : > { %v2169_v50 = vld [vmem:[%s3881_s24 + $0x30] sm:$0xff] (%p3631_p10)   ;;  %v2173_v7 = vld [vmem:[%s3881_s24 + $0x38] sm:$0xff] (%p3631_p10)   ;;  %v2177_v53 = vld [vmem:[%s3881_s24 + $0x40] sm:$0xff] (%p3631_p10)   ;;  %s5007_s6 = sld [smem:[#allocation17_spill]] (%p3631_p10) }
 0x3e1   : > { %v2181_v30 = vld [vmem:[%s3881_s24 + $0x48] sm:$0xff] (%p3631_p10)   ;;  %v2185_v23 = vld [vmem:[%s3881_s24 + $0x50] sm:$0xff] (%p3631_p10)   ;;  %v2189_v21 = vld [vmem:[%s3881_s24 + $0x58] sm:$0xff] (%p3631_p10)  }
 0x3e2   : > { %v2193_v19 = vld [vmem:[%s3881_s24 + $0x60] sm:$0xff] (%p3631_p10)   ;;  %v2197_v39 = vld [vmem:[%s3881_s24 + $0x68] sm:$0xff] (%p3631_p10)   ;;  %v2201_v61 = vld [vmem:[%s3881_s24 + $0x70] sm:$0xff] (%p3631_p10)  }
 0x3e3   : > { %v2205_v25 = vld [vmem:[%s3881_s24 + $0x78] sm:$0xff]   ;;  %v2209_v0 = vld [vmem:[%s3881_s24 + $0x80] sm:$0xff]   ;;  %v2213_v27 = vld [vmem:[%s3881_s24 + $0x88] sm:$0xff]  }
 0x3e4   : > { %s3113_s20 = sshll.u32 %s5005_s18, 4  ;;  %v2217_v48 = vld [vmem:[%s3881_s24 + $0x90] sm:$0xff]   ;;  %v2221_v47 = vld [vmem:[%s3881_s24 + $0x98] sm:$0xff]   ;;  %v2225_v8 = vld [vmem:[%s3881_s24 + $0xa0] sm:$0xff]  }
 0x3e5   : > { %s3114_s11 = sshll.u32 %s5006_s19, 8  ;;  %v2229_v26 = vld [vmem:[%s3881_s24 + $0xa8] sm:$0xff]   ;;  %v2233_v18 = vld [vmem:[%s3881_s24 + $0xb0] sm:$0xff]   ;;  %v2237_v58 = vld [vmem:[%s3881_s24 + $0xb8] sm:$0xff]  }
 0x3e6   : > { %s2126_s16 = sadd.s32 %s3114_s11, %s3113_s20  ;;  %v2241_v5 = vld [vmem:[%s3881_s24 + $0xc0] sm:$0xff]   ;;  %v2245_v41 = vld [vmem:[%s3881_s24 + $0xc8] sm:$0xff]   ;;  %v2249_v6 = vld [vmem:[%s3881_s24 + $0xd0] sm:$0xff]  }
 0x3e7   : > { %s3115_s21 = sshll.u32 %s2126_s16, 2  ;;  %v2253_v9 = vld [vmem:[%s3881_s24 + $0xd8] sm:$0xff]   ;;  %v2257_v35 = vld [vmem:[%s3881_s24 + $0xe0] sm:$0xff]   ;;  %v2261_v52 = vld [vmem:[%s3881_s24 + $0xe8] sm:$0xff]  }
 0x3e8   : > { %s4818_s28 = scalar_lea.vmem %s5007_s6, %s3115_s21  ;;  %v2265_v17 = vld [vmem:[%s3881_s24 + $0xf0] sm:$0xff]   ;;  %v2269_v54 = vld [vmem:[%s3881_s24 + $0xf8] sm:$0xff]  }
 0x3e9   : > { %2146 = vst [vmem:[%s4818_s28] sm:$0xff] %v2145_v1   ;;  %2150 = vst [vmem:[%s4818_s28 + $0x8] sm:$0xff] %v2149_v13  }
 0x3ea   : > { %2154 = vst [vmem:[%s4818_s28 + $0x10] sm:$0xff] %v2153_v31   ;;  %2158 = vst [vmem:[%s4818_s28 + $0x18] sm:$0xff] %v2157_v40  }
 0x3eb   : > { %2162 = vst [vmem:[%s4818_s28 + $0x20] sm:$0xff] %v2161_v45   ;;  %2166 = vst [vmem:[%s4818_s28 + $0x28] sm:$0xff] %v2165_v2  }
 0x3ec   : > { %2170 = vst [vmem:[%s4818_s28 + $0x30] sm:$0xff] %v2169_v50   ;;  %2174 = vst [vmem:[%s4818_s28 + $0x38] sm:$0xff] %v2173_v7  }
 0x3ed   : > { %2178 = vst [vmem:[%s4818_s28 + $0x100] sm:$0xff] %v2177_v53   ;;  %2182 = vst [vmem:[%s4818_s28 + $0x108] sm:$0xff] %v2181_v30  }
 0x3ee   : > { %2186 = vst [vmem:[%s4818_s28 + $0x110] sm:$0xff] %v2185_v23   ;;  %2190 = vst [vmem:[%s4818_s28 + $0x118] sm:$0xff] %v2189_v21  }
 0x3ef   : > { %2194 = vst [vmem:[%s4818_s28 + $0x120] sm:$0xff] %v2193_v19   ;;  %2198 = vst [vmem:[%s4818_s28 + $0x128] sm:$0xff] %v2197_v39  }
 0x3f0   : > { %2202 = vst [vmem:[%s4818_s28 + $0x130] sm:$0xff] %v2201_v61   ;;  %2206 = vst [vmem:[%s4818_s28 + $0x138] sm:$0xff] %v2205_v25  }
 0x3f1   : > { %2210 = vst [vmem:[%s4818_s28 + $0x200] sm:$0xff] %v2209_v0   ;;  %2214 = vst [vmem:[%s4818_s28 + $0x208] sm:$0xff] %v2213_v27  }
 0x3f2   : > { %2218 = vst [vmem:[%s4818_s28 + $0x210] sm:$0xff] %v2217_v48   ;;  %2222 = vst [vmem:[%s4818_s28 + $0x218] sm:$0xff] %v2221_v47  }
 0x3f3   : > { %2226 = vst [vmem:[%s4818_s28 + $0x220] sm:$0xff] %v2225_v8   ;;  %2230 = vst [vmem:[%s4818_s28 + $0x228] sm:$0xff] %v2229_v26  }
 0x3f4   : > { %2234 = vst [vmem:[%s4818_s28 + $0x230] sm:$0xff] %v2233_v18   ;;  %2238 = vst [vmem:[%s4818_s28 + $0x238] sm:$0xff] %v2237_v58  }
 0x3f5   : > { %2242 = vst [vmem:[%s4818_s28 + $0x300] sm:$0xff] %v2241_v5   ;;  %2246 = vst [vmem:[%s4818_s28 + $0x308] sm:$0xff] %v2245_v41  }
 0x3f6   : > { %2250 = vst [vmem:[%s4818_s28 + $0x310] sm:$0xff] %v2249_v6   ;;  %2254 = vst [vmem:[%s4818_s28 + $0x318] sm:$0xff] %v2253_v9  }
 0x3f7   : > { %2258 = vst [vmem:[%s4818_s28 + $0x320] sm:$0xff] %v2257_v35   ;;  %2262 = vst [vmem:[%s4818_s28 + $0x328] sm:$0xff] %v2261_v52  }
 0x3f8   : > { %2266 = vst [vmem:[%s4818_s28 + $0x330] sm:$0xff] %v2265_v17   ;;  %2270 = vst [vmem:[%s4818_s28 + $0x338] sm:$0xff] %v2269_v54  }
 0x3f9 PF: > { %2424 = sbr.rel (!%p3631_p10) target bundleno = 1044 (0x414), region = 134  ;;  %s5009_s15 = sld [smem:[#allocation11_spill]] (%p3631_p10)  ;;  %v2446_v20 = vld [vmem:[%s3898_s3] sm:$0xff] (%p3631_p10)   ;;  %v2450_v28 = vld [vmem:[%s3898_s3 + $0x8] sm:$0xff] (%p3631_p10)   ;;  %v2454_v10 = vld [vmem:[%s3898_s3 + $0x10] sm:$0xff] (%p3631_p10)  }
 0x3fa   : > { %s5010_s17 = sld [smem:[#allocation12_spill]] (%p3631_p10)  ;;  %v2458_v24 = vld [vmem:[%s3898_s3 + $0x18] sm:$0xff] (%p3631_p10)   ;;  %v2462_v38 = vld [vmem:[%s3898_s3 + $0x20] sm:$0xff] (%p3631_p10)   ;;  %v2466_v60 = vld [vmem:[%s3898_s3 + $0x28] sm:$0xff] (%p3631_p10)  }
 0x3fb   : > { %v2470_v15 = vld [vmem:[%s3898_s3 + $0x30] sm:$0xff] (%p3631_p10)   ;;  %v2474_v37 = vld [vmem:[%s3898_s3 + $0x38] sm:$0xff] (%p3631_p10)   ;;  %v2478_v46 = vld [vmem:[%s3898_s3 + $0x40] sm:$0xff] (%p3631_p10)   ;;  %s5011_s18 = sld [smem:[#allocation18_spill]] (%p3631_p10) }
 0x3fc   : > { %v2482_v12 = vld [vmem:[%s3898_s3 + $0x48] sm:$0xff] (%p3631_p10)   ;;  %v2486_v34 = vld [vmem:[%s3898_s3 + $0x50] sm:$0xff] (%p3631_p10)   ;;  %v2490_v16 = vld [vmem:[%s3898_s3 + $0x58] sm:$0xff] (%p3631_p10)  }
 0x3fd   : > { %v2494_v29 = vld [vmem:[%s3898_s3 + $0x60] sm:$0xff] (%p3631_p10)   ;;  %v2498_v57 = vld [vmem:[%s3898_s3 + $0x68] sm:$0xff] (%p3631_p10)   ;;  %v2502_v22 = vld [vmem:[%s3898_s3 + $0x70] sm:$0xff] (%p3631_p10)  }
 0x3fe   : > { %v2506_v56 = vld [vmem:[%s3898_s3 + $0x78] sm:$0xff]   ;;  %v2510_v42 = vld [vmem:[%s3898_s3 + $0x80] sm:$0xff]   ;;  %v2514_v33 = vld [vmem:[%s3898_s3 + $0x88] sm:$0xff]  }
 0x3ff   : > { %s3116_s24 = sshll.u32 %s5009_s15, 4  ;;  %v2518_v3 = vld [vmem:[%s3898_s3 + $0x90] sm:$0xff]   ;;  %v2522_v44 = vld [vmem:[%s3898_s3 + $0x98] sm:$0xff]   ;;  %v2526_v49 = vld [vmem:[%s3898_s3 + $0xa0] sm:$0xff]  }
 0x400   : > { %s3117_s27 = sshll.u32 %s5010_s17, 8  ;;  %v2530_v51 = vld [vmem:[%s3898_s3 + $0xa8] sm:$0xff]   ;;  %v2534_v43 = vld [vmem:[%s3898_s3 + $0xb0] sm:$0xff]   ;;  %v2538_v4 = vld [vmem:[%s3898_s3 + $0xb8] sm:$0xff]  }
 0x401   : > { %s2427_s10 = sadd.s32 %s3117_s27, %s3116_s24  ;;  %v2542_v55 = vld [vmem:[%s3898_s3 + $0xc0] sm:$0xff]   ;;  %v2546_v32 = vld [vmem:[%s3898_s3 + $0xc8] sm:$0xff]   ;;  %v2550_v59 = vld [vmem:[%s3898_s3 + $0xd0] sm:$0xff]  }
 0x402   : > { %s3118_s12 = sshll.u32 %s2427_s10, 2  ;;  %v2554_v11 = vld [vmem:[%s3898_s3 + $0xd8] sm:$0xff]   ;;  %v2558_v62 = vld [vmem:[%s3898_s3 + $0xe0] sm:$0xff]   ;;  %v2562_v36 = vld [vmem:[%s3898_s3 + $0xe8] sm:$0xff]  }
 0x403   : > { %s4891_s19 = scalar_lea.vmem %s5011_s18, %s3118_s12  ;;  %v2566_v14 = vld [vmem:[%s3898_s3 + $0xf0] sm:$0xff]   ;;  %v2570_v63 = vld [vmem:[%s3898_s3 + $0xf8] sm:$0xff]  }
 0x404   : > { %2447 = vst [vmem:[%s4891_s19] sm:$0xff] %v2446_v20   ;;  %2451 = vst [vmem:[%s4891_s19 + $0x8] sm:$0xff] %v2450_v28  }
 0x405   : > { %2455 = vst [vmem:[%s4891_s19 + $0x10] sm:$0xff] %v2454_v10   ;;  %2459 = vst [vmem:[%s4891_s19 + $0x18] sm:$0xff] %v2458_v24  }
 0x406   : > { %2463 = vst [vmem:[%s4891_s19 + $0x20] sm:$0xff] %v2462_v38   ;;  %2467 = vst [vmem:[%s4891_s19 + $0x28] sm:$0xff] %v2466_v60  }
 0x407   : > { %2471 = vst [vmem:[%s4891_s19 + $0x30] sm:$0xff] %v2470_v15   ;;  %2475 = vst [vmem:[%s4891_s19 + $0x38] sm:$0xff] %v2474_v37  }
 0x408   : > { %2479 = vst [vmem:[%s4891_s19 + $0x100] sm:$0xff] %v2478_v46   ;;  %2483 = vst [vmem:[%s4891_s19 + $0x108] sm:$0xff] %v2482_v12  }
 0x409   : > { %2487 = vst [vmem:[%s4891_s19 + $0x110] sm:$0xff] %v2486_v34   ;;  %2491 = vst [vmem:[%s4891_s19 + $0x118] sm:$0xff] %v2490_v16  }
 0x40a   : > { %2495 = vst [vmem:[%s4891_s19 + $0x120] sm:$0xff] %v2494_v29   ;;  %2499 = vst [vmem:[%s4891_s19 + $0x128] sm:$0xff] %v2498_v57  }
 0x40b   : > { %2503 = vst [vmem:[%s4891_s19 + $0x130] sm:$0xff] %v2502_v22   ;;  %2507 = vst [vmem:[%s4891_s19 + $0x138] sm:$0xff] %v2506_v56  }
 0x40c   : > { %2511 = vst [vmem:[%s4891_s19 + $0x200] sm:$0xff] %v2510_v42   ;;  %2515 = vst [vmem:[%s4891_s19 + $0x208] sm:$0xff] %v2514_v33  }
 0x40d   : > { %2519 = vst [vmem:[%s4891_s19 + $0x210] sm:$0xff] %v2518_v3   ;;  %2523 = vst [vmem:[%s4891_s19 + $0x218] sm:$0xff] %v2522_v44  }
 0x40e   : > { %2527 = vst [vmem:[%s4891_s19 + $0x220] sm:$0xff] %v2526_v49   ;;  %2531 = vst [vmem:[%s4891_s19 + $0x228] sm:$0xff] %v2530_v51  }
 0x40f   : > { %2535 = vst [vmem:[%s4891_s19 + $0x230] sm:$0xff] %v2534_v43   ;;  %2539 = vst [vmem:[%s4891_s19 + $0x238] sm:$0xff] %v2538_v4  }
 0x410   : > { %2543 = vst [vmem:[%s4891_s19 + $0x300] sm:$0xff] %v2542_v55   ;;  %2547 = vst [vmem:[%s4891_s19 + $0x308] sm:$0xff] %v2546_v32  }
 0x411   : > { %2551 = vst [vmem:[%s4891_s19 + $0x310] sm:$0xff] %v2550_v59   ;;  %2555 = vst [vmem:[%s4891_s19 + $0x318] sm:$0xff] %v2554_v11  }
 0x412   : > { %2559 = vst [vmem:[%s4891_s19 + $0x320] sm:$0xff] %v2558_v62   ;;  %2563 = vst [vmem:[%s4891_s19 + $0x328] sm:$0xff] %v2562_v36  }
 0x413   : > { %2567 = vst [vmem:[%s4891_s19 + $0x330] sm:$0xff] %v2566_v14   ;;  %2571 = vst [vmem:[%s4891_s19 + $0x338] sm:$0xff] %v2570_v63  }
 0x414 PF: > { %s22_s8 = sadd.s32 1, %s3495_s8   ;;  %s5012_s20 = sld [smem:[#allocation13_spill]] }
 0x415   : > { %p19_p1 = scmp.ge.s32.totalorder %s22_s8, 10   ;;  %s5013_s24 = smov %s3471_s25 }
 0x416   : > { %s5014_s25 = smov %s3475_s26  ;;  %s5015_s26 = smov %s3644_s7 }
 0x417   : > { %s5016_s27 = smov %s3487_s29  ;;  %s5017_s28 = smov %s3491_s30 }
 0x418   : > { %s5019_s30 = smov %s5025_s22  ;;  %21 = sbr.rel (!%p19_p1) target bundleno = 11 (0xb), region = 240 }
 0x41a   : > { %s5018_s29 = smov %s5012_s20 }
 0x41d   :  { %2749 = vsyncpa [#allocation3], 1 }
 0x41e   :  { %2751 = vsyncpa [#allocation3 + $0x1], 1 }
 0x41f   :  { %2752 = vsyncpa [#allocation5], 1 }

</bundles_post_ra>
